<compile_context>
chip_gen: v7x
topology: tpu7x:2x2x1
jax: 0.10.0
libtpu: 0.0.40
codegen_flags: <defaults>
</compile_context>

<pallas_src>
import functools

import jax
import jax.numpy as jnp
from jax.experimental import pallas as pl
from jax.experimental.pallas import tpu as pltpu

EPS = 1e-5                    # PyTorch BatchNorm1d default
OUT_DIM = 5                   # real head width
HEAD_COLS = 8                 # padded head width actually written to HBM
OUT_PAD = 128                 # lane-dense padded width used for the head matmul
MATMUL_DTYPE = jnp.bfloat16   # MXU operand dtype (set jnp.float32 for full-f32 matmuls)


def _round_up(v, m):
    return ((v + m - 1) // m) * m


# --------------------------------------------------------------------------- BN helpers
def _bn_scale(sum_ref, sq_ref, g_ref, n_rows):
    """gamma * rsqrt(var + eps) from accumulated sum / sumsq (biased variance)."""
    inv_n = 1.0 / float(n_rows)
    mean = sum_ref[...] * inv_n
    var = jnp.maximum(sq_ref[...] * inv_n - mean * mean, 0.0)
    return g_ref[...] * jax.lax.rsqrt(var + EPS)


def _bn_scale_shift(sum_ref, sq_ref, g_ref, b_ref, n_rows):
    """Fused training-mode BN affine: y = x*scale + shift."""
    inv_n = 1.0 / float(n_rows)
    mean = sum_ref[...] * inv_n
    var = jnp.maximum(sq_ref[...] * inv_n - mean * mean, 0.0)
    scale = g_ref[...] * jax.lax.rsqrt(var + EPS)
    shift = b_ref[...] - mean * scale
    return scale, shift


# --------------------------------------------------------------------------- fused kernel
def _fused_mlp_kernel(x_ref, g0_ref, w1_ref, g1_ref, bt1_ref, w2_ref,
                      g2_ref, bt2_ref, w3_ref, b3_ref,
                      o_ref,
                      x_vmem, h1_vmem, h2_vmem,
                      xsum, xsq, h1sum, h1sq, h2sum, h2sq,
                      *, n_rows, block_rows, mask_pad, out_cols):
    p = pl.program_id(0)           # phase
    i = pl.program_id(1)           # batch tile
    row0 = pl.multiple_of(i * block_rows, block_rows)
    rows = pl.ds(row0, block_rows)

    # ---------------- init stats accumulators once -----------------------------------
    @pl.when(jnp.logical_and(p == 0, i == 0))
    def _():
        xsum[...] = jnp.zeros_like(xsum)
        xsq[...] = jnp.zeros_like(xsq)
        h1sum[...] = jnp.zeros_like(h1sum)
        h1sq[...] = jnp.zeros_like(h1sq)
        h2sum[...] = jnp.zeros_like(h2sum)
        h2sq[...] = jnp.zeros_like(h2sq)

    # ---------------- phase 0: stream x into VMEM, accumulate BN0 batch stats --------
    @pl.when(p == 0)
    def _():
        x = x_ref[...]
        x_vmem[rows, :] = x
        xsum[...] += jnp.sum(x, axis=0, keepdims=True)
        xsq[...] += jnp.sum(x * x, axis=0, keepdims=True)

    # ---------------- phase 1: h1 = (x * scale0) @ W1 ; h1 stats ---------------------
    # BN0 mean/shift (and the Linear bias b1) are constant per row -> they cancel
    # exactly in BN1's training-mode mean subtraction, so only the scale survives.
    # Padded x rows are zero, so h1 padded rows stay exactly zero (stats stay exact).
    @pl.when(p == 1)
    def _():
        scale0 = _bn_scale(xsum, xsq, g0_ref, n_rows)
        a = x_vmem[rows, :] * scale0
        h1 = jnp.dot(a.astype(w1_ref.dtype), w1_ref[...],
                     preferred_element_type=jnp.float32)
        h1_vmem[rows, :] = h1
        h1sum[...] += jnp.sum(h1, axis=0, keepdims=True)
        h1sq[...] += jnp.sum(h1 * h1, axis=0, keepdims=True)

    # ---------------- phase 2: h2 = relu(BN1(h1)) @ W2 ; h2 stats --------------------
    @pl.when(p == 2)
    def _():
        scale1, shift1 = _bn_scale_shift(h1sum, h1sq, g1_ref, bt1_ref, n_rows)
        a = jnp.maximum(h1_vmem[rows, :] * scale1 + shift1, 0.0)
        if mask_pad:
            # Only emitted when batch padding exists (static): zero padded rows so the
            # h2 batch statistics stay exact.
            ridx = row0 + jax.lax.broadcasted_iota(jnp.int32, a.shape, 0)
            a = jnp.where(ridx < n_rows, a, 0.0)
        h2 = jnp.dot(a.astype(w2_ref.dtype), w2_ref[...],
                     preferred_element_type=jnp.float32)
        h2_vmem[rows, :] = h2
        h2sum[...] += jnp.sum(h2, axis=0, keepdims=True)
        h2sq[...] += jnp.sum(h2 * h2, axis=0, keepdims=True)

    # ---------------- phase 3: softmax(relu(BN2(h2)) @ W3p + b3p) --------------------
    @pl.when(p == 3)
    def _():
        scale2, shift2 = _bn_scale_shift(h2sum, h2sq, g2_ref, bt2_ref, n_rows)
        a = jnp.maximum(h2_vmem[rows, :] * scale2 + shift2, 0.0)
        logits = jnp.dot(a.astype(w3_ref.dtype), w3_ref[...],
                         preferred_element_type=jnp.float32) + b3_ref[...]
        lg = logits[:, :out_cols]               # 5 real cols + padded cols at -1e30
        m = jnp.max(lg, axis=1, keepdims=True)
        e = jnp.exp(lg - m)                     # padded cols -> exp(-1e30 - m) == 0
        s = jnp.sum(e, axis=1, keepdims=True)
        r = pl.reciprocal(s, approx=True)       # EUP slot
        r = r * (2.0 - s * r)                   # one Newton step -> f32-accurate
        o_ref[...] = e * r


# --------------------------------------------------------------------------- wrapper
def neural_network_forward(x, params, *, block_rows=1024):
    """Forward pass of NeuralNetwork. x: (B, inp_dim) f32 -> (B, 5) softmax probs."""
    B, d_in = x.shape
    l1 = params["w1"].shape[1]
    l2 = params["w2"].shape[1]
    out_pad = params["w3p"].shape[1]
    f32 = jnp.float32

    tb = _round_up(min(block_rows, _round_up(B, 8)), 8)
    nbt = pl.cdiv(B, tb)
    b_pad = nbt * tb
    if b_pad != B:
        # Zero padding rows contribute nothing to BN sums; stage 2 masks their activations.
        x = jnp.pad(x, ((0, b_pad - B), (0, 0)))

    # VMEM budget: resident x/h1/h2 scratch + double-buffered weights + streamed tiles.
    w_item = jnp.dtype(MATMUL_DTYPE).itemsize
    resident_bytes = 4 * b_pad * (d_in + l1 + l2)
    weight_bytes = 2 * w_item * (d_in * l1 + l1 * l2 + l2 * out_pad)
    stream_bytes = 2 * 4 * tb * (d_in + HEAD_COLS)
    need = resident_bytes + weight_bytes + stream_bytes + (2 << 20)
    if need > 48 * 2**20:
        # TODO(synk): streaming (HBM-resident h1/h2) fallback for very large batches.
        raise ValueError("batch too large for the VMEM-resident fused kernel "
                         f"(needs ~{need >> 20} MiB of VMEM)")
    vmem_limit = int(min(max(need, 32 * 2**20), 64 * 2**20))

    def resident(r, c):
        # Constant index_map -> single DMA, stays VMEM-resident across the whole grid.
        # (pl.Buffered(1) could drop the second buffer for these at large l1/l2.)
        return pl.BlockSpec((r, c), lambda p, i: (0, 0))

    in_specs = [
        # x is only consumed in phase 0; pinning the index afterwards avoids re-DMA.
        pl.BlockSpec((tb, d_in), lambda p, i: (jnp.where(p == 0, i, nbt - 1), 0)),
        resident(1, d_in),                    # g0
        resident(d_in, l1),                   # w1
        resident(1, l1), resident(1, l1),     # g1, bt1
        resident(l1, l2),                     # w2
        resident(1, l2), resident(1, l2),     # g2, bt2
        resident(l2, out_pad),                # w3p
        resident(1, out_pad),                 # b3p
    ]
    # Output only written in phase 3; keep the block index pinned elsewhere so no
    # garbage blocks are ever written back to HBM.
    out_spec = pl.BlockSpec((tb, HEAD_COLS), lambda p, i: (jnp.where(p == 3, i, 0), 0))

    kern = functools.partial(_fused_mlp_kernel, n_rows=B, block_rows=tb,
                             mask_pad=(b_pad != B), out_cols=HEAD_COLS)

    out = pl.pallas_call(
        kern,
        grid=(4, nbt),                        # (phase, batch tile)
        in_specs=in_specs,
        out_specs=out_spec,
        out_shape=jax.ShapeDtypeStruct((b_pad, HEAD_COLS), f32),
        scratch_shapes=[
            pltpu.VMEM((b_pad, d_in), f32),   # x   (resident across phases)
            pltpu.VMEM((b_pad, l1), f32),     # h1
            pltpu.VMEM((b_pad, l2), f32),     # h2
            pltpu.VMEM((1, d_in), f32), pltpu.VMEM((1, d_in), f32),   # x  sum / sumsq
            pltpu.VMEM((1, l1), f32), pltpu.VMEM((1, l1), f32),       # h1 sum / sumsq
            pltpu.VMEM((1, l2), f32), pltpu.VMEM((1, l2), f32),       # h2 sum / sumsq
        ],
        compiler_params=pltpu.CompilerParams(
            dimension_semantics=("arbitrary", "arbitrary"),
            vmem_limit_bytes=vmem_limit),
    )(x, params["g0"], params["w1"], params["g1"], params["bt1"],
      params["w2"], params["g2"], params["bt2"], params["w3p"], params["b3p"])

    return out[:B, :OUT_DIM]


# --------------------------------------------------------------------------- params / reference
def init_params(key, inp_dim, l1, l2, out_dim=OUT_DIM, out_pad=OUT_PAD):
    """Deterministic synthetic parameters matching the PyTorch module's shapes.

    Linear weights are stored transposed (in, out) and cast to bf16 for the MXU.
    b1/b2 (and BN0's beta/mean shift) are consumed only by the pure-JAX reference:
    the kernel drops them because they cancel exactly in the next training-mode
    BatchNorm's mean subtraction. The 5-wide head is padded (zero weight cols,
    -1e30 bias cols) so softmax over the padded columns is exact.
    """
    ks = jax.random.split(key, 6)

    def linear(k, fan_in, fan_out):
        bound = float(fan_in) ** -0.5
        kw, kb = jax.random.split(k)
        w = jax.random.uniform(kw, (fan_in, fan_out), jnp.float32, -bound, bound)
        b = jax.random.uniform(kb, (1, fan_out), jnp.float32, -bound, bound)
        return w, b

    w1, b1 = linear(ks[0], inp_dim, l1)
    w2, b2 = linear(ks[1], l1, l2)
    w3, b3 = linear(ks[2], l2, out_dim)

    w3p = jnp.zeros((l2, out_pad), jnp.float32).at[:, :out_dim].set(w3)
    b3p = jnp.full((1, out_pad), -1e30, jnp.float32).at[:, :out_dim].set(b3)

    def bn_params(k, n):
        kg, kb = jax.random.split(k)
        g = 1.0 + 0.1 * jax.random.normal(kg, (1, n), jnp.float32)
        b = 0.1 * jax.random.normal(kb, (1, n), jnp.float32)
        return g, b

    g0, bt0 = bn_params(ks[3], inp_dim)
    g1, bt1 = bn_params(ks[4], l1)
    g2, bt2 = bn_params(ks[5], l2)

    return dict(w1=w1.astype(MATMUL_DTYPE), b1=b1,
                w2=w2.astype(MATMUL_DTYPE), b2=b2,
                w3p=w3p.astype(MATMUL_DTYPE), b3p=b3p,
                g0=g0, bt0=bt0, g1=g1, bt1=bt1, g2=g2, bt2=bt2)


def reference_forward(x, p):
    """Pure-JAX reference: full module semantics (training-mode BN, biases included)."""
    def bn(h, g, b):
        mu = jnp.mean(h, axis=0, keepdims=True)
        var = jnp.mean((h - mu) ** 2, axis=0, keepdims=True)   # biased variance
        return (h - mu) * jax.lax.rsqrt(var + EPS) * g + b

    def mm(a, w):
        return jnp.dot(a.astype(w.dtype), w, preferred_element_type=jnp.float32)

    h = bn(x, p["g0"], p["bt0"])
    h = jnp.maximum(bn(mm(h, p["w1"]) + p["b1"], p["g1"], p["bt1"]), 0.0)
    h = jnp.maximum(bn(mm(h, p["w2"]) + p["b2"], p["g2"], p["bt2"]), 0.0)
    logits = mm(h, p["w3p"]) + p["b3p"]
    return jax.nn.softmax(logits, axis=1)[:, :OUT_DIM]


if __name__ == "__main__":
    inp_dim, l1, l2 = 32, 64, 32
    B = 300   # deliberately not a multiple of 8/128 -> exercises the padding/mask path
    key = jax.random.PRNGKey(0)
    kx, kp = jax.random.split(key)
    x = jax.random.normal(kx, (B, inp_dim), jnp.float32)
    params = init_params(kp, inp_dim, l1, l2)

    # Default (single batch tile) and a deliberately small tile (multi-tile correctness
    # check of the phase/stats accumulation; small tiles are not for real workloads).
    out = jax.block_until_ready(neural_network_forward(x, params))
    out_tiled = jax.block_until_ready(neural_network_forward(x, params, block_rows=128))

    ref = reference_forward(x, params)
    assert out.shape == (B, OUT_DIM)
    assert bool(jnp.all(jnp.isfinite(out)))
    assert jnp.allclose(jnp.sum(out, axis=1), 1.0, atol=1e-5)
    # bf16 MXU operands in both paths; small slack for differing reduction order and
    # the exact-cancellation rewrites (b1/b2/BN0-shift dropped in the kernel).
    assert jnp.allclose(out, ref, atol=2e-3, rtol=1e-2)
    assert jnp.allclose(out_tiled, ref, atol=2e-3, rtol=1e-2)
    print("KERNEL_OK")
</pallas_src>

<mosaic_0001>
module attributes {stable_mosaic.version = 11 : i64} {
  func.func @_fused_mlp_kernel(%arg0: i32, %arg1: i32, %arg2: memref<304x32xf32, #tpu.memory_space<vmem>>, %arg3: memref<1x32xf32, #tpu.memory_space<vmem>>, %arg4: memref<32x64xbf16, #tpu.memory_space<vmem>>, %arg5: memref<1x64xf32, #tpu.memory_space<vmem>>, %arg6: memref<1x64xf32, #tpu.memory_space<vmem>>, %arg7: memref<64x32xbf16, #tpu.memory_space<vmem>>, %arg8: memref<1x32xf32, #tpu.memory_space<vmem>>, %arg9: memref<1x32xf32, #tpu.memory_space<vmem>>, %arg10: memref<32x128xbf16, #tpu.memory_space<vmem>>, %arg11: memref<1x128xf32, #tpu.memory_space<vmem>>, %arg12: memref<304x8xf32, #tpu.memory_space<vmem>>, %arg13: memref<304x32xf32, #tpu.memory_space<vmem>>, %arg14: memref<304x64xf32, #tpu.memory_space<vmem>>, %arg15: memref<304x32xf32, #tpu.memory_space<vmem>>, %arg16: memref<1x32xf32, #tpu.memory_space<vmem>>, %arg17: memref<1x32xf32, #tpu.memory_space<vmem>>, %arg18: memref<1x64xf32, #tpu.memory_space<vmem>>, %arg19: memref<1x64xf32, #tpu.memory_space<vmem>>, %arg20: memref<1x32xf32, #tpu.memory_space<vmem>>, %arg21: memref<1x32xf32, #tpu.memory_space<vmem>>) attributes {dimension_semantics = [#tpu.dimension_semantics<arbitrary>, #tpu.dimension_semantics<arbitrary>], iteration_bounds = array<i64: 4, 1>, scalar_prefetch = 0 : i64, scratch_operands = 9 : i64, tpu.core_type = #tpu.core_type<tc>, window_params = [{transform_indices = @transform_0, window_bounds = array<i64: 304, 32>}, {pipeline_mode = #tpu.pipeline_mode<synchronous>, transform_indices = @transform_1, window_bounds = array<i64: 1, 32>}, {pipeline_mode = #tpu.pipeline_mode<synchronous>, transform_indices = @transform_2, window_bounds = array<i64: 32, 64>}, {pipeline_mode = #tpu.pipeline_mode<synchronous>, transform_indices = @transform_3, window_bounds = array<i64: 1, 64>}, {pipeline_mode = #tpu.pipeline_mode<synchronous>, transform_indices = @transform_4, window_bounds = array<i64: 1, 64>}, {pipeline_mode = #tpu.pipeline_mode<synchronous>, transform_indices = @transform_5, window_bounds = array<i64: 64, 32>}, {pipeline_mode = #tpu.pipeline_mode<synchronous>, transform_indices = @transform_6, window_bounds = array<i64: 1, 32>}, {pipeline_mode = #tpu.pipeline_mode<synchronous>, transform_indices = @transform_7, window_bounds = array<i64: 1, 32>}, {pipeline_mode = #tpu.pipeline_mode<synchronous>, transform_indices = @transform_8, window_bounds = array<i64: 32, 128>}, {pipeline_mode = #tpu.pipeline_mode<synchronous>, transform_indices = @transform_9, window_bounds = array<i64: 1, 128>}, {transform_indices = @transform_10, window_bounds = array<i64: 304, 8>}]} {
    %c304_i32 = arith.constant 304 : i32
    %0 = arith.muli %arg1, %c304_i32 : i32
    %1 = tpu.assume_multiple %0, 304 : i32
    %c0_i32 = arith.constant 0 : i32
    %2 = arith.cmpi eq, %arg0, %c0_i32 : i32
    %c0_i32_0 = arith.constant 0 : i32
    %3 = arith.cmpi eq, %arg1, %c0_i32_0 : i32
    %4 = arith.andi %2, %3 : i1
    %5 = arith.extui %4 : i1 to i32
    %c0_i32_1 = arith.constant 0 : i32
    %6 = arith.cmpi ne, %5, %c0_i32_1 : i32
    scf.if %6 {
      %cst = arith.constant 0.000000e+00 : f32
      %19 = vector.broadcast %cst : f32 to vector<1x32xf32>
      %c0 = arith.constant 0 : index
      %c0_7 = arith.constant 0 : index
      %20 = vector.load %arg16[%c0, %c0_7] : memref<1x32xf32, #tpu.memory_space<vmem>>, vector<1x32xf32>
      tpu.vector_store %arg16[%c0, %c0_7], %19 {strides = array<i32>} : memref<1x32xf32, #tpu.memory_space<vmem>>, vector<1x32xf32>,
      %cst_8 = arith.constant 0.000000e+00 : f32
      %21 = vector.broadcast %cst_8 : f32 to vector<1x32xf32>
      %c0_9 = arith.constant 0 : index
      %c0_10 = arith.constant 0 : index
      %22 = vector.load %arg17[%c0_9, %c0_10] : memref<1x32xf32, #tpu.memory_space<vmem>>, vector<1x32xf32>
      tpu.vector_store %arg17[%c0_9, %c0_10], %21 {strides = array<i32>} : memref<1x32xf32, #tpu.memory_space<vmem>>, vector<1x32xf32>,
      %cst_11 = arith.constant 0.000000e+00 : f32
      %23 = vector.broadcast %cst_11 : f32 to vector<1x64xf32>
      %c0_12 = arith.constant 0 : index
      %c0_13 = arith.constant 0 : index
      %24 = vector.load %arg18[%c0_12, %c0_13] : memref<1x64xf32, #tpu.memory_space<vmem>>, vector<1x64xf32>
      tpu.vector_store %arg18[%c0_12, %c0_13], %23 {strides = array<i32>} : memref<1x64xf32, #tpu.memory_space<vmem>>, vector<1x64xf32>,
      %cst_14 = arith.constant 0.000000e+00 : f32
      %25 = vector.broadcast %cst_14 : f32 to vector<1x64xf32>
      %c0_15 = arith.constant 0 : index
      %c0_16 = arith.constant 0 : index
      %26 = vector.load %arg19[%c0_15, %c0_16] : memref<1x64xf32, #tpu.memory_space<vmem>>, vector<1x64xf32>
      tpu.vector_store %arg19[%c0_15, %c0_16], %25 {strides = array<i32>} : memref<1x64xf32, #tpu.memory_space<vmem>>, vector<1x64xf32>,
      %cst_17 = arith.constant 0.000000e+00 : f32
      %27 = vector.broadcast %cst_17 : f32 to vector<1x32xf32>
      %c0_18 = arith.constant 0 : index
      %c0_19 = arith.constant 0 : index
      %28 = vector.load %arg20[%c0_18, %c0_19] : memref<1x32xf32, #tpu.memory_space<vmem>>, vector<1x32xf32>
      tpu.vector_store %arg20[%c0_18, %c0_19], %27 {strides = array<i32>} : memref<1x32xf32, #tpu.memory_space<vmem>>, vector<1x32xf32>,
      %cst_20 = arith.constant 0.000000e+00 : f32
      %29 = vector.broadcast %cst_20 : f32 to vector<1x32xf32>
      %c0_21 = arith.constant 0 : index
      %c0_22 = arith.constant 0 : index
      %30 = vector.load %arg21[%c0_21, %c0_22] : memref<1x32xf32, #tpu.memory_space<vmem>>, vector<1x32xf32>
      tpu.vector_store %arg21[%c0_21, %c0_22], %29 {strides = array<i32>} : memref<1x32xf32, #tpu.memory_space<vmem>>, vector<1x32xf32>,
    } else {
    }
    %c0_i32_2 = arith.constant 0 : i32
    %7 = arith.cmpi eq, %arg0, %c0_i32_2 : i32
    %8 = arith.extui %7 : i1 to i32
    %c0_i32_3 = arith.constant 0 : i32
    %9 = arith.cmpi ne, %8, %c0_i32_3 : i32
    scf.if %9 {
      %c0 = arith.constant 0 : index
      %c0_7 = arith.constant 0 : index
      %19 = vector.load %arg2[%c0, %c0_7] : memref<304x32xf32, #tpu.memory_space<vmem>>, vector<304x32xf32>
      %20 = arith.index_cast %1 : i32 to index
      %c0_8 = arith.constant 0 : index
      %21 = vector.load %arg13[%20, %c0_8] : memref<304x32xf32, #tpu.memory_space<vmem>>, vector<304x32xf32>
      tpu.vector_store %arg13[%20, %c0_8], %19 {strides = array<i32>} : memref<304x32xf32, #tpu.memory_space<vmem>>, vector<304x32xf32>,
      %c0_9 = arith.constant 0 : index
      %c0_10 = arith.constant 0 : index
      %22 = vector.load %arg16[%c0_9, %c0_10] : memref<1x32xf32, #tpu.memory_space<vmem>>, vector<1x32xf32>
      %cst = arith.constant dense<0.000000e+00> : vector<32xf32>
      %23 = vector.multi_reduction <add>, %19, %cst [0] : vector<304x32xf32> to vector<32xf32>
      %24 = vector.shape_cast %23 : vector<32xf32> to vector<1x32xf32>
      %25 = arith.addf %22, %24 : vector<1x32xf32>
      %c0_11 = arith.constant 0 : index
      %c0_12 = arith.constant 0 : index
      %26 = vector.load %arg16[%c0_11, %c0_12] : memref<1x32xf32, #tpu.memory_space<vmem>>, vector<1x32xf32>
      tpu.vector_store %arg16[%c0_11, %c0_12], %25 {strides = array<i32>} : memref<1x32xf32, #tpu.memory_space<vmem>>, vector<1x32xf32>,
      %c0_13 = arith.constant 0 : index
      %c0_14 = arith.constant 0 : index
      %27 = vector.load %arg17[%c0_13, %c0_14] : memref<1x32xf32, #tpu.memory_space<vmem>>, vector<1x32xf32>
      %28 = arith.mulf %19, %19 : vector<304x32xf32>
      %cst_15 = arith.constant dense<0.000000e+00> : vector<32xf32>
      %29 = vector.multi_reduction <add>, %28, %cst_15 [0] : vector<304x32xf32> to vector<32xf32>
      %30 = vector.shape_cast %29 : vector<32xf32> to vector<1x32xf32>
      %31 = arith.addf %27, %30 : vector<1x32xf32>
      %c0_16 = arith.constant 0 : index
      %c0_17 = arith.constant 0 : index
      %32 = vector.load %arg17[%c0_16, %c0_17] : memref<1x32xf32, #tpu.memory_space<vmem>>, vector<1x32xf32>
      tpu.vector_store %arg17[%c0_16, %c0_17], %31 {strides = array<i32>} : memref<1x32xf32, #tpu.memory_space<vmem>>, vector<1x32xf32>,
    } else {
    }
    %c1_i32 = arith.constant 1 : i32
    %10 = arith.cmpi eq, %arg0, %c1_i32 : i32
    %11 = arith.extui %10 : i1 to i32
    %c0_i32_4 = arith.constant 0 : i32
    %12 = arith.cmpi ne, %11, %c0_i32_4 : i32
    scf.if %12 {
      %c0 = arith.constant 0 : index
      %c0_7 = arith.constant 0 : index
      %19 = vector.load %arg16[%c0, %c0_7] : memref<1x32xf32, #tpu.memory_space<vmem>>, vector<1x32xf32>
      %cst = arith.constant 0.00333333341 : f32
      %20 = vector.broadcast %cst : f32 to vector<1x32xf32>
      %21 = arith.mulf %19, %20 : vector<1x32xf32>
      %c0_8 = arith.constant 0 : index
      %c0_9 = arith.constant 0 : index
      %22 = vector.load %arg17[%c0_8, %c0_9] : memref<1x32xf32, #tpu.memory_space<vmem>>, vector<1x32xf32>
      %cst_10 = arith.constant 0.00333333341 : f32
      %23 = vector.broadcast %cst_10 : f32 to vector<1x32xf32>
      %24 = arith.mulf %22, %23 : vector<1x32xf32>
      %25 = arith.mulf %21, %21 : vector<1x32xf32>
      %26 = arith.subf %24, %25 : vector<1x32xf32>
      %cst_11 = arith.constant 0.000000e+00 : f32
      %27 = vector.broadcast %cst_11 : f32 to vector<1x32xf32>
      %28 = arith.maximumf %26, %27 : vector<1x32xf32>
      %c0_12 = arith.constant 0 : index
      %c0_13 = arith.constant 0 : index
      %29 = vector.load %arg3[%c0_12, %c0_13] : memref<1x32xf32, #tpu.memory_space<vmem>>, vector<1x32xf32>
      %cst_14 = arith.constant 9.99999974E-6 : f32
      %30 = vector.broadcast %cst_14 : f32 to vector<1x32xf32>
      %31 = arith.addf %28, %30 : vector<1x32xf32>
      %32 = math.rsqrt %31 : vector<1x32xf32>
      %33 = arith.mulf %29, %32 : vector<1x32xf32>
      %34 = arith.index_cast %1 : i32 to index
      %c0_15 = arith.constant 0 : index
      %35 = vector.load %arg13[%34, %c0_15] : memref<304x32xf32, #tpu.memory_space<vmem>>, vector<304x32xf32>
      %36 = vector.broadcast %33 : vector<1x32xf32> to vector<304x32xf32>
      %37 = arith.mulf %35, %36 : vector<304x32xf32>
      %38 = arith.truncf %37 : vector<304x32xf32> to vector<304x32xbf16>
      %c0_16 = arith.constant 0 : index
      %c0_17 = arith.constant 0 : index
      %39 = vector.load %arg4[%c0_16, %c0_17] : memref<32x64xbf16, #tpu.memory_space<vmem>>, vector<32x64xbf16>
      %cst_18 = arith.constant dense<0.000000e+00> : vector<304x64xf32>
      %40 = tpu.matmul %38, %39, %cst_18 {dimension_numbers = #tpu.dot_dimension_numbers<[1], [0], [0], [1], [0, 0, 1, 1], [], []>} : vector<304x32xbf16>, vector<32x64xbf16>, vector<304x64xf32> -> vector<304x64xf32>
      %41 = arith.index_cast %1 : i32 to index
      %c0_19 = arith.constant 0 : index
      %42 = vector.load %arg14[%41, %c0_19] : memref<304x64xf32, #tpu.memory_space<vmem>>, vector<304x64xf32>
      tpu.vector_store %arg14[%41, %c0_19], %40 {strides = array<i32>} : memref<304x64xf32, #tpu.memory_space<vmem>>, vector<304x64xf32>,
      %c0_20 = arith.constant 0 : index
      %c0_21 = arith.constant 0 : index
      %43 = vector.load %arg18[%c0_20, %c0_21] : memref<1x64xf32, #tpu.memory_space<vmem>>, vector<1x64xf32>
      %cst_22 = arith.constant dense<0.000000e+00> : vector<64xf32>
      %44 = vector.multi_reduction <add>, %40, %cst_22 [0] : vector<304x64xf32> to vector<64xf32>
      %45 = vector.shape_cast %44 : vector<64xf32> to vector<1x64xf32>
      %46 = arith.addf %43, %45 : vector<1x64xf32>
      %c0_23 = arith.constant 0 : index
      %c0_24 = arith.constant 0 : index
      %47 = vector.load %arg18[%c0_23, %c0_24] : memref<1x64xf32, #tpu.memory_space<vmem>>, vector<1x64xf32>
      tpu.vector_store %arg18[%c0_23, %c0_24], %46 {strides = array<i32>} : memref<1x64xf32, #tpu.memory_space<vmem>>, vector<1x64xf32>,
      %c0_25 = arith.constant 0 : index
      %c0_26 = arith.constant 0 : index
      %48 = vector.load %arg19[%c0_25, %c0_26] : memref<1x64xf32, #tpu.memory_space<vmem>>, vector<1x64xf32>
      %49 = arith.mulf %40, %40 : vector<304x64xf32>
      %cst_27 = arith.constant dense<0.000000e+00> : vector<64xf32>
      %50 = vector.multi_reduction <add>, %49, %cst_27 [0] : vector<304x64xf32> to vector<64xf32>
      %51 = vector.shape_cast %50 : vector<64xf32> to vector<1x64xf32>
      %52 = arith.addf %48, %51 : vector<1x64xf32>
      %c0_28 = arith.constant 0 : index
      %c0_29 = arith.constant 0 : index
      %53 = vector.load %arg19[%c0_28, %c0_29] : memref<1x64xf32, #tpu.memory_space<vmem>>, vector<1x64xf32>
      tpu.vector_store %arg19[%c0_28, %c0_29], %52 {strides = array<i32>} : memref<1x64xf32, #tpu.memory_space<vmem>>, vector<1x64xf32>,
    } else {
    }
    %c2_i32 = arith.constant 2 : i32
    %13 = arith.cmpi eq, %arg0, %c2_i32 : i32
    %14 = arith.extui %13 : i1 to i32
    %c0_i32_5 = arith.constant 0 : i32
    %15 = arith.cmpi ne, %14, %c0_i32_5 : i32
    scf.if %15 {
      %c0 = arith.constant 0 : index
      %c0_7 = arith.constant 0 : index
      %19 = vector.load %arg18[%c0, %c0_7] : memref<1x64xf32, #tpu.memory_space<vmem>>, vector<1x64xf32>
      %cst = arith.constant 0.00333333341 : f32
      %20 = vector.broadcast %cst : f32 to vector<1x64xf32>
      %21 = arith.mulf %19, %20 : vector<1x64xf32>
      %c0_8 = arith.constant 0 : index
      %c0_9 = arith.constant 0 : index
      %22 = vector.load %arg19[%c0_8, %c0_9] : memref<1x64xf32, #tpu.memory_space<vmem>>, vector<1x64xf32>
      %cst_10 = arith.constant 0.00333333341 : f32
      %23 = vector.broadcast %cst_10 : f32 to vector<1x64xf32>
      %24 = arith.mulf %22, %23 : vector<1x64xf32>
      %25 = arith.mulf %21, %21 : vector<1x64xf32>
      %26 = arith.subf %24, %25 : vector<1x64xf32>
      %cst_11 = arith.constant 0.000000e+00 : f32
      %27 = vector.broadcast %cst_11 : f32 to vector<1x64xf32>
      %28 = arith.maximumf %26, %27 : vector<1x64xf32>
      %c0_12 = arith.constant 0 : index
      %c0_13 = arith.constant 0 : index
      %29 = vector.load %arg5[%c0_12, %c0_13] : memref<1x64xf32, #tpu.memory_space<vmem>>, vector<1x64xf32>
      %cst_14 = arith.constant 9.99999974E-6 : f32
      %30 = vector.broadcast %cst_14 : f32 to vector<1x64xf32>
      %31 = arith.addf %28, %30 : vector<1x64xf32>
      %32 = math.rsqrt %31 : vector<1x64xf32>
      %33 = arith.mulf %29, %32 : vector<1x64xf32>
      %c0_15 = arith.constant 0 : index
      %c0_16 = arith.constant 0 : index
      %34 = vector.load %arg6[%c0_15, %c0_16] : memref<1x64xf32, #tpu.memory_space<vmem>>, vector<1x64xf32>
      %35 = arith.mulf %21, %33 : vector<1x64xf32>
      %36 = arith.subf %34, %35 : vector<1x64xf32>
      %37 = arith.index_cast %1 : i32 to index
      %c0_17 = arith.constant 0 : index
      %38 = vector.load %arg14[%37, %c0_17] : memref<304x64xf32, #tpu.memory_space<vmem>>, vector<304x64xf32>
      %39 = vector.broadcast %33 : vector<1x64xf32> to vector<304x64xf32>
      %40 = arith.mulf %38, %39 : vector<304x64xf32>
      %41 = vector.broadcast %36 : vector<1x64xf32> to vector<304x64xf32>
      %42 = arith.addf %40, %41 : vector<304x64xf32>
      %cst_18 = arith.constant 0.000000e+00 : f32
      %43 = vector.broadcast %cst_18 : f32 to vector<304x64xf32>
      %44 = arith.maximumf %42, %43 : vector<304x64xf32>
      %45 = tpu.iota {dimensions = array<i32: 0>} : vector<304x64xi32>
      %46 = vector.broadcast %1 : i32 to vector<304x64xi32>
      %47 = arith.addi %46, %45 : vector<304x64xi32>
      %c300_i32 = arith.constant 300 : i32
      %48 = vector.broadcast %c300_i32 : i32 to vector<304x64xi32>
      %49 = arith.cmpi slt, %47, %48 : vector<304x64xi32>
      %cst_19 = arith.constant 0.000000e+00 : f32
      %50 = vector.broadcast %cst_19 : f32 to vector<304x64xf32>
      %51 = arith.select %49, %44, %50 : vector<304x64xi1>, vector<304x64xf32>
      %52 = arith.truncf %51 : vector<304x64xf32> to vector<304x64xbf16>
      %c0_20 = arith.constant 0 : index
      %c0_21 = arith.constant 0 : index
      %53 = vector.load %arg7[%c0_20, %c0_21] : memref<64x32xbf16, #tpu.memory_space<vmem>>, vector<64x32xbf16>
      %cst_22 = arith.constant dense<0.000000e+00> : vector<304x32xf32>
      %54 = tpu.matmul %52, %53, %cst_22 {dimension_numbers = #tpu.dot_dimension_numbers<[1], [0], [0], [1], [0, 0, 1, 1], [], []>} : vector<304x64xbf16>, vector<64x32xbf16>, vector<304x32xf32> -> vector<304x32xf32>
      %55 = arith.index_cast %1 : i32 to index
      %c0_23 = arith.constant 0 : index
      %56 = vector.load %arg15[%55, %c0_23] : memref<304x32xf32, #tpu.memory_space<vmem>>, vector<304x32xf32>
      tpu.vector_store %arg15[%55, %c0_23], %54 {strides = array<i32>} : memref<304x32xf32, #tpu.memory_space<vmem>>, vector<304x32xf32>,
      %c0_24 = arith.constant 0 : index
      %c0_25 = arith.constant 0 : index
      %57 = vector.load %arg20[%c0_24, %c0_25] : memref<1x32xf32, #tpu.memory_space<vmem>>, vector<1x32xf32>
      %cst_26 = arith.constant dense<0.000000e+00> : vector<32xf32>
      %58 = vector.multi_reduction <add>, %54, %cst_26 [0] : vector<304x32xf32> to vector<32xf32>
      %59 = vector.shape_cast %58 : vector<32xf32> to vector<1x32xf32>
      %60 = arith.addf %57, %59 : vector<1x32xf32>
      %c0_27 = arith.constant 0 : index
      %c0_28 = arith.constant 0 : index
      %61 = vector.load %arg20[%c0_27, %c0_28] : memref<1x32xf32, #tpu.memory_space<vmem>>, vector<1x32xf32>
      tpu.vector_store %arg20[%c0_27, %c0_28], %60 {strides = array<i32>} : memref<1x32xf32, #tpu.memory_space<vmem>>, vector<1x32xf32>,
      %c0_29 = arith.constant 0 : index
      %c0_30 = arith.constant 0 : index
      %62 = vector.load %arg21[%c0_29, %c0_30] : memref<1x32xf32, #tpu.memory_space<vmem>>, vector<1x32xf32>
      %63 = arith.mulf %54, %54 : vector<304x32xf32>
      %cst_31 = arith.constant dense<0.000000e+00> : vector<32xf32>
      %64 = vector.multi_reduction <add>, %63, %cst_31 [0] : vector<304x32xf32> to vector<32xf32>
      %65 = vector.shape_cast %64 : vector<32xf32> to vector<1x32xf32>
      %66 = arith.addf %62, %65 : vector<1x32xf32>
      %c0_32 = arith.constant 0 : index
      %c0_33 = arith.constant 0 : index
      %67 = vector.load %arg21[%c0_32, %c0_33] : memref<1x32xf32, #tpu.memory_space<vmem>>, vector<1x32xf32>
      tpu.vector_store %arg21[%c0_32, %c0_33], %66 {strides = array<i32>} : memref<1x32xf32, #tpu.memory_space<vmem>>, vector<1x32xf32>,
    } else {
    }
    %c3_i32 = arith.constant 3 : i32
    %16 = arith.cmpi eq, %arg0, %c3_i32 : i32
    %17 = arith.extui %16 : i1 to i32
    %c0_i32_6 = arith.constant 0 : i32
    %18 = arith.cmpi ne, %17, %c0_i32_6 : i32
    scf.if %18 {
      %c0 = arith.constant 0 : index
      %c0_7 = arith.constant 0 : index
      %19 = vector.load %arg20[%c0, %c0_7] : memref<1x32xf32, #tpu.memory_space<vmem>>, vector<1x32xf32>
      %cst = arith.constant 0.00333333341 : f32
      %20 = vector.broadcast %cst : f32 to vector<1x32xf32>
      %21 = arith.mulf %19, %20 : vector<1x32xf32>
      %c0_8 = arith.constant 0 : index
      %c0_9 = arith.constant 0 : index
      %22 = vector.load %arg21[%c0_8, %c0_9] : memref<1x32xf32, #tpu.memory_space<vmem>>, vector<1x32xf32>
      %cst_10 = arith.constant 0.00333333341 : f32
      %23 = vector.broadcast %cst_10 : f32 to vector<1x32xf32>
      %24 = arith.mulf %22, %23 : vector<1x32xf32>
      %25 = arith.mulf %21, %21 : vector<1x32xf32>
      %26 = arith.subf %24, %25 : vector<1x32xf32>
      %cst_11 = arith.constant 0.000000e+00 : f32
      %27 = vector.broadcast %cst_11 : f32 to vector<1x32xf32>
      %28 = arith.maximumf %26, %27 : vector<1x32xf32>
      %c0_12 = arith.constant 0 : index
      %c0_13 = arith.constant 0 : index
      %29 = vector.load %arg8[%c0_12, %c0_13] : memref<1x32xf32, #tpu.memory_space<vmem>>, vector<1x32xf32>
      %cst_14 = arith.constant 9.99999974E-6 : f32
      %30 = vector.broadcast %cst_14 : f32 to vector<1x32xf32>
      %31 = arith.addf %28, %30 : vector<1x32xf32>
      %32 = math.rsqrt %31 : vector<1x32xf32>
      %33 = arith.mulf %29, %32 : vector<1x32xf32>
      %c0_15 = arith.constant 0 : index
      %c0_16 = arith.constant 0 : index
      %34 = vector.load %arg9[%c0_15, %c0_16] : memref<1x32xf32, #tpu.memory_space<vmem>>, vector<1x32xf32>
      %35 = arith.mulf %21, %33 : vector<1x32xf32>
      %36 = arith.subf %34, %35 : vector<1x32xf32>
      %37 = arith.index_cast %1 : i32 to index
      %c0_17 = arith.constant 0 : index
      %38 = vector.load %arg15[%37, %c0_17] : memref<304x32xf32, #tpu.memory_space<vmem>>, vector<304x32xf32>
      %39 = vector.broadcast %33 : vector<1x32xf32> to vector<304x32xf32>
      %40 = arith.mulf %38, %39 : vector<304x32xf32>
      %41 = vector.broadcast %36 : vector<1x32xf32> to vector<304x32xf32>
      %42 = arith.addf %40, %41 : vector<304x32xf32>
      %cst_18 = arith.constant 0.000000e+00 : f32
      %43 = vector.broadcast %cst_18 : f32 to vector<304x32xf32>
      %44 = arith.maximumf %42, %43 : vector<304x32xf32>
      %45 = arith.truncf %44 : vector<304x32xf32> to vector<304x32xbf16>
      %c0_19 = arith.constant 0 : index
      %c0_20 = arith.constant 0 : index
      %46 = vector.load %arg10[%c0_19, %c0_20] : memref<32x128xbf16, #tpu.memory_space<vmem>>, vector<32x128xbf16>
      %cst_21 = arith.constant dense<0.000000e+00> : vector<304x128xf32>
      %47 = tpu.matmul %45, %46, %cst_21 {dimension_numbers = #tpu.dot_dimension_numbers<[1], [0], [0], [1], [0, 0, 1, 1], [], []>} : vector<304x32xbf16>, vector<32x128xbf16>, vector<304x128xf32> -> vector<304x128xf32>
      %c0_22 = arith.constant 0 : index
      %c0_23 = arith.constant 0 : index
      %48 = vector.load %arg11[%c0_22, %c0_23] : memref<1x128xf32, #tpu.memory_space<vmem>>, vector<1x128xf32>
      %49 = vector.broadcast %48 : vector<1x128xf32> to vector<304x128xf32>
      %50 = arith.addf %47, %49 : vector<304x128xf32>
      %51 = vector.extract_strided_slice %50 {offsets = [0, 0], sizes = [304, 8], strides = [1, 1]} : vector<304x128xf32> to vector<304x8xf32>
      %cst_24 = arith.constant dense<0xFF800000> : vector<304xf32>
      %52 = vector.multi_reduction <maximumf>, %51, %cst_24 [1] : vector<304x8xf32> to vector<304xf32>
      %53 = vector.shape_cast %52 : vector<304xf32> to vector<304x1xf32>
      %54 = vector.broadcast %53 : vector<304x1xf32> to vector<304x8xf32>
      %55 = arith.subf %51, %54 : vector<304x8xf32>
      %56 = math.exp %55 : vector<304x8xf32>
      %cst_25 = arith.constant dense<0.000000e+00> : vector<304xf32>
      %57 = vector.multi_reduction <add>, %56, %cst_25 [1] : vector<304x8xf32> to vector<304xf32>
      %58 = vector.shape_cast %57 : vector<304xf32> to vector<304x1xf32>
      %59 = tpu.reciprocal %58 {approx = true} : vector<304x1xf32> -> vector<304x1xf32>
      %60 = arith.mulf %58, %59 : vector<304x1xf32>
      %cst_26 = arith.constant 2.000000e+00 : f32
      %61 = vector.broadcast %cst_26 : f32 to vector<304x1xf32>
      %62 = arith.subf %61, %60 : vector<304x1xf32>
      %63 = arith.mulf %59, %62 : vector<304x1xf32>
      %64 = vector.broadcast %63 : vector<304x1xf32> to vector<304x8xf32>
      %65 = arith.mulf %56, %64 : vector<304x8xf32>
      %c0_27 = arith.constant 0 : index
      %c0_28 = arith.constant 0 : index
      %66 = vector.load %arg12[%c0_27, %c0_28] : memref<304x8xf32, #tpu.memory_space<vmem>>, vector<304x8xf32>
      tpu.vector_store %arg12[%c0_27, %c0_28], %65 {strides = array<i32>} : memref<304x8xf32, #tpu.memory_space<vmem>>, vector<304x8xf32>,
    } else {
    }
    return
  }
  func.func @transform_0(%arg0: i32, %arg1: i32) -> (i32, i32) {
    %c0_i32 = arith.constant 0 : i32
    %0 = arith.cmpi eq, %arg0, %c0_i32 : i32
    %c0_i32_0 = arith.constant 0 : i32
    %1 = arith.select %0, %arg1, %c0_i32_0 : i32
    %c0_i32_1 = arith.constant 0 : i32
    %c0_i32_2 = arith.constant 0 : i32
    return %1, %c0_i32_1 : i32, i32
  }
  func.func @transform_1(%arg0: i32, %arg1: i32) -> (i32, i32) {
    %c0_i32 = arith.constant 0 : i32
    %c0_i32_0 = arith.constant 0 : i32
    %c0_i32_1 = arith.constant 0 : i32
    return %c0_i32, %c0_i32_0 : i32, i32
  }
  func.func @transform_2(%arg0: i32, %arg1: i32) -> (i32, i32) {
    %c0_i32 = arith.constant 0 : i32
    %c0_i32_0 = arith.constant 0 : i32
    %c0_i32_1 = arith.constant 0 : i32
    return %c0_i32, %c0_i32_0 : i32, i32
  }
  func.func @transform_3(%arg0: i32, %arg1: i32) -> (i32, i32) {
    %c0_i32 = arith.constant 0 : i32
    %c0_i32_0 = arith.constant 0 : i32
    %c0_i32_1 = arith.constant 0 : i32
    return %c0_i32, %c0_i32_0 : i32, i32
  }
  func.func @transform_4(%arg0: i32, %arg1: i32) -> (i32, i32) {
    %c0_i32 = arith.constant 0 : i32
    %c0_i32_0 = arith.constant 0 : i32
    %c0_i32_1 = arith.constant 0 : i32
    return %c0_i32, %c0_i32_0 : i32, i32
  }
  func.func @transform_5(%arg0: i32, %arg1: i32) -> (i32, i32) {
    %c0_i32 = arith.constant 0 : i32
    %c0_i32_0 = arith.constant 0 : i32
    %c0_i32_1 = arith.constant 0 : i32
    return %c0_i32, %c0_i32_0 : i32, i32
  }
  func.func @transform_6(%arg0: i32, %arg1: i32) -> (i32, i32) {
    %c0_i32 = arith.constant 0 : i32
    %c0_i32_0 = arith.constant 0 : i32
    %c0_i32_1 = arith.constant 0 : i32
    return %c0_i32, %c0_i32_0 : i32, i32
  }
  func.func @transform_7(%arg0: i32, %arg1: i32) -> (i32, i32) {
    %c0_i32 = arith.constant 0 : i32
    %c0_i32_0 = arith.constant 0 : i32
    %c0_i32_1 = arith.constant 0 : i32
    return %c0_i32, %c0_i32_0 : i32, i32
  }
  func.func @transform_8(%arg0: i32, %arg1: i32) -> (i32, i32) {
    %c0_i32 = arith.constant 0 : i32
    %c0_i32_0 = arith.constant 0 : i32
    %c0_i32_1 = arith.constant 0 : i32
    return %c0_i32, %c0_i32_0 : i32, i32
  }
  func.func @transform_9(%arg0: i32, %arg1: i32) -> (i32, i32) {
    %c0_i32 = arith.constant 0 : i32
    %c0_i32_0 = arith.constant 0 : i32
    %c0_i32_1 = arith.constant 0 : i32
    return %c0_i32, %c0_i32_0 : i32, i32
  }
  func.func @transform_10(%arg0: i32, %arg1: i32) -> (i32, i32) {
    %c3_i32 = arith.constant 3 : i32
    %0 = arith.cmpi eq, %arg0, %c3_i32 : i32
    %c0_i32 = arith.constant 0 : i32
    %1 = arith.select %0, %arg1, %c0_i32 : i32
    %c0_i32_0 = arith.constant 0 : i32
    %c0_i32_1 = arith.constant 0 : i32
    return %1, %c0_i32_0 : i32, i32
  }
}

</mosaic_0001>

<bundles_post_ra>
// kernel: tpu_custom_call.1
= control target key start
LH: loop header
LB: loop body
LE: loop exit
PB: predicated region body
PF: predicated region fallthrough
CT: control target
= control target key end

     0   :  { %s4016_s13 = smov 0   ;;  %s4018_s14 = smov 0   ;;  %s5931_s0 = inlined_call_operand.vmem [shape: f32[304,32], index: 0, kind: input, shape index: {}]   ;;  %s5932_s1 = inlined_call_operand.vmem [shape: f32[1,32], index: 1, kind: input, shape index: {}]   ;;  %s5933_s2 = inlined_call_operand.vmem [shape: bf16[32,64], index: 2, kind: input, shape index: {}]   ;;  %s5934_s3 = inlined_call_operand.vmem [shape: f32[1,64], index: 3, kind: input, shape index: {}]   ;;  %s5935_s4 = inlined_call_operand.vmem [shape: f32[1,64], index: 4, kind: input, shape index: {}]   ;;  %s5936_s5 = inlined_call_operand.vmem [shape: bf16[64,32], index: 5, kind: input, shape index: {}]   ;;  %s5937_s6 = inlined_call_operand.vmem [shape: f32[1,32], index: 6, kind: input, shape index: {}]   ;;  %s5938_s7 = inlined_call_operand.vmem [shape: f32[1,32], index: 7, kind: input, shape index: {}]   ;;  %s5939_s8 = inlined_call_operand.vmem [shape: bf16[32,128], index: 8, kind: input, shape index: {}]   ;;  %s5940_s9 = inlined_call_operand.vmem [shape: f32[1,128], index: 9, kind: input, shape index: {}]   ;;  %s5941_s10 = inlined_call_operand.vmem [shape: f32[304,8], index: 10, kind: output, shape index: {}]  }
   0x1   :  { %s4020_s15 = smov 0  }
   0x2 LB: > { %s32_s16 = sadd.s32 1, %s3948_s14  ;;  %p3331_p0 = scmp.ge.s32.totalorder %s3952_s15, 1  ;;  %s3952_s15 = sphi %s4020_s15, %s20_s15   ;;  %s3948_s14 = sphi %s4018_s14, %s5943_s14   ;;  %s3944_s13 = sphi %s4016_s13, %s5942_s13  }
   0x3   : > { %p34_p1 = scmp.ge.s32.totalorder %s32_s16, 4  ;;  %p337_p2 = scmp.lt.s32.totalorder %s3952_s15, 5 }
   0x5   : > { %s5945_s16 = smov (%p34_p1, %s32_s16), 0  ;;  %p338_p3 = pnand %p3331_p0, %p337_p2 }
   0x6   : > { %p401_p4 = scmp.eq.s32.totalorder (!%p338_p3), %s3944_s13, 0 }
   0x7   : > { %341 = sbr.rel (%p338_p3) target bundleno = 1529 (0x5f9), region = 60 }
   0xe   : > { %406 = sbr.rel (!%p401_p4) target bundleno = 21 (0x15), region = 64  ;;  %vm407_vm0 = vcmask (%p401_p4), 253952   ;;  %vm410_vm1 = vcmask (%p401_p4), 516096   ;;  %v3954_v0 = vmov (%p401_p4), 0.0  }
   0xf   : > { %408 = vst.msk [vmem:[#allocation5] sm:$0x1] (%p401_p4), %vm407_vm0, %v3954_v0  ;;  %409 = vst.msk [vmem:[#allocation6] sm:$0x1] (%p401_p4), %vm407_vm0, %v3954_v0 }
  0x10   : > { %413 = vst.msk [vmem:[#allocation9] sm:$0x1] (%p401_p4), %vm407_vm0, %v3954_v0  ;;  %414 = vst.msk [vmem:[#allocation10] sm:$0x1] (%p401_p4), %vm407_vm0, %v3954_v0 }
  0x11   : > { %411 = vst.msk [vmem:[#allocation7] sm:$0x1] (%p401_p4), %vm410_vm1, %v3954_v0  ;;  %412 = vst.msk [vmem:[#allocation8] sm:$0x1] (%p401_p4), %vm410_vm1, %v3954_v0 }
  0x15 PF: > { %p3333_p5 = scmp.ne.s32.totalorder %s3944_s13, 0 }
  0x16   : > { %v418_v1 = vld [vmem:[%s5931_s0] sm:$0xff] (!%p3333_p5)  ;;  %vm457_vm2 = vcmask (!%p3333_p5), 261120   ;;  %v419_v2 = vld [vmem:[%s5931_s0 + $0x8] sm:$0xff] (!%p3333_p5)  ;;  %v420_v3 = vld [vmem:[%s5931_s0 + $0x10] sm:$0xff] (!%p3333_p5)  ;;  %vm579_vm3 = vcmask (!%p3333_p5), 253952  }
  0x17   : > { %417 = sbr.rel (%p3333_p5) target bundleno = 115 (0x73), region = 68  ;;  %458 = vst.msk [vmem:[#allocation2] sm:$0xff] (!%p3333_p5), %vm457_vm2, %v418_v1  ;;  %v497_v4 = vsel (!%p3333_p5), %vm457_vm2, %v418_v1, 0.0  ;;  %v582_v5 = vmul.f32 (!%p3333_p5), %v418_v1, %v418_v1  ;;  %459 = vst.msk [vmem:[#allocation2 + $0x8] sm:$0xff] (!%p3333_p5), %vm457_vm2, %v419_v2  ;;  %v498_v6 = vsel (!%p3333_p5), %vm457_vm2, %v419_v2, 0.0  ;;  %v583_v7 = vmul.f32 (!%p3333_p5), %v419_v2, %v419_v2  ;;  %v421_v8 = vld [vmem:[%s5931_s0 + $0x18] sm:$0xff] (!%p3333_p5) }
  0x18   : > { %460 = vst.msk [vmem:[#allocation2 + $0x10] sm:$0xff] (!%p3333_p5), %vm457_vm2, %v420_v3  ;;  %v422_v9 = vld [vmem:[%s5931_s0 + $0x20] sm:$0xff] (!%p3333_p5)  ;;  %v423_v10 = vld [vmem:[%s5931_s0 + $0x28] sm:$0xff] (!%p3333_p5)  ;;  %v499_v11 = vadd.f32 (!%p3333_p5), %v498_v6, %v497_v4  ;;  %v500_v12 = vsel (!%p3333_p5), %vm457_vm2, %v420_v3, 0.0  ;;  %v584_v13 = vmul.f32 (!%p3333_p5), %v420_v3, %v420_v3  ;;  %461 = vst.msk [vmem:[#allocation2 + $0x18] sm:$0xff] (!%p3333_p5), %vm457_vm2, %v421_v8  ;;  %v502_v19 = vsel (!%p3333_p5), %vm457_vm2, %v421_v8, 0.0 }
  0x19   : > { %462 = vst.msk [vmem:[#allocation2 + $0x20] sm:$0xff] (!%p3333_p5), %vm457_vm2, %v422_v9  ;;  %463 = vst.msk [vmem:[#allocation2 + $0x28] sm:$0xff] (!%p3333_p5), %vm457_vm2, %v423_v10  ;;  %v424_v14 = vld [vmem:[%s5931_s0 + $0x30] sm:$0xff] (!%p3333_p5)  ;;  %v4071_v15 = vld [vmem:[%s5931_s0 + $0x38] sm:$0xff] (!%p3333_p5)  ;;  %v620_v17 = vsel (!%p3333_p5), %vm457_vm2, %v582_v5, 0.0  ;;  %v621_v18 = vsel (!%p3333_p5), %vm457_vm2, %v583_v7, 0.0  ;;  %v585_v20 = vmul.f32 (!%p3333_p5), %v421_v8, %v421_v8  ;;  %v586_v27 = vmul.f32 (!%p3333_p5), %v422_v9, %v422_v9 }
  0x1a   : > { %v4076_v16 = vld [vmem:[%s5931_s0 + $0x40] sm:$0xff] (!%p3333_p5)  ;;  %464 = vst.msk [vmem:[#allocation2 + $0x30] sm:$0xff] (!%p3333_p5), %vm457_vm2, %v424_v14  ;;  %465 = vst.msk [vmem:[#allocation2 + $0x38] sm:$0xff] (!%p3333_p5), %vm457_vm2, %v4071_v15  ;;  %v4089_v21 = vld [vmem:[%s5931_s0 + $0x48] sm:$0xff] (!%p3333_p5)  ;;  %v622_v24 = vadd.f32 (!%p3333_p5), %v621_v18, %v620_v17  ;;  %v501_v25 = vadd.f32 (!%p3333_p5), %v500_v12, %v499_v11  ;;  %v623_v26 = vsel (!%p3333_p5), %vm457_vm2, %v584_v13, 0.0  ;;  %v504_v32 = vsel (!%p3333_p5), %vm457_vm2, %v422_v9, 0.0 }
  0x1b   : > { %466 = vst.msk [vmem:[#allocation2 + $0x40] sm:$0xff] (!%p3333_p5), %vm457_vm2, %v4076_v16  ;;  %v4094_v22 = vld [vmem:[%s5931_s0 + $0x50] sm:$0xff] (!%p3333_p5)  ;;  %v4099_v23 = vld [vmem:[%s5931_s0 + $0x58] sm:$0xff] (!%p3333_p5)  ;;  %467 = vst.msk [vmem:[#allocation2 + $0x48] sm:$0xff] (!%p3333_p5), %vm457_vm2, %v4089_v21  ;;  %v625_v31 = vsel (!%p3333_p5), %vm457_vm2, %v585_v20, 0.0  ;;  %v587_v33 = vmul.f32 (!%p3333_p5), %v423_v10, %v423_v10  ;;  %v627_v42 = vsel (!%p3333_p5), %vm457_vm2, %v586_v27, 0.0  ;;  %v588_v44 = vmul.f32 (!%p3333_p5), %v424_v14, %v424_v14 }
  0x1c   : > { %468 = vst.msk [vmem:[#allocation2 + $0x50] sm:$0xff] (!%p3333_p5), %vm457_vm2, %v4094_v22  ;;  %469 = vst.msk [vmem:[#allocation2 + $0x58] sm:$0xff] (!%p3333_p5), %vm457_vm2, %v4099_v23  ;;  %v4111_v28 = vld [vmem:[%s5931_s0 + $0x60] sm:$0xff] (!%p3333_p5)  ;;  %v4116_v29 = vld [vmem:[%s5931_s0 + $0x68] sm:$0xff] (!%p3333_p5)  ;;  %v624_v37 = vadd.f32 (!%p3333_p5), %v623_v26, %v622_v24  ;;  %v503_v38 = vadd.f32 (!%p3333_p5), %v502_v19, %v501_v25  ;;  %v506_v43 = vsel (!%p3333_p5), %vm457_vm2, %v423_v10, 0.0  ;;  %v508_v54 = vsel (!%p3333_p5), %vm457_vm2, %v424_v14, 0.0 }
  0x1d   : > { %v4121_v30 = vld [vmem:[%s5931_s0 + $0x70] sm:$0xff] (!%p3333_p5)  ;;  %470 = vst.msk [vmem:[#allocation2 + $0x60] sm:$0xff] (!%p3333_p5), %vm457_vm2, %v4111_v28  ;;  %471 = vst.msk [vmem:[#allocation2 + $0x68] sm:$0xff] (!%p3333_p5), %vm457_vm2, %v4116_v29  ;;  %v4134_v34 = vld [vmem:[%s5931_s0 + $0x78] sm:$0xff] (!%p3333_p5)  ;;  %v629_v53 = vsel (!%p3333_p5), %vm457_vm2, %v587_v33, 0.0  ;;  %v589_v55 = vmul.f32 (!%p3333_p5), %v4071_v15, %v4071_v15  ;;  %v631_v0 = vsel (!%p3333_p5), %vm457_vm2, %v588_v44, 0.0  ;;  %v590_v2 = vmul.f32 (!%p3333_p5), %v4076_v16, %v4076_v16 }
  0x1e   : > { %472 = vst.msk [vmem:[#allocation2 + $0x70] sm:$0xff] %vm457_vm2, %v4121_v30  ;;  %v4139_v35 = vld [vmem:[%s5931_s0 + $0x80] sm:$0xff]  ;;  %v4144_v36 = vld [vmem:[%s5931_s0 + $0x88] sm:$0xff]  ;;  %473 = vst.msk [vmem:[#allocation2 + $0x78] sm:$0xff] %vm457_vm2, %v4134_v34  ;;  %v626_v48 = vadd.f32 %v625_v31, %v624_v37  ;;  %v505_v49 = vadd.f32 %v504_v32, %v503_v38  ;;  %v510_v1 = vsel %vm457_vm2, %v4071_v15, 0.0  ;;  %v512_v11 = vsel %vm457_vm2, %v4076_v16, 0.0 }
  0x1f   : > { %474 = vst.msk [vmem:[#allocation2 + $0x80] sm:$0xff] %vm457_vm2, %v4139_v35  ;;  %475 = vst.msk [vmem:[#allocation2 + $0x88] sm:$0xff] %vm457_vm2, %v4144_v36  ;;  %v4155_v39 = vld [vmem:[%s5931_s0 + $0x90] sm:$0xff]  ;;  %v4160_v40 = vld [vmem:[%s5931_s0 + $0x98] sm:$0xff]  ;;  %v633_v10 = vsel %vm457_vm2, %v589_v55, 0.0  ;;  %v591_v12 = vmul.f32 %v4089_v21, %v4089_v21  ;;  %v635_v15 = vsel %vm457_vm2, %v590_v2, 0.0  ;;  %v592_v18 = vmul.f32 %v4094_v22, %v4094_v22 }
  0x20   : > { %v4165_v41 = vld [vmem:[%s5931_s0 + $0xa0] sm:$0xff]  ;;  %476 = vst.msk [vmem:[#allocation2 + $0x90] sm:$0xff] %vm457_vm2, %v4155_v39  ;;  %477 = vst.msk [vmem:[#allocation2 + $0x98] sm:$0xff] %vm457_vm2, %v4160_v40  ;;  %v4178_v45 = vld [vmem:[%s5931_s0 + $0xa8] sm:$0xff]  ;;  %v628_v59 = vadd.f32 %v627_v42, %v626_v48  ;;  %v507_v60 = vadd.f32 %v506_v43, %v505_v49  ;;  %v514_v17 = vsel %vm457_vm2, %v4089_v21, 0.0  ;;  %v516_v24 = vsel %vm457_vm2, %v4094_v22, 0.0 }
  0x21   : > { %478 = vst.msk [vmem:[#allocation2 + $0xa0] sm:$0xff] %vm457_vm2, %v4165_v41  ;;  %v4183_v46 = vld [vmem:[%s5931_s0 + $0xb0] sm:$0xff]  ;;  %v4188_v47 = vld [vmem:[%s5931_s0 + $0xb8] sm:$0xff]  ;;  %479 = vst.msk [vmem:[#allocation2 + $0xa8] sm:$0xff] %vm457_vm2, %v4178_v45  ;;  %v637_v20 = vsel %vm457_vm2, %v591_v12, 0.0  ;;  %v593_v25 = vmul.f32 %v4099_v23, %v4099_v23  ;;  %v639_v31 = vsel %vm457_vm2, %v592_v18, 0.0  ;;  %v594_v32 = vmul.f32 %v4111_v28, %v4111_v28 }
  0x22   : > { %480 = vst.msk [vmem:[#allocation2 + $0xb0] sm:$0xff] %vm457_vm2, %v4183_v46  ;;  %481 = vst.msk [vmem:[#allocation2 + $0xb8] sm:$0xff] %vm457_vm2, %v4188_v47  ;;  %v4199_v50 = vld [vmem:[%s5931_s0 + $0xc0] sm:$0xff]  ;;  %v4204_v51 = vld [vmem:[%s5931_s0 + $0xc8] sm:$0xff]  ;;  %v630_v6 = vadd.f32 %v629_v53, %v628_v59  ;;  %v509_v7 = vadd.f32 %v508_v54, %v507_v60  ;;  %v518_v21 = vsel %vm457_vm2, %v4099_v23, 0.0  ;;  %v520_v22 = vsel %vm457_vm2, %v4111_v28, 0.0 }
  0x23   : > { %v4209_v52 = vld [vmem:[%s5931_s0 + $0xd0] sm:$0xff]  ;;  %482 = vst.msk [vmem:[#allocation2 + $0xc0] sm:$0xff] %vm457_vm2, %v4199_v50  ;;  %483 = vst.msk [vmem:[#allocation2 + $0xc8] sm:$0xff] %vm457_vm2, %v4204_v51  ;;  %v4224_v56 = vld [vmem:[%s5931_s0 + $0xd8] sm:$0xff]  ;;  %v641_v38 = vsel %vm457_vm2, %v593_v25, 0.0  ;;  %v595_v42 = vmul.f32 %v4116_v29, %v4116_v29  ;;  %v643_v48 = vsel %vm457_vm2, %v594_v32, 0.0  ;;  %v596_v49 = vmul.f32 %v4121_v30, %v4121_v30 }
  0x24   : > { %484 = vst.msk [vmem:[#allocation2 + $0xd0] sm:$0xff] %vm457_vm2, %v4209_v52  ;;  %v4229_v57 = vld [vmem:[%s5931_s0 + $0xe0] sm:$0xff]  ;;  %v4234_v58 = vld [vmem:[%s5931_s0 + $0xe8] sm:$0xff]  ;;  %485 = vst.msk [vmem:[#allocation2 + $0xd8] sm:$0xff] %vm457_vm2, %v4224_v56  ;;  %v632_v13 = vadd.f32 %v631_v0, %v630_v6  ;;  %v511_v14 = vadd.f32 %v510_v1, %v509_v7  ;;  %v522_v23 = vsel %vm457_vm2, %v4116_v29, 0.0  ;;  %v524_v28 = vsel %vm457_vm2, %v4121_v30, 0.0 }
  0x25   : > { %486 = vst.msk [vmem:[#allocation2 + $0xe0] sm:$0xff] %vm457_vm2, %v4229_v57  ;;  %487 = vst.msk [vmem:[#allocation2 + $0xe8] sm:$0xff] %vm457_vm2, %v4234_v58  ;;  %v4245_v61 = vld [vmem:[%s5931_s0 + $0xf0] sm:$0xff]  ;;  %v4250_v62 = vld [vmem:[%s5931_s0 + $0xf8] sm:$0xff]  ;;  %v645_v55 = vsel %vm457_vm2, %v595_v42, 0.0  ;;  %v597_v59 = vmul.f32 %v4134_v34, %v4134_v34  ;;  %v647_v1 = vsel %vm457_vm2, %v596_v49, 0.0  ;;  %v598_v2 = vmul.f32 %v4139_v35, %v4139_v35 }
  0x26   : > { %v4255_v63 = vld [vmem:[%s5931_s0 + $0x100] sm:$0xff]  ;;  %488 = vst.msk [vmem:[#allocation2 + $0xf0] sm:$0xff] %vm457_vm2, %v4245_v61  ;;  %489 = vst.msk [vmem:[#allocation2 + $0xf8] sm:$0xff] %vm457_vm2, %v4250_v62  ;;  %v4271_v3 = vld [vmem:[%s5931_s0 + $0x108] sm:$0xff]  ;;  %v634_v16 = vadd.f32 %v633_v10, %v632_v13  ;;  %v513_v19 = vadd.f32 %v512_v11, %v511_v14  ;;  %v526_v29 = vsel %vm457_vm2, %v4134_v34, 0.0  ;;  %v528_v30 = vsel %vm457_vm2, %v4139_v35, 0.0 }
  0x27   : > { %490 = vst.msk [vmem:[#allocation2 + $0x100] sm:$0xff] %vm457_vm2, %v4255_v63  ;;  %v4276_v4 = vld [vmem:[%s5931_s0 + $0x110] sm:$0xff]  ;;  %v4281_v5 = vld [vmem:[%s5931_s0 + $0x118] sm:$0xff]  ;;  %491 = vst.msk [vmem:[#allocation2 + $0x108] sm:$0xff] %vm457_vm2, %v4271_v3  ;;  %v649_v10 = vsel %vm457_vm2, %v597_v59, 0.0  ;;  %v599_v11 = vmul.f32 %v4144_v36, %v4144_v36  ;;  %v651_v14 = vsel %vm457_vm2, %v598_v2, 0.0  ;;  %v603_v32 = vmul.f32 %v4178_v45, %v4178_v45 }
  0x28   : > { %492 = vst.msk [vmem:[#allocation2 + $0x110] sm:$0xff] %vm457_vm2, %v4276_v4  ;;  %493 = vst.msk [vmem:[#allocation2 + $0x118] sm:$0xff] %vm457_vm2, %v4281_v5  ;;  %v4292_v8 = vld [vmem:[%s5931_s0 + $0x120] sm:$0xff]  ;;  %v4297_v9 = vld [vmem:[%s5931_s0 + $0x128] sm:$0xff]  ;;  %v636_v26 = vadd.f32 %v635_v15, %v634_v16  ;;  %v515_v27 = vadd.f32 %v514_v17, %v513_v19  ;;  %v530_v34 = vsel %vm457_vm2, %v4144_v36, 0.0  ;;  %v600_v15 = vmul.f32 %v4155_v39, %v4155_v39 }
  0x29   : > { %494 = vst.msk [vmem:[#allocation2 + $0x120] sm:$0xff] %vm457_vm2, %v4292_v8  ;;  %495 = vst.msk [vmem:[#allocation2 + $0x128] sm:$0xff] %vm457_vm2, %v4297_v9  ;;  %v653_v16 = vsel %vm457_vm2, %v599_v11, 0.0  ;;  %v532_v35 = vsel %vm457_vm2, %v4155_v39, 0.0  ;;  %v601_v19 = vmul.f32 %v4160_v40, %v4160_v40  ;;  %v534_v36 = vsel %vm457_vm2, %v4160_v40, 0.0 }
  0x2a   : > { %v638_v33 = vadd.f32 %v637_v20, %v636_v26  ;;  %v517_v37 = vadd.f32 %v516_v24, %v515_v27  ;;  %v655_v25 = vsel %vm457_vm2, %v600_v15, 0.0  ;;  %v602_v26 = vmul.f32 %v4165_v41, %v4165_v41 }
  0x2b   : > { %v536_v39 = vsel %vm457_vm2, %v4165_v41, 0.0  ;;  %v538_v40 = vsel %vm457_vm2, %v4178_v45, 0.0  ;;  %v540_v41 = vsel %vm457_vm2, %v4183_v46, 0.0  ;;  %v542_v45 = vsel %vm457_vm2, %v4188_v47, 0.0 }
  0x2c   : > { %v640_v43 = vadd.f32 %v639_v31, %v638_v33  ;;  %v519_v44 = vadd.f32 %v518_v21, %v517_v37  ;;  %v657_v21 = vsel %vm457_vm2, %v601_v19, 0.0  ;;  %v608_v2 = vmul.f32 %v4209_v52, %v4209_v52 }
  0x2e   : > { %v642_v53 = vadd.f32 %v641_v38, %v640_v43  ;;  %v521_v54 = vadd.f32 %v520_v22, %v519_v44  ;;  %v659_v38 = vsel %vm457_vm2, %v602_v26, 0.0  ;;  %v604_v22 = vmul.f32 %v4183_v46, %v4183_v46 }
  0x2f   : > { %v661_v44 = vsel %vm457_vm2, %v603_v32, 0.0  ;;  %v544_v46 = vsel %vm457_vm2, %v4199_v50, 0.0  ;;  %v613_v26 = vmul.f32 %v4250_v62, %v4250_v62 }
  0x30   : > { %v644_v60 = vadd.f32 %v643_v48, %v642_v53  ;;  %v523_v0 = vadd.f32 %v522_v23, %v521_v54  ;;  %v605_v48 = vmul.f32 %v4188_v47, %v4188_v47  ;;  %v663_v53 = vsel %vm457_vm2, %v604_v22, 0.0 }
  0x31   : > { %v606_v54 = vmul.f32 %v4199_v50, %v4199_v50  ;;  %v546_v47 = vsel %vm457_vm2, %v4204_v51, 0.0  ;;  %v548_v50 = vsel %vm457_vm2, %v4209_v52, 0.0  ;;  %v552_v52 = vsel %vm457_vm2, %v4229_v57, 0.0 }
  0x32   : > { %v646_v6 = vadd.f32 %v645_v55, %v644_v60  ;;  %v525_v7 = vadd.f32 %v524_v28, %v523_v0  ;;  %v665_v59 = vsel %vm457_vm2, %v605_v48, 0.0  ;;  %v607_v60 = vmul.f32 %v4204_v51, %v4204_v51 }
  0x33   : > { %v550_v51 = vsel %vm457_vm2, %v4224_v56, 0.0 }
  0x34   : > { %v648_v12 = vadd.f32 %v647_v1, %v646_v6  ;;  %v527_v13 = vadd.f32 %v526_v29, %v525_v7  ;;  %v667_v29 = vsel %vm457_vm2, %v606_v54, 0.0  ;;  %v618_v54 = vmul.f32 %v4292_v8, %v4292_v8 }
  0x36   : > { %v650_v17 = vadd.f32 %v649_v10, %v648_v12  ;;  %v529_v18 = vadd.f32 %v528_v30, %v527_v13  ;;  %v669_v10 = vsel %vm457_vm2, %v607_v60, 0.0  ;;  %v609_v30 = vmul.f32 %v4224_v56, %v4224_v56 }
  0x37   : > { %v671_v13 = vsel %vm457_vm2, %v608_v2, 0.0  ;;  %v554_v56 = vsel %vm457_vm2, %v4234_v58, 0.0 }
  0x38   : > { %v652_v20 = vadd.f32 %v651_v14, %v650_v17  ;;  %v531_v24 = vadd.f32 %v530_v34, %v529_v18  ;;  %v610_v14 = vmul.f32 %v4229_v57, %v4229_v57  ;;  %v673_v17 = vsel %vm457_vm2, %v609_v30, 0.0 }
  0x39   : > { %v611_v18 = vmul.f32 %v4234_v58, %v4234_v58  ;;  %v556_v57 = vsel %vm457_vm2, %v4245_v61, 0.0  ;;  %v558_v58 = vsel %vm457_vm2, %v4250_v62, 0.0  ;;  %v562_v62 = vsel %vm457_vm2, %v4271_v3, 0.0 }
  0x3a   : > { %v654_v27 = vadd.f32 %v653_v16, %v652_v20  ;;  %v533_v31 = vadd.f32 %v532_v35, %v531_v24  ;;  %v675_v19 = vsel %vm457_vm2, %v610_v14, 0.0  ;;  %v612_v20 = vmul.f32 %v4245_v61, %v4245_v61 }
  0x3b   : > { %v560_v61 = vsel %vm457_vm2, %v4255_v63, 0.0 }
  0x3c   : > { %v656_v33 = vadd.f32 %v655_v25, %v654_v27  ;;  %v535_v37 = vadd.f32 %v534_v36, %v533_v31  ;;  %v677_v36 = vsel %vm457_vm2, %v611_v18, 0.0 }
  0x3e   : > { %v658_v42 = vadd.f32 %v657_v21, %v656_v33  ;;  %v537_v43 = vadd.f32 %v536_v39, %v535_v37  ;;  %v679_v21 = vsel %vm457_vm2, %v612_v20, 0.0  ;;  %v614_v39 = vmul.f32 %v4255_v63, %v4255_v63 }
  0x3f   : > { %v681_v37 = vsel %vm457_vm2, %v613_v26, 0.0  ;;  %v564_v63 = vsel %vm457_vm2, %v4276_v4, 0.0 }
  0x40   : > { %v660_v23 = vadd.f32 %v659_v38, %v658_v42  ;;  %v539_v49 = vadd.f32 %v538_v40, %v537_v43  ;;  %v615_v38 = vmul.f32 %v4271_v3, %v4271_v3  ;;  %v683_v42 = vsel %vm457_vm2, %v614_v39, 0.0 }
  0x41   : > { %v616_v43 = vmul.f32 %v4276_v4, %v4276_v4  ;;  %v566_v3 = vsel %vm457_vm2, %v4281_v5, 0.0  ;;  %v568_v4 = vsel %vm457_vm2, %v4292_v8, 0.0 }
  0x42   : > { %v662_v55 = vadd.f32 %v661_v44, %v660_v23  ;;  %v541_v28 = vadd.f32 %v540_v41, %v539_v49  ;;  %v685_v48 = vsel %vm457_vm2, %v615_v38, 0.0  ;;  %v617_v23 = vmul.f32 %v4281_v5, %v4281_v5 }
  0x43   : > { %v570_v5 = vsel %vm457_vm2, %v4297_v9, 0.0 }
  0x44   : > { %v664_v0 = vadd.f32 %v663_v53, %v662_v55  ;;  %v543_v1 = vadd.f32 %v542_v45, %v541_v28  ;;  %v687_v45 = vsel %vm457_vm2, %v616_v43, 0.0 }
  0x46   : > { %v666_v6 = vadd.f32 %v665_v59, %v664_v0  ;;  %v545_v7 = vadd.f32 %v544_v46, %v543_v1  ;;  %v689_v59 = vsel %vm457_vm2, %v617_v23, 0.0  ;;  %v619_v46 = vmul.f32 %v4297_v9, %v4297_v9  ;;  %v581_v9 = vld [vmem:[#allocation6] sm:$0x1] }
  0x47   : > { %v691_v1 = vsel %vm457_vm2, %v618_v54, 0.0 }
  0x48   : > { %v668_v11 = vadd.f32 %v667_v29, %v666_v6  ;;  %v547_v12 = vadd.f32 %v546_v47, %v545_v7  ;;  %v693_v2 = vsel %vm457_vm2, %v619_v46, 0.0 }
  0x4a   : > { %v670_v34 = vadd.f32 %v669_v10, %v668_v11  ;;  %v549_v15 = vadd.f32 %v548_v50, %v547_v12 }
  0x4c   : > { %v672_v16 = vadd.f32 %v671_v13, %v670_v34  ;;  %v551_v35 = vadd.f32 %v550_v51, %v549_v15  ;;  %v496_v15 = vld [vmem:[#allocation5] sm:$0x1] }
  0x4e   : > { %v674_v24 = vadd.f32 %v673_v17, %v672_v16  ;;  %v553_v25 = vadd.f32 %v552_v52, %v551_v35 }
  0x50   : > { %v676_v27 = vadd.f32 %v675_v19, %v674_v24  ;;  %v555_v31 = vadd.f32 %v554_v56, %v553_v25 }
  0x52   : > { %v678_v32 = vadd.f32 %v677_v36, %v676_v27  ;;  %v557_v33 = vadd.f32 %v556_v57, %v555_v31 }
  0x54   : > { %v680_v40 = vadd.f32 %v679_v21, %v678_v32  ;;  %v559_v22 = vadd.f32 %v558_v58, %v557_v33 }
  0x56   : > { %v682_v44 = vadd.f32 %v681_v37, %v680_v40  ;;  %v561_v41 = vadd.f32 %v560_v61, %v559_v22 }
  0x58   : > { %v684_v49 = vadd.f32 %v683_v42, %v682_v44  ;;  %v563_v53 = vadd.f32 %v562_v62, %v561_v41 }
  0x5a   : > { %v686_v55 = vadd.f32 %v685_v48, %v684_v49  ;;  %v565_v28 = vadd.f32 %v564_v63, %v563_v53 }
  0x5c   : > { %v688_v60 = vadd.f32 %v687_v45, %v686_v55  ;;  %v567_v0 = vadd.f32 %v566_v3, %v565_v28 }
  0x5e   : > { %v690_v29 = vadd.f32 %v689_v59, %v688_v60  ;;  %v569_v47 = vadd.f32 %v568_v4, %v567_v0 }
  0x60   : > { %v692_v6 = vadd.f32 %v691_v1, %v690_v29  ;;  %v571_v7 = vadd.f32 %v570_v5, %v569_v47 }
  0x62   : > { %v572_v10 = vrot.slane %v571_v7, 4  ;;  %v694_v50 = vadd.f32 %v693_v2, %v692_v6 }
  0x64   : > { %v573_v30 = vadd.f32 %v572_v10, %v571_v7  ;;  %v695_v8 = vrot.slane %v694_v50, 4 }
  0x66   : > { %v574_v11 = vrot.slane %v573_v30, 2  ;;  %v696_v12 = vadd.f32 %v695_v8, %v694_v50 }
  0x68   : > { %v575_v13 = vadd.f32 %v574_v11, %v573_v30  ;;  %v697_v51 = vrot.slane %v696_v12, 2 }
  0x6a   : > { %v576_v14 = vrot.slane %v575_v13, 1  ;;  %v698_v34 = vadd.f32 %v697_v51, %v696_v12 }
  0x6c   : > { %v577_v17 = vadd.f32 %v576_v14, %v575_v13  ;;  %v699_v52 = vrot.slane %v698_v34, 1 }
  0x6e   : > { %v578_v18 = vadd.f32 %v577_v17, %v496_v15  ;;  %v700_v16 = vadd.f32 %v699_v52, %v698_v34 }
  0x70   : > { %580 = vst.msk [vmem:[#allocation5] sm:$0x1] %vm579_vm3, %v578_v18  ;;  %v701_v35 = vadd.f32 %v700_v16, %v581_v9 }
  0x72   : > { %702 = vst.msk [vmem:[#allocation6] sm:$0x1] %vm579_vm3, %v701_v35 }
  0x73 PF: > { %p3334_p6 = scmp.ne.s32.totalorder %s3944_s13, 1 }
  0x74   : > { %v3764_v19 = vld [vmem:[%s5933_s2] sm:$0xff] (!%p3334_p6)   ;;  %v3955_v56 = vmov (!%p3334_p6), 0.0   ;;  %v3765_v20 = vld [vmem:[%s5933_s2 + $0x8] sm:$0xff] (!%p3334_p6)   ;;  %vm3956_vm4 = vmmov (!%p3334_p6), 0   ;;  %v758_v58 = vlaneseq (!%p3334_p6)  ;;  %v721_v43 = vld [vmem:[#allocation2 + $0x10] sm:$0xff] (!%p3334_p6)  ;;  %vm836_vm5 = vcmask (!%p3334_p6), 261120  }
  0x75   : > { %706 = sbr.rel (%p3334_p6) target bundleno = 491 (0x1eb), region = 72  ;;  %3473 = vmatprep.subr.bf16.mxu0 (!%p3334_p6), %v3955_v56  ;;  %3717 = vmatprep.subr.bf16.mxu1 (!%p3334_p6), %v3955_v56  ;;  %v714_v32 = vld [vmem:[%s5932_s1] sm:$0x1] (!%p3334_p6)  ;;  %v720_v40 = vld [vmem:[#allocation2 + $0x8] sm:$0xff] (!%p3334_p6)  ;;  %v722_v44 = vld [vmem:[#allocation2 + $0x18] sm:$0xff] (!%p3334_p6)  ;;  %vm1080_vm6 = vcmask (!%p3334_p6), 523264  }
  0x76   : > { %3474 = vmatpush3.bf16.msra.mxu0 (!%p3334_p6), %v3764_v19  ;;  %3477 = vmatprep.mubr.msk.bf16.mxu0 (!%p3334_p6), %vm3956_vm4, %v3955_v56  ;;  %v759_v39 = vshrl.u32 (!%p3334_p6), %v758_v58, 7  ;;  %v719_v38 = vld [vmem:[#allocation2] sm:$0xff] (!%p3334_p6)  ;;  %v740_v48 = vld [vmem:[#allocation2 + $0xa8] sm:$0xff] (!%p3334_p6)  ;;  %v741_v3 = vld [vmem:[#allocation2 + $0xb0] sm:$0xff] (!%p3334_p6)  ;;  %vm1202_vm7 = vcmask (!%p3334_p6), 516096  }
  0x77   : > { %v707_v24 = vld [vmem:[#allocation5] sm:$0x1] (!%p3334_p6)  ;;  %3475 = vmatprep.subr.bf16.mxu0 (!%p3334_p6), %v3955_v56  ;;  %3719 = vmatpush3.bf16.msra.mxu1 (!%p3334_p6), %v3764_v19  ;;  %v739_v41 = vld [vmem:[#allocation2 + $0xa0] sm:$0xff] (!%p3334_p6)  ;;  %v742_v54 = vld [vmem:[#allocation2 + $0xb8] sm:$0xff] (!%p3334_p6) }
  0x78   : > { %v708_v36 = vmul.f32 (!%p3334_p6), 0.0033333334, %v707_v24  ;;  %3718 = vmatprep.subr.bf16.mxu1 (!%p3334_p6), %v3955_v56  ;;  %3517 = vmatprep.mubr.msk.bf16.mxu1 (!%p3334_p6), %vm3956_vm4, %v3955_v56  ;;  %v760_v33 = vsub.s32 (!%p3334_p6), 0, %v759_v39  ;;  %v723_v46 = vld [vmem:[#allocation2 + $0x20] sm:$0xff] (!%p3334_p6)  ;;  %v724_v60 = vld [vmem:[#allocation2 + $0x28] sm:$0xff] (!%p3334_p6)  ;;  %v725_v10 = vld [vmem:[#allocation2 + $0x30] sm:$0xff] (!%p3334_p6) }
  0x79   : > { %v709_v25 = vld [vmem:[#allocation6] sm:$0x1] (!%p3334_p6)  ;;  %v743_v29 = vld [vmem:[#allocation2 + $0xc0] sm:$0xff] (!%p3334_p6)  ;;  %v744_v47 = vld [vmem:[#allocation2 + $0xc8] sm:$0xff] (!%p3334_p6) }
  0x7a   : > { %v710_v57 = vmul.f32 (!%p3334_p6), 0.0033333334, %v709_v25  ;;  %v711_v26 = vmul.f32 (!%p3334_p6), %v708_v36, %v708_v36  ;;  %3476 = vmatpush3.bf16.msra.mxu0 (!%p3334_p6), %v3765_v20  ;;  %v726_v50 = vld [vmem:[#allocation2 + $0x38] sm:$0xff] (!%p3334_p6)  ;;  %v745_v12 = vld [vmem:[#allocation2 + $0xd0] sm:$0xff] (!%p3334_p6)  ;;  %v727_v15 = vld [vmem:[#allocation2 + $0x40] sm:$0xff] (!%p3334_p6) }
  0x7b   : > { %3720 = vmatpush3.bf16.msra.mxu1 (!%p3334_p6), %v3765_v20  ;;  %v746_v13 = vld [vmem:[#allocation2 + $0xd8] sm:$0xff] (!%p3334_p6)  ;;  %v728_v17 = vld [vmem:[#allocation2 + $0x48] sm:$0xff] (!%p3334_p6)  ;;  %v747_v16 = vld [vmem:[#allocation2 + $0xe0] sm:$0xff] (!%p3334_p6) }
  0x7c   : > { %v712_v27 = vsub.f32 %v710_v57, %v711_v26  ;;  %v748_v35 = vld [vmem:[#allocation2 + $0xe8] sm:$0xff]  ;;  %v729_v25 = vld [vmem:[#allocation2 + $0x50] sm:$0xff]  ;;  %v730_v36 = vld [vmem:[#allocation2 + $0x58] sm:$0xff] }
  0x7e   : > { %v713_v31 = vmax.f32 %v712_v27, 0.0 }
  0x80   : > { %v715_v21 = vadd.f32 1e-05, %v713_v31  ;;  %v749_v31 = vld [vmem:[#allocation2 + $0xf0] sm:$0xff] }
  0x82   : > { %3766 = vrsqrt.f32 %v715_v21  ;;  %v750_v21 = vld [vmem:[#allocation2 + $0xf8] sm:$0xff] }
  0x8c   : > { %v3767_v37 = vpop.eup %3766 }
  0x8d   : > { %v717_v61 = vmul.f32 %v3767_v37, %v714_v32  ;;  %v732_v37 = vld [vmem:[#allocation2 + $0x68] sm:$0xff] }
  0x8f   : > { %v4470_v22 = vrot.slane %v717_v61, %v760_v33  ;;  %v731_v33 = vld [vmem:[#allocation2 + $0x60] sm:$0xff] }
  0x91   : > { %v763_v42 = vmul.f32 %v4470_v22, %v719_v38  ;;  %v764_v62 = vmul.f32 %v4470_v22, %v720_v40  ;;  %v765_v23 = vmul.f32 %v4470_v22, %v721_v43  ;;  %v766_v49 = vmul.f32 %v4470_v22, %v722_v44 }
  0x92   : > { %v783_v53 = vmul.f32 %v4470_v22, %v739_v41  ;;  %v784_v45 = vmul.f32 %v4470_v22, %v740_v48  ;;  %v785_v59 = vmul.f32 %v4470_v22, %v741_v3  ;;  %v786_v4 = vmul.f32 %v4470_v22, %v742_v54  ;;  %v733_v48 = vld [vmem:[#allocation2 + $0x70] sm:$0xff]  ;;  %v754_v3 = vld [vmem:[#allocation2 + $0x118] sm:$0xff] }
  0x93   : > { %v801_v63 = vpack.c.bf16 %v764_v62, %v763_v42  ;;  %v802_v28 = vpack.c.bf16 %v766_v49, %v765_v23  ;;  %v767_v0 = vmul.f32 %v4470_v22, %v723_v46  ;;  %v768_v1 = vmul.f32 %v4470_v22, %v724_v60  ;;  %v751_v42 = vld [vmem:[#allocation2 + $0x100] sm:$0xff]  ;;  %v752_v62 = vld [vmem:[#allocation2 + $0x108] sm:$0xff] }
  0x94   : > { %v811_v55 = vpack.c.bf16 %v784_v45, %v783_v53  ;;  %v812_v5 = vpack.c.bf16 %v786_v4, %v785_v59  ;;  %v787_v6 = vmul.f32 %v4470_v22, %v743_v29  ;;  %v788_v7 = vmul.f32 %v4470_v22, %v744_v47  ;;  %v753_v45 = vld [vmem:[#allocation2 + $0x110] sm:$0xff]  ;;  %v735_v59 = vld [vmem:[#allocation2 + $0x80] sm:$0xff]  ;;  %v736_v4 = vld [vmem:[#allocation2 + $0x88] sm:$0xff] }
  0x95   : > { %3478 = vmatmul.mubr.msk.bf16.vlgmr.msra.gmra.mrb[0].mxu0 %vm836_vm5, %v801_v63  ;;  %v803_v2 = vpack.c.bf16 %v768_v1, %v767_v0  ;;  %v769_v30 = vmul.f32 %v4470_v22, %v725_v10  ;;  %v770_v8 = vmul.f32 %v4470_v22, %v726_v50  ;;  %v789_v14 = vmul.f32 %v4470_v22, %v745_v12  ;;  %v734_v63 = vld [vmem:[#allocation2 + $0x78] sm:$0xff]  ;;  %v755_v1 = vld [vmem:[#allocation2 + $0x120] sm:$0xff] }
  0x96   : > { %3481 = vmatprep.mubr.msk.bf16.mxu0 %vm3956_vm4, %v3955_v56  ;;  %3518 = vmatmul.mubr.msk.bf16.vlgmr.msra.gmra.mrb[0].mxu1 %vm836_vm5, %v811_v55  ;;  %v813_v11 = vpack.c.bf16 %v788_v7, %v787_v6  ;;  %v790_v34 = vmul.f32 %v4470_v22, %v746_v13  ;;  %v771_v52 = vmul.f32 %v4470_v22, %v727_v15  ;;  %v737_v6 = vld [vmem:[#allocation2 + $0x90] sm:$0xff]  ;;  %v738_v7 = vld [vmem:[#allocation2 + $0x98] sm:$0xff] }
  0x97   : > { %3521 = vmatprep.mubr.msk.bf16.mxu1 %vm3956_vm4, %v3955_v56  ;;  %v804_v51 = vpack.c.bf16 %v770_v8, %v769_v30  ;;  %v772_v9 = vmul.f32 %v4470_v22, %v728_v17  ;;  %v791_v20 = vmul.f32 %v4470_v22, %v747_v16  ;;  %v792_v24 = vmul.f32 %v4470_v22, %v748_v35 }
  0x98   : > { %v814_v18 = vpack.c.bf16 %v790_v34, %v789_v14  ;;  %v773_v57 = vmul.f32 %v4470_v22, %v729_v25  ;;  %v774_v26 = vmul.f32 %v4470_v22, %v730_v36  ;;  %v793_v39 = vmul.f32 %v4470_v22, %v749_v31 }
  0x99   : > { %v805_v19 = vpack.c.bf16 %v772_v9, %v771_v52  ;;  %v815_v27 = vpack.c.bf16 %v792_v24, %v791_v20  ;;  %v794_v32 = vmul.f32 %v4470_v22, %v750_v21  ;;  %v775_v61 = vmul.f32 %v4470_v22, %v731_v33 }
  0x9a   : > { %v806_v58 = vpack.c.bf16 %v774_v26, %v773_v57  ;;  %v776_v38 = vmul.f32 %v4470_v22, %v732_v37  ;;  %v795_v44 = vmul.f32 %v4470_v22, %v751_v42  ;;  %v796_v41 = vmul.f32 %v4470_v22, %v752_v62 }
  0x9b   : > { %v816_v40 = vpack.c.bf16 %v794_v32, %v793_v39  ;;  %v777_v23 = vmul.f32 %v4470_v22, %v733_v48  ;;  %v778_v49 = vmul.f32 %v4470_v22, %v734_v63  ;;  %v797_v55 = vmul.f32 %v4470_v22, %v753_v45 }
  0x9c   : > { %v807_v43 = vpack.c.bf16 %v776_v38, %v775_v61  ;;  %v817_v53 = vpack.c.bf16 %v796_v41, %v795_v44  ;;  %v779_v46 = vmul.f32 %v4470_v22, %v735_v59  ;;  %v780_v60 = vmul.f32 %v4470_v22, %v736_v4 }
  0x9d   : > { %3482 = vmatmul.mubr.msk.bf16.gmra.mrb[4].mxu0 %vm836_vm5, %v802_v28  ;;  %v808_v54 = vpack.c.bf16 %v778_v49, %v777_v23  ;;  %v798_v28 = vmul.f32 %v4470_v22, %v754_v3  ;;  %v799_v47 = vmul.f32 %v4470_v22, %v755_v1  ;;  %v781_v10 = vmul.f32 %v4470_v22, %v737_v6 }
  0x9e   : > { %3485 = vmatprep.mubr.msk.bf16.mxu0 %vm3956_vm4, %v3955_v56  ;;  %3522 = vmatmul.mubr.msk.bf16.gmra.mrb[4].mxu1 %vm836_vm5, %v812_v5  ;;  %v756_v5 = vld [vmem:[#allocation2 + $0x128] sm:$0xff]  ;;  %v809_v29 = vpack.c.bf16 %v780_v60, %v779_v46  ;;  %v782_v50 = vmul.f32 %v4470_v22, %v738_v7 }
  0x9f   : > { %3525 = vmatprep.mubr.msk.bf16.mxu1 %vm3956_vm4, %v3955_v56  ;;  %v818_v0 = vpack.c.bf16 %v798_v28, %v797_v55 }
  0xa0   : > { %v810_v8 = vpack.c.bf16 %v782_v50, %v781_v10 }
  0xa5   : > { %3486 = vmatmul.mubr.msk.bf16.gmra.mrb[8].mxu0 %vm836_vm5, %v803_v2  ;;  %v800_v2 = vmul.f32 %v4470_v22, %v756_v5 }
  0xa6   : > { %3489 = vmatprep.mubr.msk.bf16.mxu0 %vm3956_vm4, %v3955_v56  ;;  %3526 = vmatmul.mubr.msk.bf16.gmra.mrb[8].mxu1 %vm836_vm5, %v813_v11 }
  0xa7   : > { %3529 = vmatprep.mubr.msk.bf16.mxu1 %vm3956_vm4, %v3955_v56  ;;  %v819_v30 = vpack.c.bf16 %v800_v2, %v799_v47 }
  0xad   : > { %3490 = vmatmul.mubr.msk.bf16.gmra.mrb[12].mxu0 %vm836_vm5, %v804_v51 }
  0xae   : > { %3493 = vmatprep.mubr.msk.bf16.mxu0 %vm3956_vm4, %v3955_v56  ;;  %3530 = vmatmul.mubr.msk.bf16.gmra.mrb[12].mxu1 %vm836_vm5, %v814_v18 }
  0xaf   : > { %3533 = vmatprep.mubr.msk.bf16.mxu1 %vm3956_vm4, %v3955_v56 }
  0xb5   : > { %3494 = vmatmul.mubr.msk.bf16.gmra.mrb[16].mxu0 %vm836_vm5, %v805_v19 }
  0xb6   : > { %3497 = vmatprep.mubr.msk.bf16.mxu0 %vm3956_vm4, %v3955_v56  ;;  %3534 = vmatmul.mubr.msk.bf16.gmra.mrb[16].mxu1 %vm836_vm5, %v815_v27 }
  0xb7   : > { %3537 = vmatprep.mubr.msk.bf16.mxu1 %vm3956_vm4, %v3955_v56 }
  0xbd   : > { %3498 = vmatmul.mubr.msk.bf16.gmra.mrb[20].mxu0 %vm836_vm5, %v806_v58 }
  0xbe   : > { %3501 = vmatprep.mubr.msk.bf16.mxu0 %vm3956_vm4, %v3955_v56  ;;  %3538 = vmatmul.mubr.msk.bf16.gmra.mrb[20].mxu1 %vm836_vm5, %v816_v40 }
  0xbf   : > { %3541 = vmatprep.mubr.msk.bf16.mxu1 %vm3956_vm4, %v3955_v56 }
  0xc5   : > { %3502 = vmatmul.mubr.msk.bf16.gmra.mrb[24].mxu0 %vm836_vm5, %v807_v43 }
  0xc6   : > { %3505 = vmatprep.mubr.msk.bf16.mxu0 %vm3956_vm4, %v3955_v56  ;;  %3542 = vmatmul.mubr.msk.bf16.gmra.mrb[24].mxu1 %vm836_vm5, %v817_v53 }
  0xc7   : > { %3545 = vmatprep.mubr.msk.bf16.mxu1 %vm3956_vm4, %v3955_v56 }
  0xcd   : > { %3506 = vmatmul.mubr.msk.bf16.gmra.mrb[28].mxu0 %vm836_vm5, %v808_v54 }
  0xce   : > { %3509 = vmatprep.mubr.msk.bf16.mxu0 %vm3956_vm4, %v3955_v56  ;;  %3546 = vmatmul.mubr.msk.bf16.gmra.mrb[28].mxu1 %vm836_vm5, %v818_v0 }
  0xcf   : > { %3549 = vmatprep.mubr.msk.bf16.mxu1 %vm3956_vm4, %v3955_v56 }
  0xd5   : > { %3510 = vmatmul.mubr.msk.bf16.gmra.mrb[32].mxu0 %vm836_vm5, %v809_v29 }
  0xd6   : > { %3513 = vmatprep.mubr.msk.bf16.mxu0 %vm3956_vm4, %v3955_v56  ;;  %3550 = vmatmul.mubr.msk.bf16.gmra.mrb[32].mxu1 %vm836_vm5, %v819_v30 }
  0xdd   : > { %3514 = vmatmul.mubr.msk.bf16.gmra.mrb[36].mxu0 %vm836_vm5, %v810_v8 }
 0x168   : > { %v928_v11 = vpop.f32.mrb[0].mxu0 }
 0x169   : > { %1081 = vst.msk [vmem:[#allocation3] sm:$0xff] %vm1080_vm6, %v928_v11  ;;  %v1205_v12 = vmul.f32 %v928_v11, %v928_v11  ;;  %v3479_v13 = vpop.f32.mrb[1].mxu0  ;;  %v1120_v14 = vsel %vm1080_vm6, %v928_v11, 0.0  ;;  %v4567_v17 = vpop.f32.mrb[0].mxu1 }
 0x16a   : > { %v931_v51 = vpop.f32.mrb[2].mxu0  ;;  %1101 = vst.msk [vmem:[#allocation3 + $0xa0] sm:$0xff] %vm1080_vm6, %v4567_v17  ;;  %v3519_v18 = vpop.f32.mrb[1].mxu1 }
 0x16b   : > { %1082 = vst.msk [vmem:[#allocation3 + $0x8] sm:$0xff] %vm1080_vm6, %v931_v51  ;;  %v1121_v22 = vsel %vm1080_vm6, %v931_v51, 0.0  ;;  %v1206_v34 = vmul.f32 %v931_v51, %v931_v51  ;;  %v3480_v56 = vpop.f32.mrb[3].mxu0  ;;  %v1243_v52 = vsel %vm1080_vm6, %v1205_v12, 0.0  ;;  %v4573_v35 = vpop.f32.mrb[2].mxu1 }
 0x16c   : > { %v1122_v15 = vadd.f32 %v1121_v22, %v1120_v14  ;;  %1102 = vst.msk [vmem:[#allocation3 + $0xa8] sm:$0xff] %vm1080_vm6, %v4573_v35  ;;  %v3520_v19 = vpop.f32.mrb[3].mxu1 }
 0x16d   : > { %v1244_v9 = vsel %vm1080_vm6, %v1206_v34, 0.0 }
 0x16e   : > { %v1245_v16 = vadd.f32 %v1244_v9, %v1243_v52 }
 0x170   : > { %v936_v20 = vpop.f32.mrb[4].mxu0 }
 0x171   : > { %1083 = vst.msk [vmem:[#allocation3 + $0x10] sm:$0xff] %vm1080_vm6, %v936_v20  ;;  %v1123_v24 = vsel %vm1080_vm6, %v936_v20, 0.0  ;;  %v1207_v25 = vmul.f32 %v936_v20, %v936_v20  ;;  %v3483_v36 = vpop.f32.mrb[5].mxu0  ;;  %v4582_v33 = vpop.f32.mrb[4].mxu1 }
 0x172   : > { %v1124_v57 = vadd.f32 %v1123_v24, %v1122_v15  ;;  %v939_v26 = vpop.f32.mrb[6].mxu0  ;;  %1103 = vst.msk [vmem:[#allocation3 + $0xb0] sm:$0xff] %vm1080_vm6, %v4582_v33  ;;  %v3523_v61 = vpop.f32.mrb[5].mxu1 }
 0x173   : > { %v1246_v27 = vsel %vm1080_vm6, %v1207_v25, 0.0  ;;  %1084 = vst.msk [vmem:[#allocation3 + $0x18] sm:$0xff] %vm1080_vm6, %v939_v26  ;;  %v1125_v31 = vsel %vm1080_vm6, %v939_v26, 0.0  ;;  %v1208_v21 = vmul.f32 %v939_v26, %v939_v26  ;;  %v3484_v58 = vpop.f32.mrb[7].mxu0  ;;  %v4587_v40 = vpop.f32.mrb[6].mxu1 }
 0x174   : > { %v1247_v39 = vadd.f32 %v1246_v27, %v1245_v16  ;;  %v1126_v32 = vadd.f32 %v1125_v31, %v1124_v57  ;;  %1104 = vst.msk [vmem:[#allocation3 + $0xb8] sm:$0xff] %vm1080_vm6, %v4587_v40  ;;  %v3524_v42 = vpop.f32.mrb[7].mxu1 }
 0x175   : > { %v1248_v37 = vsel %vm1080_vm6, %v1208_v21, 0.0 }
 0x176   : > { %v1249_v38 = vadd.f32 %v1248_v37, %v1247_v39 }
 0x178   : > { %v944_v62 = vpop.f32.mrb[8].mxu0 }
 0x179   : > { %1085 = vst.msk [vmem:[#allocation3 + $0x20] sm:$0xff] %vm1080_vm6, %v944_v62  ;;  %v1127_v43 = vsel %vm1080_vm6, %v944_v62, 0.0  ;;  %v1209_v44 = vmul.f32 %v944_v62, %v944_v62  ;;  %v3487_v41 = vpop.f32.mrb[9].mxu0  ;;  %v4596_v55 = vpop.f32.mrb[8].mxu1 }
 0x17a   : > { %v1128_v48 = vadd.f32 %v1127_v43, %v1126_v32  ;;  %v947_v63 = vpop.f32.mrb[10].mxu0  ;;  %1105 = vst.msk [vmem:[#allocation3 + $0xc0] sm:$0xff] %vm1080_vm6, %v4596_v55  ;;  %v3527_v59 = vpop.f32.mrb[9].mxu1 }
 0x17b   : > { %v1250_v23 = vsel %vm1080_vm6, %v1209_v44, 0.0  ;;  %1086 = vst.msk [vmem:[#allocation3 + $0x28] sm:$0xff] %vm1080_vm6, %v947_v63  ;;  %v1129_v49 = vsel %vm1080_vm6, %v947_v63, 0.0  ;;  %v1210_v53 = vmul.f32 %v947_v63, %v947_v63  ;;  %v3488_v45 = vpop.f32.mrb[11].mxu0  ;;  %v4601_v46 = vpop.f32.mrb[10].mxu1 }
 0x17c   : > { %v1251_v3 = vadd.f32 %v1250_v23, %v1249_v38  ;;  %v1130_v54 = vadd.f32 %v1129_v49, %v1128_v48  ;;  %1106 = vst.msk [vmem:[#allocation3 + $0xc8] sm:$0xff] %vm1080_vm6, %v4601_v46  ;;  %v3528_v60 = vpop.f32.mrb[11].mxu1 }
 0x17d   : > { %v1252_v28 = vsel %vm1080_vm6, %v1210_v53, 0.0 }
 0x17e   : > { %v1253_v4 = vadd.f32 %v1252_v28, %v1251_v3 }
 0x180   : > { %v952_v0 = vpop.f32.mrb[12].mxu0 }
 0x181   : > { %1087 = vst.msk [vmem:[#allocation3 + $0x30] sm:$0xff] %vm1080_vm6, %v952_v0  ;;  %v1131_v1 = vsel %vm1080_vm6, %v952_v0, 0.0  ;;  %v1211_v5 = vmul.f32 %v952_v0, %v952_v0  ;;  %v3491_v29 = vpop.f32.mrb[13].mxu0  ;;  %v4610_v11 = vpop.f32.mrb[12].mxu1 }
 0x182   : > { %v1132_v47 = vadd.f32 %v1131_v1, %v1130_v54  ;;  %v955_v2 = vpop.f32.mrb[14].mxu0  ;;  %1107 = vst.msk [vmem:[#allocation3 + $0xd0] sm:$0xff] %vm1080_vm6, %v4610_v11  ;;  %v3531_v13 = vpop.f32.mrb[13].mxu1 }
 0x183   : > { %v1254_v6 = vsel %vm1080_vm6, %v1211_v5, 0.0  ;;  %1088 = vst.msk [vmem:[#allocation3 + $0x38] sm:$0xff] %vm1080_vm6, %v955_v2  ;;  %v1133_v7 = vsel %vm1080_vm6, %v955_v2, 0.0  ;;  %v1212_v10 = vmul.f32 %v955_v2, %v955_v2  ;;  %v3492_v50 = vpop.f32.mrb[15].mxu0  ;;  %v4615_v14 = vpop.f32.mrb[14].mxu1 }
 0x184   : > { %v1255_v30 = vadd.f32 %v1254_v6, %v1253_v4  ;;  %v1134_v8 = vadd.f32 %v1133_v7, %v1132_v47  ;;  %1108 = vst.msk [vmem:[#allocation3 + $0xd8] sm:$0xff] %vm1080_vm6, %v4615_v14  ;;  %v3532_v22 = vpop.f32.mrb[15].mxu1 }
 0x185   : > { %v1256_v12 = vsel %vm1080_vm6, %v1212_v10, 0.0 }
 0x186   : > { %v1257_v51 = vadd.f32 %v1256_v12, %v1255_v30 }
 0x188   : > { %v960_v34 = vpop.f32.mrb[16].mxu0 }
 0x189   : > { %1089 = vst.msk [vmem:[#allocation3 + $0x40] sm:$0xff] %vm1080_vm6, %v960_v34  ;;  %v1135_v56 = vsel %vm1080_vm6, %v960_v34, 0.0  ;;  %v1213_v15 = vmul.f32 %v960_v34, %v960_v34  ;;  %v3495_v52 = vpop.f32.mrb[17].mxu0  ;;  %v4624_v57 = vpop.f32.mrb[16].mxu1 }
 0x18a   : > { %v1136_v9 = vadd.f32 %v1135_v56, %v1134_v8  ;;  %v963_v18 = vpop.f32.mrb[18].mxu0  ;;  %1109 = vst.msk [vmem:[#allocation3 + $0xe0] sm:$0xff] %vm1080_vm6, %v4624_v57  ;;  %v3535_v27 = vpop.f32.mrb[17].mxu1 }
 0x18b   : > { %v1258_v16 = vsel %vm1080_vm6, %v1213_v15, 0.0  ;;  %1090 = vst.msk [vmem:[#allocation3 + $0x48] sm:$0xff] %vm1080_vm6, %v963_v18  ;;  %v1137_v19 = vsel %vm1080_vm6, %v963_v18, 0.0  ;;  %v1214_v20 = vmul.f32 %v963_v18, %v963_v18  ;;  %v3496_v24 = vpop.f32.mrb[19].mxu0  ;;  %v4629_v21 = vpop.f32.mrb[18].mxu1 }
 0x18c   : > { %v1259_v25 = vadd.f32 %v1258_v16, %v1257_v51  ;;  %v1138_v36 = vadd.f32 %v1137_v19, %v1136_v9  ;;  %1110 = vst.msk [vmem:[#allocation3 + $0xe8] sm:$0xff] %vm1080_vm6, %v4629_v21  ;;  %v3536_v58 = vpop.f32.mrb[19].mxu1 }
 0x18d   : > { %v1260_v26 = vsel %vm1080_vm6, %v1214_v20, 0.0 }
 0x18e   : > { %v1261_v31 = vadd.f32 %v1260_v26, %v1259_v25 }
 0x190   : > { %v968_v39 = vpop.f32.mrb[20].mxu0 }
 0x191   : > { %1091 = vst.msk [vmem:[#allocation3 + $0x50] sm:$0xff] %vm1080_vm6, %v968_v39  ;;  %v1139_v32 = vsel %vm1080_vm6, %v968_v39, 0.0  ;;  %v1215_v37 = vmul.f32 %v968_v39, %v968_v39  ;;  %v3499_v61 = vpop.f32.mrb[21].mxu0  ;;  %v4638_v23 = vpop.f32.mrb[20].mxu1 }
 0x192   : > { %v1140_v38 = vadd.f32 %v1139_v32, %v1138_v36  ;;  %v971_v42 = vpop.f32.mrb[22].mxu0  ;;  %1111 = vst.msk [vmem:[#allocation3 + $0xf0] sm:$0xff] %vm1080_vm6, %v4638_v23  ;;  %v3539_v53 = vpop.f32.mrb[21].mxu1 }
 0x193   : > { %v1262_v62 = vsel %vm1080_vm6, %v1215_v37, 0.0  ;;  %1092 = vst.msk [vmem:[#allocation3 + $0x58] sm:$0xff] %vm1080_vm6, %v971_v42  ;;  %v1141_v43 = vsel %vm1080_vm6, %v971_v42, 0.0  ;;  %v1216_v44 = vmul.f32 %v971_v42, %v971_v42  ;;  %v3500_v41 = vpop.f32.mrb[23].mxu0  ;;  %v4643_v3 = vpop.f32.mrb[22].mxu1 }
 0x194   : > { %v1263_v48 = vadd.f32 %v1262_v62, %v1261_v31  ;;  %v1142_v63 = vadd.f32 %v1141_v43, %v1140_v38  ;;  %1112 = vst.msk [vmem:[#allocation3 + $0xf8] sm:$0xff] %vm1080_vm6, %v4643_v3  ;;  %v3540_v54 = vpop.f32.mrb[23].mxu1 }
 0x195   : > { %v1264_v49 = vsel %vm1080_vm6, %v1216_v44, 0.0 }
 0x196   : > { %v1265_v45 = vadd.f32 %v1264_v49, %v1263_v48 }
 0x198   : > { %v976_v28 = vpop.f32.mrb[24].mxu0 }
 0x199   : > { %1093 = vst.msk [vmem:[#allocation3 + $0x60] sm:$0xff] %vm1080_vm6, %v976_v28  ;;  %v1143_v59 = vsel %vm1080_vm6, %v976_v28, 0.0  ;;  %v1217_v4 = vmul.f32 %v976_v28, %v976_v28  ;;  %v3503_v60 = vpop.f32.mrb[25].mxu0  ;;  %v4652_v10 = vpop.f32.mrb[24].mxu1 }
 0x19a   : > { %v1144_v0 = vadd.f32 %v1143_v59, %v1142_v63  ;;  %v979_v1 = vpop.f32.mrb[26].mxu0  ;;  %1113 = vst.msk [vmem:[#allocation3 + $0x100] sm:$0xff] %vm1080_vm6, %v4652_v10  ;;  %v3543_v30 = vpop.f32.mrb[25].mxu1 }
 0x19b   : > { %v1266_v5 = vsel %vm1080_vm6, %v1217_v4, 0.0  ;;  %1094 = vst.msk [vmem:[#allocation3 + $0x68] sm:$0xff] %vm1080_vm6, %v979_v1  ;;  %v1145_v29 = vsel %vm1080_vm6, %v979_v1, 0.0  ;;  %v1218_v47 = vmul.f32 %v979_v1, %v979_v1  ;;  %v3504_v2 = vpop.f32.mrb[27].mxu0  ;;  %v4657_v12 = vpop.f32.mrb[26].mxu1 }
 0x19c   : > { %v1267_v6 = vadd.f32 %v1266_v5, %v1265_v45  ;;  %v1146_v7 = vadd.f32 %v1145_v29, %v1144_v0  ;;  %1114 = vst.msk [vmem:[#allocation3 + $0x108] sm:$0xff] %vm1080_vm6, %v4657_v12  ;;  %v3544_v13 = vpop.f32.mrb[27].mxu1 }
 0x19d   : > { %v1268_v50 = vsel %vm1080_vm6, %v1218_v47, 0.0  ;;  %v1225_v47 = vmul.f32 %v4567_v17, %v4567_v17  ;;  %v1159_v13 = vsel %vm1080_vm6, %v4567_v17, 0.0  ;;  %v1163_v17 = vsel %vm1080_vm6, %v4582_v33, 0.0 }
 0x19e   : > { %v1269_v8 = vadd.f32 %v1268_v50, %v1267_v6 }
 0x1a0   : > { %v984_v51 = vpop.f32.mrb[28].mxu0 }
 0x1a1   : > { %1095 = vst.msk [vmem:[#allocation3 + $0x70] sm:$0xff] %vm1080_vm6, %v984_v51  ;;  %v1147_v22 = vsel %vm1080_vm6, %v984_v51, 0.0  ;;  %v1219_v34 = vmul.f32 %v984_v51, %v984_v51  ;;  %v3507_v56 = vpop.f32.mrb[29].mxu0  ;;  %v4666_v25 = vpop.f32.mrb[28].mxu1  ;;  %v1226_v51 = vmul.f32 %v4573_v35, %v4573_v35 }
 0x1a2   : > { %v1148_v15 = vadd.f32 %v1147_v22, %v1146_v7  ;;  %v987_v52 = vpop.f32.mrb[30].mxu0  ;;  %1115 = vst.msk [vmem:[#allocation3 + $0x110] sm:$0xff] %vm1080_vm6, %v4666_v25  ;;  %v3547_v26 = vpop.f32.mrb[29].mxu1 }
 0x1a3   : > { %v1270_v9 = vsel %vm1080_vm6, %v1219_v34, 0.0  ;;  %1096 = vst.msk [vmem:[#allocation3 + $0x78] sm:$0xff] %vm1080_vm6, %v987_v52  ;;  %v1149_v18 = vsel %vm1080_vm6, %v987_v52, 0.0  ;;  %v1220_v16 = vmul.f32 %v987_v52, %v987_v52  ;;  %v3508_v19 = vpop.f32.mrb[31].mxu0  ;;  %v4671_v31 = vpop.f32.mrb[30].mxu1  ;;  %v1161_v52 = vsel %vm1080_vm6, %v4573_v35, 0.0 }
 0x1a4   : > { %v1271_v20 = vadd.f32 %v1270_v9, %v1269_v8  ;;  %v1150_v24 = vadd.f32 %v1149_v18, %v1148_v15  ;;  %1116 = vst.msk [vmem:[#allocation3 + $0x118] sm:$0xff] %vm1080_vm6, %v4671_v31  ;;  %v3548_v58 = vpop.f32.mrb[31].mxu1  ;;  %v1282_v15 = vsel %vm1080_vm6, %v1225_v47, 0.0  ;;  %v1227_v9 = vmul.f32 %v4582_v33, %v4582_v33 }
 0x1a5   : > { %v1272_v36 = vsel %vm1080_vm6, %v1220_v16, 0.0  ;;  %v1284_v19 = vsel %vm1080_vm6, %v1226_v51, 0.0  ;;  %v1165_v35 = vsel %vm1080_vm6, %v4587_v40, 0.0  ;;  %v1167_v33 = vsel %vm1080_vm6, %v4596_v55, 0.0 }
 0x1a6   : > { %v1273_v27 = vadd.f32 %v1272_v36, %v1271_v20  ;;  %v1228_v20 = vmul.f32 %v4587_v40, %v4587_v40  ;;  %v1286_v26 = vsel %vm1080_vm6, %v1227_v9, 0.0  ;;  %v1169_v40 = vsel %vm1080_vm6, %v4601_v46, 0.0 }
 0x1a7   : > { %v1235_v47 = vmul.f32 %v4638_v23, %v4638_v23  ;;  %v1237_v51 = vmul.f32 %v4652_v10, %v4652_v10 }
 0x1a8   : > { %v992_v39 = vpop.f32.mrb[32].mxu0 }
 0x1a9   : > { %1097 = vst.msk [vmem:[#allocation3 + $0x80] sm:$0xff] %vm1080_vm6, %v992_v39  ;;  %v1151_v32 = vsel %vm1080_vm6, %v992_v39, 0.0  ;;  %v1221_v37 = vmul.f32 %v992_v39, %v992_v39  ;;  %v3511_v61 = vpop.f32.mrb[33].mxu0  ;;  %v4680_v49 = vpop.f32.mrb[32].mxu1 }
 0x1aa   : > { %v1152_v38 = vadd.f32 %v1151_v32, %v1150_v24  ;;  %v995_v42 = vpop.f32.mrb[34].mxu0  ;;  %1117 = vst.msk [vmem:[#allocation3 + $0x120] sm:$0xff] %vm1080_vm6, %v4680_v49  ;;  %v3551_v45 = vpop.f32.mrb[33].mxu1  ;;  %v1288_v32 = vsel %vm1080_vm6, %v1228_v20, 0.0 }
 0x1ab   : > { %v1274_v62 = vsel %vm1080_vm6, %v1221_v37, 0.0  ;;  %1098 = vst.msk [vmem:[#allocation3 + $0x88] sm:$0xff] %vm1080_vm6, %v995_v42  ;;  %v1153_v43 = vsel %vm1080_vm6, %v995_v42, 0.0  ;;  %v1222_v44 = vmul.f32 %v995_v42, %v995_v42  ;;  %v3512_v41 = vpop.f32.mrb[35].mxu0  ;;  %v4685_v28 = vpop.f32.mrb[34].mxu1  ;;  %v1230_v37 = vmul.f32 %v4601_v46, %v4601_v46 }
 0x1ac   : > { %v1275_v48 = vadd.f32 %v1274_v62, %v1273_v27  ;;  %v1154_v63 = vadd.f32 %v1153_v43, %v1152_v38  ;;  %1118 = vst.msk [vmem:[#allocation3 + $0x128] sm:$0xff] %vm1080_vm6, %v4685_v28  ;;  %v3552_v59 = vpop.f32.mrb[35].mxu1  ;;  %v1229_v27 = vmul.f32 %v4596_v55, %v4596_v55  ;;  %v1231_v62 = vmul.f32 %v4610_v11, %v4610_v11 }
 0x1ad   : > { %v1276_v53 = vsel %vm1080_vm6, %v1222_v44, 0.0  ;;  %v1292_v41 = vsel %vm1080_vm6, %v1230_v37, 0.0  ;;  %v1171_v55 = vsel %vm1080_vm6, %v4610_v11, 0.0  ;;  %v1173_v46 = vsel %vm1080_vm6, %v4615_v14, 0.0 }
 0x1ae   : > { %v1277_v54 = vadd.f32 %v1276_v53, %v1275_v48  ;;  %v1290_v42 = vsel %vm1080_vm6, %v1229_v27, 0.0  ;;  %v1232_v48 = vmul.f32 %v4615_v14, %v4615_v14  ;;  %v1294_v45 = vsel %vm1080_vm6, %v1231_v62, 0.0 }
 0x1af   : > { %v1175_v11 = vsel %vm1080_vm6, %v4624_v57, 0.0  ;;  %v1177_v14 = vsel %vm1080_vm6, %v4629_v21, 0.0  ;;  %v1189_v27 = vsel %vm1080_vm6, %v4671_v31, 0.0  ;;  %v1242_v37 = vmul.f32 %v4685_v28, %v4685_v28 }
 0x1b0   : > { %v1000_v4 = vpop.f32.mrb[36].mxu0 }
 0x1b1   : > { %1099 = vst.msk [vmem:[#allocation3 + $0x90] sm:$0xff] %vm1080_vm6, %v1000_v4  ;;  %v1155_v60 = vsel %vm1080_vm6, %v1000_v4, 0.0  ;;  %v1223_v0 = vmul.f32 %v1000_v4, %v1000_v4  ;;  %v3515_v1 = vpop.f32.mrb[37].mxu0 }
 0x1b2   : > { %v1156_v5 = vadd.f32 %v1155_v60, %v1154_v63  ;;  %v1003_v29 = vpop.f32.mrb[38].mxu0  ;;  %v1296_v60 = vsel %vm1080_vm6, %v1232_v48, 0.0 }
 0x1b3   : > { %v1278_v2 = vsel %vm1080_vm6, %v1223_v0, 0.0  ;;  %1100 = vst.msk [vmem:[#allocation3 + $0x98] sm:$0xff] %vm1080_vm6, %v1003_v29  ;;  %v1157_v6 = vsel %vm1080_vm6, %v1003_v29, 0.0  ;;  %v1224_v7 = vmul.f32 %v1003_v29, %v1003_v29  ;;  %v3516_v50 = vpop.f32.mrb[39].mxu0  ;;  %v1234_v0 = vmul.f32 %v4629_v21, %v4629_v21 }
 0x1b4   : > { %v1279_v30 = vadd.f32 %v1278_v2, %v1277_v54  ;;  %v1158_v8 = vadd.f32 %v1157_v6, %v1156_v5  ;;  %v1233_v54 = vmul.f32 %v4624_v57, %v4624_v57  ;;  %v1179_v57 = vsel %vm1080_vm6, %v4638_v23, 0.0 }
 0x1b5   : > { %v1280_v22 = vsel %vm1080_vm6, %v1224_v7, 0.0  ;;  %v1300_v7 = vsel %vm1080_vm6, %v1234_v0, 0.0  ;;  %v1236_v50 = vmul.f32 %v4643_v3, %v4643_v3  ;;  %v1181_v21 = vsel %vm1080_vm6, %v4643_v3, 0.0 }
 0x1b6   : > { %v1160_v34 = vadd.f32 %v1159_v13, %v1158_v8  ;;  %v1281_v56 = vadd.f32 %v1280_v22, %v1279_v30  ;;  %v1298_v29 = vsel %vm1080_vm6, %v1233_v54, 0.0  ;;  %v1302_v13 = vsel %vm1080_vm6, %v1235_v47, 0.0  ;;  %v1119_v54 = vld [vmem:[#allocation7] sm:$0x1] }
 0x1b7   : > { %v1183_v23 = vsel %vm1080_vm6, %v4652_v10, 0.0  ;;  %v1185_v3 = vsel %vm1080_vm6, %v4657_v12, 0.0  ;;  %v1187_v10 = vsel %vm1080_vm6, %v4666_v25, 0.0 }
 0x1b8   : > { %v1162_v18 = vadd.f32 %v1161_v52, %v1160_v34  ;;  %v1283_v16 = vadd.f32 %v1282_v15, %v1281_v56  ;;  %v1304_v56 = vsel %vm1080_vm6, %v1236_v50, 0.0  ;;  %v1238_v15 = vmul.f32 %v4657_v12, %v4657_v12 }
 0x1ba   : > { %v1164_v24 = vadd.f32 %v1163_v17, %v1162_v18  ;;  %v1285_v36 = vadd.f32 %v1284_v19, %v1283_v16  ;;  %v1306_v18 = vsel %vm1080_vm6, %v1237_v51, 0.0  ;;  %v1239_v16 = vmul.f32 %v4666_v25, %v4666_v25 }
 0x1bb   : > { %v1308_v20 = vsel %vm1080_vm6, %v1238_v15, 0.0 }
 0x1bc   : > { %v1166_v58 = vadd.f32 %v1165_v35, %v1164_v24  ;;  %v1287_v39 = vadd.f32 %v1286_v26, %v1285_v36  ;;  %v1240_v24 = vmul.f32 %v4671_v31, %v4671_v31  ;;  %v1241_v36 = vmul.f32 %v4680_v49, %v4680_v49 }
 0x1bd   : > { %v1310_v12 = vsel %vm1080_vm6, %v1239_v16, 0.0  ;;  %v1316_v31 = vsel %vm1080_vm6, %v1242_v37, 0.0 }
 0x1be   : > { %v1289_v61 = vadd.f32 %v1288_v32, %v1287_v39  ;;  %v1168_v38 = vadd.f32 %v1167_v33, %v1166_v58  ;;  %v1191_v58 = vsel %vm1080_vm6, %v4680_v49, 0.0  ;;  %v1312_v25 = vsel %vm1080_vm6, %v1240_v24, 0.0 }
 0x1bf   : > { %v1314_v33 = vsel %vm1080_vm6, %v1241_v36, 0.0 }
 0x1c0   : > { %v1170_v43 = vadd.f32 %v1169_v40, %v1168_v38  ;;  %v1291_v44 = vadd.f32 %v1290_v42, %v1289_v61  ;;  %v1193_v42 = vsel %vm1080_vm6, %v4685_v28, 0.0 }
 0x1c2   : > { %v1172_v63 = vadd.f32 %v1171_v55, %v1170_v43  ;;  %v1293_v53 = vadd.f32 %v1292_v41, %v1291_v44 }
 0x1c4   : > { %v1174_v59 = vadd.f32 %v1173_v46, %v1172_v63  ;;  %v1295_v4 = vadd.f32 %v1294_v45, %v1293_v53 }
 0x1c6   : > { %v1176_v1 = vadd.f32 %v1175_v11, %v1174_v59  ;;  %v1297_v5 = vadd.f32 %v1296_v60, %v1295_v4  ;;  %v1204_v60 = vld [vmem:[#allocation8] sm:$0x1] }
 0x1c8   : > { %v1178_v2 = vadd.f32 %v1177_v14, %v1176_v1  ;;  %v1299_v6 = vadd.f32 %v1298_v29, %v1297_v5 }
 0x1ca   : > { %v1301_v30 = vadd.f32 %v1300_v7, %v1299_v6  ;;  %v1180_v8 = vadd.f32 %v1179_v57, %v1178_v2 }
 0x1cc   : > { %v1303_v22 = vadd.f32 %v1302_v13, %v1301_v30  ;;  %v1182_v34 = vadd.f32 %v1181_v21, %v1180_v8 }
 0x1ce   : > { %v1305_v52 = vadd.f32 %v1304_v56, %v1303_v22  ;;  %v1184_v9 = vadd.f32 %v1183_v23, %v1182_v34 }
 0x1d0   : > { %v1307_v19 = vadd.f32 %v1306_v18, %v1305_v52  ;;  %v1186_v17 = vadd.f32 %v1185_v3, %v1184_v9 }
 0x1d2   : > { %v1309_v26 = vadd.f32 %v1308_v20, %v1307_v19  ;;  %v1188_v35 = vadd.f32 %v1187_v10, %v1186_v17 }
 0x1d4   : > { %v1311_v39 = vadd.f32 %v1310_v12, %v1309_v26  ;;  %v1190_v32 = vadd.f32 %v1189_v27, %v1188_v35 }
 0x1d6   : > { %v1313_v61 = vadd.f32 %v1312_v25, %v1311_v39  ;;  %v1192_v38 = vadd.f32 %v1191_v58, %v1190_v32 }
 0x1d8   : > { %v1315_v40 = vadd.f32 %v1314_v33, %v1313_v61  ;;  %v1194_v62 = vadd.f32 %v1193_v42, %v1192_v38 }
 0x1da   : > { %v1195_v43 = vrot.slane %v1194_v62, 4  ;;  %v1317_v49 = vadd.f32 %v1316_v31, %v1315_v40 }
 0x1dc   : > { %v1196_v44 = vadd.f32 %v1195_v43, %v1194_v62  ;;  %v1318_v41 = vrot.slane %v1317_v49, 4 }
 0x1de   : > { %v1197_v55 = vrot.slane %v1196_v44, 2  ;;  %v1319_v48 = vadd.f32 %v1318_v41, %v1317_v49 }
 0x1e0   : > { %v1198_v63 = vadd.f32 %v1197_v55, %v1196_v44  ;;  %v1320_v53 = vrot.slane %v1319_v48, 2 }
 0x1e2   : > { %v1199_v45 = vrot.slane %v1198_v63, 1  ;;  %v1321_v46 = vadd.f32 %v1320_v53, %v1319_v48 }
 0x1e4   : > { %v1200_v59 = vadd.f32 %v1199_v45, %v1198_v63  ;;  %v1322_v4 = vrot.slane %v1321_v46, 1 }
 0x1e6   : > { %v1201_v28 = vadd.f32 %v1200_v59, %v1119_v54  ;;  %v1323_v11 = vadd.f32 %v1322_v4, %v1321_v46 }
 0x1e8   : > { %1203 = vst.msk [vmem:[#allocation7] sm:$0x1] %vm1202_vm7, %v1201_v28  ;;  %v1324_v0 = vadd.f32 %v1323_v11, %v1204_v60 }
 0x1ea   : > { %1325 = vst.msk [vmem:[#allocation8] sm:$0x1] %vm1202_vm7, %v1324_v0 }
 0x1eb PF: > { %p3356_p7 = scmp.ne.s32.totalorder %s3944_s13, 2 }
 0x1ec   : > { %v3768_v1 = vld [vmem:[%s5936_s5] sm:$0xff] (!%p3356_p7)   ;;  %v3957_v5 = vmov (!%p3356_p7), 0.0   ;;  %v3769_v29 = vld [vmem:[%s5936_s5 + $0x8] sm:$0xff] (!%p3356_p7)   ;;  %vm3958_vm8 = vmmov (!%p3356_p7), 0   ;;  %v3770_v7 = vld [vmem:[%s5936_s5 + $0x10] sm:$0xff] (!%p3356_p7)   ;;  %v1384_v21 = vlaneseq (!%p3356_p7)  ;;  %vm1714_vm9 = vcmask (!%p3356_p7), 523264  }
 0x1ed   : > { %1329 = sbr.rel (%p3356_p7) target bundleno = 873 (0x369), region = 76  ;;  %3553 = vmatprep.subr.bf16.mxu0 (!%p3356_p7), %v3957_v5  ;;  %3721 = vmatprep.subr.bf16.mxu1 (!%p3356_p7), %v3957_v5  ;;  %v3771_v30 = vld [vmem:[%s5936_s5 + $0x18] sm:$0xff] (!%p3356_p7)   ;;  %v1337_v22 = vld [vmem:[%s5934_s3] sm:$0x1] (!%p3356_p7)  ;;  %v1345_v52 = vld [vmem:[#allocation3] sm:$0xff] (!%p3356_p7)  ;;  %vm1958_vm11 = vcmask (!%p3356_p7), 261120  }
 0x1ee   : > { %3554 = vmatpush3.bf16.msra.mxu0 (!%p3356_p7), %v3768_v1  ;;  %3561 = vmatprep.mubr.msk.bf16.mxu0 (!%p3356_p7), %vm3958_vm8, %v3957_v5  ;;  %v4810_v51 = vshrl.u32 (!%p3356_p7), %v1384_v21, 7  ;;  %v1341_v15 = vld [vmem:[%s5935_s4] sm:$0x1] (!%p3356_p7)  ;;  %v1346_v9 = vld [vmem:[#allocation3 + $0x8] sm:$0xff] (!%p3356_p7)  ;;  %v1348_v19 = vld [vmem:[#allocation3 + $0x18] sm:$0xff] (!%p3356_p7)  ;;  %vm2080_vm12 = vcmask (!%p3356_p7), 253952  }
 0x1ef   : > { %3555 = vmatprep.subr.bf16.mxu0 (!%p3356_p7), %v3957_v5  ;;  %3725 = vmatpush3.bf16.msra.mxu1 (!%p3356_p7), %v3768_v1  ;;  %v1330_v14 = vld [vmem:[#allocation7] sm:$0x1] (!%p3356_p7)  ;;  %v1347_v16 = vld [vmem:[#allocation3 + $0x10] sm:$0xff] (!%p3356_p7)  ;;  %v1366_v12 = vld [vmem:[#allocation3 + $0xa8] sm:$0xff] (!%p3356_p7) }
 0x1f0   : > { %3722 = vmatprep.subr.bf16.mxu1 (!%p3356_p7), %v3957_v5  ;;  %3601 = vmatprep.mubr.msk.bf16.mxu1 (!%p3356_p7), %vm3958_vm8, %v3957_v5  ;;  %v1331_v2 = vmul.f32 (!%p3356_p7), 0.0033333334, %v1330_v14  ;;  %v1386_v34 = vsub.s32 (!%p3356_p7), 0, %v4810_v51  ;;  %v1365_v35 = vld [vmem:[#allocation3 + $0xa0] sm:$0xff] (!%p3356_p7)  ;;  %v1350_v42 = vld [vmem:[#allocation3 + $0x28] sm:$0xff] (!%p3356_p7)  ;;  %v1367_v43 = vld [vmem:[#allocation3 + $0xb0] sm:$0xff] (!%p3356_p7) }
 0x1f1   : > { %v1332_v47 = vld [vmem:[#allocation8] sm:$0x1] (!%p3356_p7)  ;;  %v1368_v48 = vld [vmem:[#allocation3 + $0xb8] sm:$0xff] (!%p3356_p7)  ;;  %v1370_v4 = vld [vmem:[#allocation3 + $0xc8] sm:$0xff] (!%p3356_p7) }
 0x1f2   : > { %v1333_v6 = vmul.f32 (!%p3356_p7), 0.0033333334, %v1332_v47  ;;  %3556 = vmatpush3.bf16.msra.mxu0 (!%p3356_p7), %v3769_v29  ;;  %v1334_v57 = vmul.f32 (!%p3356_p7), %v1331_v2, %v1331_v2  ;;  %v1349_v38 = vld [vmem:[#allocation3 + $0x20] sm:$0xff] (!%p3356_p7)  ;;  %v1351_v11 = vld [vmem:[#allocation3 + $0x30] sm:$0xff] (!%p3356_p7)  ;;  %v1352_v14 = vld [vmem:[#allocation3 + $0x38] sm:$0xff] (!%p3356_p7) }
 0x1f3   : > { %3557 = vmatprep.subr.bf16.mxu0 (!%p3356_p7), %v3957_v5  ;;  %3726 = vmatpush3.bf16.msra.mxu1 (!%p3356_p7), %v3769_v29  ;;  %v1369_v46 = vld [vmem:[#allocation3 + $0xc0] sm:$0xff] (!%p3356_p7) }
 0x1f4   : > { %3723 = vmatprep.subr.bf16.mxu1 %v3957_v5  ;;  %v1335_v50 = vsub.f32 %v1333_v6, %v1334_v57  ;;  %v1361_v29 = vld [vmem:[#allocation3 + $0x80] sm:$0xff]  ;;  %v1362_v6 = vld [vmem:[#allocation3 + $0x88] sm:$0xff] }
 0x1f6   : > { %3558 = vmatpush3.bf16.msra.mxu0 %v3770_v7  ;;  %v1336_v8 = vmax.f32 %v1335_v50, 0.0 }
 0x1f7   : > { %3559 = vmatprep.subr.bf16.mxu0 %v3957_v5  ;;  %3727 = vmatpush3.bf16.msra.mxu1 %v3770_v7 }
 0x1f8   : > { %3724 = vmatprep.subr.bf16.mxu1 %v3957_v5  ;;  %v1338_v13 = vadd.f32 1e-05, %v1336_v8 }
 0x1fa   : > { %3560 = vmatpush3.bf16.msra.mxu0 %v3771_v30  ;;  %3772 = vrsqrt.f32 %v1338_v13 }
 0x1fb   : > { %3728 = vmatpush3.bf16.msra.mxu1 %v3771_v30 }
 0x204   : > { %v3773_v56 = vpop.eup %3772 }
 0x205   : > { %v1340_v23 = vmul.f32 %v3773_v56, %v1337_v22  ;;  %v1363_v56 = vld [vmem:[#allocation3 + $0x90] sm:$0xff] }
 0x207   : > { %v1342_v18 = vmul.f32 %v1340_v23, %v1331_v2  ;;  %v4819_v3 = vrot.slane %v1340_v23, %v1386_v34  ;;  %v1364_v23 = vld [vmem:[#allocation3 + $0x98] sm:$0xff] }
 0x209   : > { %v1343_v17 = vsub.f32 %v1341_v15, %v1342_v18  ;;  %v1389_v20 = vmul.f32 %v4819_v3, %v1345_v52  ;;  %v1390_v10 = vmul.f32 %v4819_v3, %v1346_v9  ;;  %v1391_v36 = vmul.f32 %v4819_v3, %v1347_v16 }
 0x20a   : > { %v1392_v26 = vmul.f32 %v4819_v3, %v1348_v19  ;;  %v1409_v39 = vmul.f32 %v4819_v3, %v1365_v35  ;;  %v1410_v32 = vmul.f32 %v4819_v3, %v1366_v12  ;;  %v1393_v62 = vmul.f32 %v4819_v3, %v1349_v38 }
 0x20b   : > { %v4823_v24 = vrot.slane %v1343_v17, %v1386_v34  ;;  %v1394_v31 = vmul.f32 %v4819_v3, %v1350_v42  ;;  %v1411_v45 = vmul.f32 %v4819_v3, %v1367_v43  ;;  %v1412_v59 = vmul.f32 %v4819_v3, %v1368_v48  ;;  %v1371_v17 = vld [vmem:[#allocation3 + $0xd0] sm:$0xff]  ;;  %v1382_v48 = vld [vmem:[#allocation3 + $0x128] sm:$0xff] }
 0x20c   : > { %v1413_v2 = vmul.f32 %v4819_v3, %v1369_v46  ;;  %v1414_v57 = vmul.f32 %v4819_v3, %v1370_v4  ;;  %v1395_v50 = vmul.f32 %v4819_v3, %v1351_v11  ;;  %v1405_v8 = vmul.f32 %v4819_v3, %v1361_v29  ;;  %v1373_v46 = vld [vmem:[#allocation3 + $0xe0] sm:$0xff]  ;;  %v1356_v29 = vld [vmem:[#allocation3 + $0x58] sm:$0xff] }
 0x20d   : > { %v1433_v27 = vadd.f32 %v4823_v24, %v1389_v20  ;;  %v1434_v58 = vadd.f32 %v4823_v24, %v1390_v10  ;;  %v1435_v37 = vadd.f32 %v4823_v24, %v1391_v36  ;;  %v1436_v61 = vadd.f32 %v4823_v24, %v1392_v26  ;;  %v1372_v20 = vld [vmem:[#allocation3 + $0xd8] sm:$0xff] }
 0x20e   : > { %v1453_v41 = vadd.f32 %v4823_v24, %v1409_v39  ;;  %v1454_v55 = vadd.f32 %v4823_v24, %v1410_v32  ;;  %v1437_v54 = vadd.f32 %v4823_v24, %v1393_v62  ;;  %v1438_v28 = vadd.f32 %v4823_v24, %v1394_v31  ;;  %v1354_v39 = vld [vmem:[#allocation3 + $0x48] sm:$0xff] }
 0x20f   : > { %v1471_v25 = vmax.f32 %v1433_v27, 0.0  ;;  %v1472_v33 = vmax.f32 %v1434_v58, 0.0  ;;  %v1473_v49 = vmax.f32 %v1435_v37, 0.0  ;;  %v1474_v44 = vmax.f32 %v1436_v61, 0.0  ;;  %v1353_v58 = vld [vmem:[#allocation3 + $0x40] sm:$0xff] }
 0x210   : > { %v1491_v63 = vmax.f32 %v1453_v41, 0.0  ;;  %v1492_v53 = vmax.f32 %v1454_v55, 0.0  ;;  %v1455_v1 = vadd.f32 %v4823_v24, %v1411_v45  ;;  %v1456_v47 = vadd.f32 %v4823_v24, %v1412_v59  ;;  %v1381_v41 = vld [vmem:[#allocation3 + $0x120] sm:$0xff] }
 0x211   : > { %v1663_v40 = vpack.c.bf16 %v1472_v33, %v1471_v25  ;;  %v1664_v60 = vpack.c.bf16 %v1474_v44, %v1473_v49  ;;  %v1475_v13 = vmax.f32 %v1437_v54, 0.0  ;;  %v1476_v21 = vmax.f32 %v1438_v28, 0.0  ;;  %v1374_v54 = vld [vmem:[#allocation3 + $0xe8] sm:$0xff] }
 0x212   : > { %v1673_v0 = vpack.c.bf16 %v1492_v53, %v1491_v63  ;;  %v1493_v7 = vmax.f32 %v1455_v1, 0.0  ;;  %v1494_v30 = vmax.f32 %v1456_v47, 0.0  ;;  %v1396_v22 = vmul.f32 %v4819_v3, %v1352_v14 }
 0x213   : > { %3562 = vmatmul.mubr.msk.bf16.vlgmr.msra.gmra.mrb[0].mxu0 %vm1714_vm9, %v1663_v40  ;;  %v1406_v34 = vmul.f32 %v4819_v3, %v1362_v6  ;;  %v1457_v15 = vadd.f32 %v4823_v24, %v1413_v2  ;;  %v1449_v52 = vadd.f32 %v4823_v24, %v1405_v8  ;;  %v1458_v18 = vadd.f32 %v4823_v24, %v1414_v57 }
 0x214   : > { %3565 = vmatprep.mubr.msk.bf16.mxu0 %vm3958_vm8, %v3957_v5  ;;  %3602 = vmatmul.mubr.msk.bf16.vlgmr.msra.gmra.mrb[0].mxu1 %vm1714_vm9, %v1673_v0  ;;  %v1674_v9 = vpack.c.bf16 %v1494_v30, %v1493_v7  ;;  %v1407_v10 = vmul.f32 %v4819_v3, %v1363_v56  ;;  %v1408_v36 = vmul.f32 %v4819_v3, %v1364_v23  ;;  %v1547_v4 = vadd.s32 296, %v4810_v51  ;;  %v1355_v0 = vld [vmem:[#allocation3 + $0x50] sm:$0xff] }
 0x215   : > { %3605 = vmatprep.mubr.msk.bf16.mxu1 %vm3958_vm8, %v3957_v5  ;;  %v1450_v16 = vadd.f32 %v4823_v24, %v1406_v34  ;;  %v1487_v19 = vmax.f32 %v1449_v52, 0.0  ;;  %v1665_v26 = vpack.c.bf16 %v1476_v21, %v1475_v13  ;;  %v1439_v35 = vadd.f32 %v4823_v24, %v1395_v50  ;;  %v1376_v52 = vld [vmem:[#allocation3 + $0xf8] sm:$0xff] }
 0x216   : > { %v1440_v12 = vadd.f32 %v4823_v24, %v1396_v22  ;;  %v1495_v32 = vmax.f32 %v1457_v15, 0.0  ;;  %v1451_v25 = vadd.f32 %v4823_v24, %v1407_v10  ;;  %v1452_v33 = vadd.f32 %v4823_v24, %v1408_v36  ;;  %v1375_v15 = vld [vmem:[#allocation3 + $0xf0] sm:$0xff] }
 0x217   : > { %v1488_v27 = vmax.f32 %v1450_v16, 0.0  ;;  %v1496_v37 = vmax.f32 %v1458_v18, 0.0  ;;  %v1415_v38 = vmul.f32 %v4819_v3, %v1371_v17  ;;  %v1416_v42 = vmul.f32 %v4819_v3, %v1372_v20  ;;  %v1357_v17 = vld [vmem:[#allocation3 + $0x60] sm:$0xff]  ;;  %v1358_v20 = vld [vmem:[#allocation3 + $0x68] sm:$0xff] }
 0x218   : > { %v1489_v40 = vmax.f32 %v1451_v25, 0.0  ;;  %v1490_v62 = vmax.f32 %v1452_v33, 0.0  ;;  %v1477_v31 = vmax.f32 %v1439_v35, 0.0  ;;  %v1478_v43 = vmax.f32 %v1440_v12, 0.0 }
 0x219   : > { %v4869_v61 = vpack.c.bf16 %v1488_v27, %v1487_v19  ;;  %v1397_v49 = vmul.f32 %v4819_v3, %v1353_v58  ;;  %v1398_v44 = vmul.f32 %v4819_v3, %v1354_v39  ;;  %v1675_v63 = vpack.c.bf16 %v1496_v37, %v1495_v32  ;;  %v1377_v37 = vld [vmem:[#allocation3 + $0x100] sm:$0xff] }
 0x21a   : > { %v4880_v55 = vpack.c.bf16 %v1490_v62, %v1489_v40  ;;  %v1459_v53 = vadd.f32 %v4823_v24, %v1415_v38  ;;  %v1460_v45 = vadd.f32 %v4823_v24, %v1416_v42  ;;  %v1425_v59 = vmul.f32 %v4819_v3, %v1381_v41  ;;  %v1378_v38 = vld [vmem:[#allocation3 + $0x108] sm:$0xff] }
 0x21b   : > { %3566 = vmatmul.mubr.msk.bf16.gmra.mrb[4].mxu0 %vm1714_vm9, %v1664_v60  ;;  %v1666_v60 = vpack.c.bf16 %v1478_v43, %v1477_v31  ;;  %v1441_v28 = vadd.f32 %v4823_v24, %v1397_v49  ;;  %v1442_v11 = vadd.f32 %v4823_v24, %v1398_v44  ;;  %v1426_v1 = vmul.f32 %v4819_v3, %v1382_v48  ;;  %v1359_v31 = vld [vmem:[#allocation3 + $0x70] sm:$0xff]  ;;  %v1360_v43 = vld [vmem:[#allocation3 + $0x78] sm:$0xff] }
 0x21c   : > { %3569 = vmatprep.mubr.msk.bf16.mxu0 %vm3958_vm8, %v3957_v5  ;;  %3606 = vmatmul.mubr.msk.bf16.gmra.mrb[4].mxu1 %vm1714_vm9, %v1674_v9  ;;  %v1417_v14 = vmul.f32 %v4819_v3, %v1373_v46  ;;  %v1469_v47 = vadd.f32 %v4823_v24, %v1425_v59  ;;  %v1497_v2 = vmax.f32 %v1459_v53, 0.0  ;;  %v1498_v6 = vmax.f32 %v1460_v45, 0.0 }
 0x21d   : > { %3609 = vmatprep.mubr.msk.bf16.mxu1 %vm3958_vm8, %v3957_v5  ;;  %v1418_v7 = vmul.f32 %v4819_v3, %v1374_v54  ;;  %v1470_v51 = vadd.f32 %v4823_v24, %v1426_v1  ;;  %v1399_v57 = vmul.f32 %v4819_v3, %v1355_v0  ;;  %vm1624_vm10 = vcmp.lt.s32.totalorder %v1547_v4, 300 }
 0x21e   : > { %v1507_v50 = vmax.f32 %v1469_v47, 0.0  ;;  %v1479_v30 = vmax.f32 %v1441_v28, 0.0  ;;  %v1480_v8 = vmax.f32 %v1442_v11, 0.0  ;;  %v1400_v13 = vmul.f32 %v4819_v3, %v1356_v29  ;;  %v1380_v28 = vld [vmem:[#allocation3 + $0x118] sm:$0xff] }
 0x21f   : > { %v1508_v21 = vmax.f32 %v1470_v51, 0.0  ;;  %v1676_v22 = vpack.c.bf16 %v1498_v6, %v1497_v2  ;;  %v1461_v34 = vadd.f32 %v4823_v24, %v1417_v14  ;;  %v1462_v56 = vadd.f32 %v4823_v24, %v1418_v7 }
 0x220   : > { %v1667_v18 = vpack.c.bf16 %v1480_v8, %v1479_v30  ;;  %v1443_v16 = vadd.f32 %v4823_v24, %v1399_v57  ;;  %v1444_v19 = vadd.f32 %v4823_v24, %v1400_v13  ;;  %v1420_v35 = vmul.f32 %v4819_v3, %v1376_v52 }
 0x221   : > { %v1662_v23 = vsel %vm1624_vm10, %v1508_v21, 0.0  ;;  %v1499_v10 = vmax.f32 %v1461_v34, 0.0  ;;  %v1500_v36 = vmax.f32 %v1462_v56, 0.0  ;;  %v1401_v58 = vmul.f32 %v4819_v3, %v1357_v17 }
 0x222   : > { %v4903_v9 = vpack.c.bf16 %v1662_v23, %v1507_v50  ;;  %v1481_v12 = vmax.f32 %v1443_v16, 0.0  ;;  %v1482_v27 = vmax.f32 %v1444_v19, 0.0  ;;  %v1402_v39 = vmul.f32 %v4819_v3, %v1358_v20 }
 0x223   : > { %3570 = vmatmul.mubr.msk.bf16.gmra.mrb[8].mxu0 %vm1714_vm9, %v1665_v26  ;;  %v1419_v26 = vmul.f32 %v4819_v3, %v1375_v15  ;;  %v1677_v32 = vpack.c.bf16 %v1500_v36, %v1499_v10  ;;  %v1464_v33 = vadd.f32 %v4823_v24, %v1420_v35  ;;  %v1445_v40 = vadd.f32 %v4823_v24, %v1401_v58 }
 0x224   : > { %3573 = vmatprep.mubr.msk.bf16.mxu0 %vm3958_vm8, %v3957_v5  ;;  %3610 = vmatmul.mubr.msk.bf16.gmra.mrb[8].mxu1 %vm1714_vm9, %v1675_v63  ;;  %v1668_v42 = vpack.c.bf16 %v1482_v27, %v1481_v12  ;;  %v1446_v62 = vadd.f32 %v4823_v24, %v1402_v39  ;;  %v1421_v41 = vmul.f32 %v4819_v3, %v1377_v37 }
 0x225   : > { %3613 = vmatprep.mubr.msk.bf16.mxu1 %vm3958_vm8, %v3957_v5  ;;  %v1463_v25 = vadd.f32 %v4823_v24, %v1419_v26  ;;  %v1502_v44 = vmax.f32 %v1464_v33, 0.0  ;;  %v1422_v48 = vmul.f32 %v4819_v3, %v1378_v38  ;;  %v1483_v63 = vmax.f32 %v1445_v40, 0.0 }
 0x226   : > { %v1484_v53 = vmax.f32 %v1446_v62, 0.0  ;;  %v1403_v45 = vmul.f32 %v4819_v3, %v1359_v31  ;;  %v1404_v46 = vmul.f32 %v4819_v3, %v1360_v43  ;;  %v1465_v59 = vadd.f32 %v4823_v24, %v1421_v41 }
 0x227   : > { %v1501_v49 = vmax.f32 %v1463_v25, 0.0  ;;  %v1466_v4 = vadd.f32 %v4823_v24, %v1422_v48  ;;  %v1424_v2 = vmul.f32 %v4819_v3, %v1380_v28 }
 0x228   : > { %v1669_v11 = vpack.c.bf16 %v1484_v53, %v1483_v63  ;;  %v1447_v0 = vadd.f32 %v4823_v24, %v1403_v45  ;;  %v1448_v1 = vadd.f32 %v4823_v24, %v1404_v46  ;;  %v1503_v29 = vmax.f32 %v1465_v59, 0.0 }
 0x229   : > { %v1678_v54 = vpack.c.bf16 %v1502_v44, %v1501_v49  ;;  %v1504_v14 = vmax.f32 %v1466_v4, 0.0  ;;  %v1468_v50 = vadd.f32 %v4823_v24, %v1424_v2 }
 0x22a   : > { %v1485_v6 = vmax.f32 %v1447_v0, 0.0  ;;  %v1486_v7 = vmax.f32 %v1448_v1, 0.0 }
 0x22b   : > { %3574 = vmatmul.mubr.msk.bf16.gmra.mrb[12].mxu0 %vm1714_vm9, %v1666_v60  ;;  %v1379_v60 = vld [vmem:[#allocation3 + $0x110] sm:$0xff]  ;;  %v1679_v51 = vpack.c.bf16 %v1504_v14, %v1503_v29 }
 0x22c   : > { %3577 = vmatprep.mubr.msk.bf16.mxu0 %vm3958_vm8, %v3957_v5  ;;  %3614 = vmatmul.mubr.msk.bf16.gmra.mrb[12].mxu1 %vm1714_vm9, %v1676_v22  ;;  %v1423_v47 = vmul.f32 %v4819_v3, %v1379_v60  ;;  %v1670_v30 = vpack.c.bf16 %v1486_v7, %v1485_v6  ;;  %v1506_v3 = vmax.f32 %v1468_v50, 0.0 }
 0x22d   : > { %3617 = vmatprep.mubr.msk.bf16.mxu1 %vm3958_vm8, %v3957_v5 }
 0x22e   : > { %v1467_v57 = vadd.f32 %v4823_v24, %v1423_v47 }
 0x230   : > { %v1505_v8 = vmax.f32 %v1467_v57, 0.0 }
 0x232   : > { %v1680_v13 = vpack.c.bf16 %v1506_v3, %v1505_v8 }
 0x233   : > { %3578 = vmatmul.mubr.msk.bf16.gmra.mrb[16].mxu0 %vm1714_vm9, %v1667_v18 }
 0x234   : > { %3581 = vmatprep.mubr.msk.bf16.mxu0 %vm3958_vm8, %v3957_v5  ;;  %3618 = vmatmul.mubr.msk.bf16.gmra.mrb[16].mxu1 %vm1714_vm9, %v1677_v32 }
 0x235   : > { %3621 = vmatprep.mubr.msk.bf16.mxu1 %vm3958_vm8, %v3957_v5 }
 0x23b   : > { %3582 = vmatmul.mubr.msk.bf16.gmra.mrb[20].mxu0 %vm1714_vm9, %v1668_v42 }
 0x23c   : > { %3585 = vmatprep.mubr.msk.bf16.mxu0 %vm3958_vm8, %v3957_v5  ;;  %3622 = vmatmul.mubr.msk.bf16.gmra.mrb[20].mxu1 %vm1714_vm9, %v1678_v54 }
 0x23d   : > { %3625 = vmatprep.mubr.msk.bf16.mxu1 %vm3958_vm8, %v3957_v5 }
 0x243   : > { %3586 = vmatmul.mubr.msk.bf16.gmra.mrb[24].mxu0 %vm1714_vm9, %v1669_v11 }
 0x244   : > { %3589 = vmatprep.mubr.msk.bf16.mxu0 %vm3958_vm8, %v3957_v5  ;;  %3626 = vmatmul.mubr.msk.bf16.gmra.mrb[24].mxu1 %vm1714_vm9, %v1679_v51 }
 0x245   : > { %3629 = vmatprep.mubr.msk.bf16.mxu1 %vm3958_vm8, %v3957_v5 }
 0x24b   : > { %3590 = vmatmul.mubr.msk.bf16.gmra.mrb[28].mxu0 %vm1714_vm9, %v1670_v30 }
 0x24c   : > { %3593 = vmatprep.mubr.msk.bf16.mxu0 %vm3958_vm8, %v3957_v5  ;;  %3630 = vmatmul.mubr.msk.bf16.gmra.mrb[28].mxu1 %vm1714_vm9, %v1680_v13 }
 0x24d   : > { %3633 = vmatprep.mubr.msk.bf16.mxu1 %vm3958_vm8, %v3957_v5 }
 0x253   : > { %3594 = vmatmul.mubr.msk.bf16.gmra.mrb[32].mxu0 %vm1714_vm9, %v4869_v61 }
 0x254   : > { %3597 = vmatprep.mubr.msk.bf16.mxu0 %vm3958_vm8, %v3957_v5  ;;  %3634 = vmatmul.mubr.msk.bf16.gmra.mrb[32].mxu1 %vm1714_vm9, %v4903_v9 }
 0x25b   : > { %3598 = vmatmul.mubr.msk.bf16.gmra.mrb[36].mxu0 %vm1714_vm9, %v4880_v55 }
 0x2e6   : > { %v1806_v24 = vpop.f32.mrb[0].mxu0 }
 0x2e7   : > { %1959 = vst.msk [vmem:[#allocation4] sm:$0xff] %vm1958_vm11, %v1806_v24  ;;  %v2083_v21 = vmul.f32 %v1806_v24, %v1806_v24  ;;  %v3563_v22 = vpop.f32.mrb[1].mxu0  ;;  %v1998_v56 = vsel %vm1958_vm11, %v1806_v24, 0.0  ;;  %v4968_v18 = vpop.f32.mrb[0].mxu1 }
 0x2e8   : > { %v1809_v34 = vpop.f32.mrb[2].mxu0  ;;  %1979 = vst.msk [vmem:[#allocation4 + $0xa0] sm:$0xff] %vm1958_vm11, %v4968_v18  ;;  %v3603_v16 = vpop.f32.mrb[1].mxu1 }
 0x2e9   : > { %1960 = vst.msk [vmem:[#allocation4 + $0x8] sm:$0xff] %vm1958_vm11, %v1809_v34  ;;  %v1999_v61 = vsel %vm1958_vm11, %v1809_v34, 0.0  ;;  %v2084_v5 = vmul.f32 %v1809_v34, %v1809_v34  ;;  %v3564_v23 = vpop.f32.mrb[3].mxu0  ;;  %v2121_v52 = vsel %vm1958_vm11, %v2083_v21, 0.0  ;;  %v4972_v17 = vpop.f32.mrb[2].mxu1 }
 0x2ea   : > { %v2000_v15 = vadd.f32 %v1999_v61, %v1998_v56  ;;  %1980 = vst.msk [vmem:[#allocation4 + $0xa8] sm:$0xff] %vm1958_vm11, %v4972_v17  ;;  %v3604_v26 = vpop.f32.mrb[3].mxu1 }
 0x2eb   : > { %v2122_v55 = vsel %vm1958_vm11, %v2084_v5, 0.0 }
 0x2ec   : > { %v2123_v9 = vadd.f32 %v2122_v55, %v2121_v52 }
 0x2ee   : > { %v1814_v19 = vpop.f32.mrb[4].mxu0 }
 0x2ef   : > { %1961 = vst.msk [vmem:[#allocation4 + $0x10] sm:$0xff] %vm1958_vm11, %v1814_v19  ;;  %v2001_v20 = vsel %vm1958_vm11, %v1814_v19, 0.0  ;;  %v2085_v10 = vmul.f32 %v1814_v19, %v1814_v19  ;;  %v3567_v36 = vpop.f32.mrb[5].mxu0  ;;  %v4982_v42 = vpop.f32.mrb[4].mxu1 }
 0x2f0   : > { %v2002_v35 = vadd.f32 %v2001_v20, %v2000_v15  ;;  %v1817_v12 = vpop.f32.mrb[6].mxu0  ;;  %1981 = vst.msk [vmem:[#allocation4 + $0xb0] sm:$0xff] %vm1958_vm11, %v4982_v42  ;;  %v3607_v40 = vpop.f32.mrb[5].mxu1 }
 0x2f1   : > { %v2124_v27 = vsel %vm1958_vm11, %v2085_v10, 0.0  ;;  %1962 = vst.msk [vmem:[#allocation4 + $0x18] sm:$0xff] %vm1958_vm11, %v1817_v12  ;;  %v2003_v58 = vsel %vm1958_vm11, %v1817_v12, 0.0  ;;  %v2086_v39 = vmul.f32 %v1817_v12, %v1817_v12  ;;  %v3568_v32 = vpop.f32.mrb[7].mxu0  ;;  %v4986_v31 = vpop.f32.mrb[6].mxu1 }
 0x2f2   : > { %v2125_v25 = vadd.f32 %v2124_v27, %v2123_v9  ;;  %v2004_v33 = vadd.f32 %v2003_v58, %v2002_v35  ;;  %1982 = vst.msk [vmem:[#allocation4 + $0xb8] sm:$0xff] %vm1958_vm11, %v4986_v31  ;;  %v3608_v41 = vpop.f32.mrb[7].mxu1 }
 0x2f3   : > { %v2126_v37 = vsel %vm1958_vm11, %v2086_v39, 0.0 }
 0x2f4   : > { %v2127_v38 = vadd.f32 %v2126_v37, %v2125_v25 }
 0x2f6   : > { %v1822_v62 = vpop.f32.mrb[8].mxu0 }
 0x2f7   : > { %1963 = vst.msk [vmem:[#allocation4 + $0x20] sm:$0xff] %vm1958_vm11, %v1822_v62  ;;  %v2005_v43 = vsel %vm1958_vm11, %v1822_v62, 0.0  ;;  %v2087_v49 = vmul.f32 %v1822_v62, %v1822_v62  ;;  %v3571_v44 = vpop.f32.mrb[9].mxu0  ;;  %v4996_v11 = vpop.f32.mrb[8].mxu1 }
 0x2f8   : > { %v2006_v48 = vadd.f32 %v2005_v43, %v2004_v33  ;;  %v1825_v63 = vpop.f32.mrb[10].mxu0  ;;  %1983 = vst.msk [vmem:[#allocation4 + $0xc0] sm:$0xff] %vm1958_vm11, %v4996_v11  ;;  %v3611_v0 = vpop.f32.mrb[9].mxu1 }
 0x2f9   : > { %v2128_v53 = vsel %vm1958_vm11, %v2087_v49, 0.0  ;;  %1964 = vst.msk [vmem:[#allocation4 + $0x28] sm:$0xff] %vm1958_vm11, %v1825_v63  ;;  %v2007_v45 = vsel %vm1958_vm11, %v1825_v63, 0.0  ;;  %v2088_v46 = vmul.f32 %v1825_v63, %v1825_v63  ;;  %v3572_v54 = vpop.f32.mrb[11].mxu0  ;;  %v5000_v29 = vpop.f32.mrb[10].mxu1 }
 0x2fa   : > { %v2129_v59 = vadd.f32 %v2128_v53, %v2127_v38  ;;  %v2008_v4 = vadd.f32 %v2007_v45, %v2006_v48  ;;  %1984 = vst.msk [vmem:[#allocation4 + $0xc8] sm:$0xff] %vm1958_vm11, %v5000_v29  ;;  %v3612_v6 = vpop.f32.mrb[11].mxu1 }
 0x2fb   : > { %v2130_v60 = vsel %vm1958_vm11, %v2088_v46, 0.0 }
 0x2fc   : > { %v2131_v28 = vadd.f32 %v2130_v60, %v2129_v59 }
 0x2fe   : > { %v1830_v1 = vpop.f32.mrb[12].mxu0 }
 0x2ff   : > { %1965 = vst.msk [vmem:[#allocation4 + $0x30] sm:$0xff] %vm1958_vm11, %v1830_v1  ;;  %v2009_v14 = vsel %vm1958_vm11, %v1830_v1, 0.0  ;;  %v2089_v47 = vmul.f32 %v1830_v1, %v1830_v1  ;;  %v3575_v2 = vpop.f32.mrb[13].mxu0  ;;  %v5010_v22 = vpop.f32.mrb[12].mxu1 }
 0x300   : > { %v2010_v7 = vadd.f32 %v2009_v14, %v2008_v4  ;;  %v1833_v51 = vpop.f32.mrb[14].mxu0  ;;  %1985 = vst.msk [vmem:[#allocation4 + $0xd0] sm:$0xff] %vm1958_vm11, %v5010_v22  ;;  %v3615_v34 = vpop.f32.mrb[13].mxu1 }
 0x301   : > { %v2132_v57 = vsel %vm1958_vm11, %v2089_v47, 0.0  ;;  %1966 = vst.msk [vmem:[#allocation4 + $0x38] sm:$0xff] %vm1958_vm11, %v1833_v51  ;;  %v2011_v50 = vsel %vm1958_vm11, %v1833_v51, 0.0  ;;  %v2090_v30 = vmul.f32 %v1833_v51, %v1833_v51  ;;  %v3576_v8 = vpop.f32.mrb[15].mxu0  ;;  %v5014_v61 = vpop.f32.mrb[14].mxu1 }
 0x302   : > { %v2133_v3 = vadd.f32 %v2132_v57, %v2131_v28  ;;  %v2012_v13 = vadd.f32 %v2011_v50, %v2010_v7  ;;  %1986 = vst.msk [vmem:[#allocation4 + $0xd8] sm:$0xff] %vm1958_vm11, %v5014_v61  ;;  %v3616_v52 = vpop.f32.mrb[15].mxu1 }
 0x303   : > { %v2134_v24 = vsel %vm1958_vm11, %v2090_v30, 0.0 }
 0x304   : > { %v2135_v21 = vadd.f32 %v2134_v24, %v2133_v3 }
 0x306   : > { %v1838_v56 = vpop.f32.mrb[16].mxu0 }
 0x307   : > { %1967 = vst.msk [vmem:[#allocation4 + $0x40] sm:$0xff] %vm1958_vm11, %v1838_v56  ;;  %v2013_v5 = vsel %vm1958_vm11, %v1838_v56, 0.0  ;;  %v2091_v23 = vmul.f32 %v1838_v56, %v1838_v56  ;;  %v3579_v15 = vpop.f32.mrb[17].mxu0  ;;  %v5024_v27 = vpop.f32.mrb[16].mxu1 }
 0x308   : > { %v2014_v55 = vadd.f32 %v2013_v5, %v2012_v13  ;;  %v1841_v9 = vpop.f32.mrb[18].mxu0  ;;  %1987 = vst.msk [vmem:[#allocation4 + $0xe0] sm:$0xff] %vm1958_vm11, %v5024_v27  ;;  %v3619_v58 = vpop.f32.mrb[17].mxu1 }
 0x309   : > { %v2136_v16 = vsel %vm1958_vm11, %v2091_v23, 0.0  ;;  %1968 = vst.msk [vmem:[#allocation4 + $0x48] sm:$0xff] %vm1958_vm11, %v1841_v9  ;;  %v2015_v19 = vsel %vm1958_vm11, %v1841_v9, 0.0  ;;  %v2092_v20 = vmul.f32 %v1841_v9, %v1841_v9  ;;  %v3580_v10 = vpop.f32.mrb[19].mxu0  ;;  %v5028_v32 = vpop.f32.mrb[18].mxu1 }
 0x30a   : > { %v2137_v36 = vadd.f32 %v2136_v16, %v2135_v21  ;;  %v2016_v26 = vadd.f32 %v2015_v19, %v2014_v55  ;;  %1988 = vst.msk [vmem:[#allocation4 + $0xe8] sm:$0xff] %vm1958_vm11, %v5028_v32  ;;  %v3620_v38 = vpop.f32.mrb[19].mxu1 }
 0x30b   : > { %v2138_v35 = vsel %vm1958_vm11, %v2092_v20, 0.0 }
 0x30c   : > { %v2139_v12 = vadd.f32 %v2138_v35, %v2137_v36 }
 0x30e   : > { %v1846_v39 = vpop.f32.mrb[20].mxu0 }
 0x30f   : > { %1969 = vst.msk [vmem:[#allocation4 + $0x50] sm:$0xff] %vm1958_vm11, %v1846_v39  ;;  %v2017_v25 = vsel %vm1958_vm11, %v1846_v39, 0.0  ;;  %v2093_v33 = vmul.f32 %v1846_v39, %v1846_v39  ;;  %v3583_v37 = vpop.f32.mrb[21].mxu0  ;;  %v5038_v46 = vpop.f32.mrb[20].mxu1 }
 0x310   : > { %v2018_v40 = vadd.f32 %v2017_v25, %v2016_v26  ;;  %v1849_v62 = vpop.f32.mrb[22].mxu0  ;;  %1989 = vst.msk [vmem:[#allocation4 + $0xf0] sm:$0xff] %vm1958_vm11, %v5038_v46  ;;  %v3623_v54 = vpop.f32.mrb[21].mxu1 }
 0x311   : > { %v2140_v43 = vsel %vm1958_vm11, %v2093_v33, 0.0  ;;  %1970 = vst.msk [vmem:[#allocation4 + $0x58] sm:$0xff] %vm1958_vm11, %v1849_v62  ;;  %v2019_v49 = vsel %vm1958_vm11, %v1849_v62, 0.0  ;;  %v2094_v44 = vmul.f32 %v1849_v62, %v1849_v62  ;;  %v3584_v41 = vpop.f32.mrb[23].mxu0  ;;  %v5042_v4 = vpop.f32.mrb[22].mxu1 }
 0x312   : > { %v2141_v48 = vadd.f32 %v2140_v43, %v2139_v12  ;;  %v2020_v63 = vadd.f32 %v2019_v49, %v2018_v40  ;;  %1990 = vst.msk [vmem:[#allocation4 + $0xf8] sm:$0xff] %vm1958_vm11, %v5042_v4  ;;  %v3624_v1 = vpop.f32.mrb[23].mxu1 }
 0x313   : > { %v2142_v53 = vsel %vm1958_vm11, %v2094_v44, 0.0 }
 0x314   : > { %v2143_v45 = vadd.f32 %v2142_v53, %v2141_v48 }
 0x316   : > { %v1854_v59 = vpop.f32.mrb[24].mxu0 }
 0x317   : > { %1971 = vst.msk [vmem:[#allocation4 + $0x60] sm:$0xff] %vm1958_vm11, %v1854_v59  ;;  %v2021_v60 = vsel %vm1958_vm11, %v1854_v59, 0.0  ;;  %v2095_v28 = vmul.f32 %v1854_v59, %v1854_v59  ;;  %v3587_v0 = vpop.f32.mrb[25].mxu0  ;;  %v5052_v3 = vpop.f32.mrb[24].mxu1 }
 0x318   : > { %v2022_v14 = vadd.f32 %v2021_v60, %v2020_v63  ;;  %v1857_v47 = vpop.f32.mrb[26].mxu0  ;;  %1991 = vst.msk [vmem:[#allocation4 + $0x100] sm:$0xff] %vm1958_vm11, %v5052_v3  ;;  %v3627_v13 = vpop.f32.mrb[25].mxu1 }
 0x319   : > { %v2144_v2 = vsel %vm1958_vm11, %v2095_v28, 0.0  ;;  %1972 = vst.msk [vmem:[#allocation4 + $0x68] sm:$0xff] %vm1958_vm11, %v1857_v47  ;;  %v2023_v6 = vsel %vm1958_vm11, %v1857_v47, 0.0  ;;  %v2096_v7 = vmul.f32 %v1857_v47, %v1857_v47  ;;  %v3588_v51 = vpop.f32.mrb[27].mxu0  ;;  %v5056_v21 = vpop.f32.mrb[26].mxu1 }
 0x31a   : > { %v2145_v57 = vadd.f32 %v2144_v2, %v2143_v45  ;;  %v2024_v50 = vadd.f32 %v2023_v6, %v2022_v14  ;;  %1992 = vst.msk [vmem:[#allocation4 + $0x108] sm:$0xff] %vm1958_vm11, %v5056_v21  ;;  %v3628_v23 = vpop.f32.mrb[27].mxu1 }
 0x31b   : > { %v2146_v30 = vsel %vm1958_vm11, %v2096_v7, 0.0  ;;  %v2103_v7 = vmul.f32 %v4968_v18, %v4968_v18 }
 0x31c   : > { %v2147_v8 = vadd.f32 %v2146_v30, %v2145_v57 }
 0x31e   : > { %v1862_v24 = vpop.f32.mrb[28].mxu0 }
 0x31f   : > { %1973 = vst.msk [vmem:[#allocation4 + $0x70] sm:$0xff] %vm1958_vm11, %v1862_v24  ;;  %v2025_v34 = vsel %vm1958_vm11, %v1862_v24, 0.0  ;;  %v2097_v56 = vmul.f32 %v1862_v24, %v1862_v24  ;;  %v3591_v5 = vpop.f32.mrb[29].mxu0  ;;  %v5066_v35 = vpop.f32.mrb[28].mxu1  ;;  %v2037_v24 = vsel %vm1958_vm11, %v4968_v18, 0.0  ;;  %v2041_v18 = vsel %vm1958_vm11, %v4982_v42, 0.0 }
 0x320   : > { %v2026_v15 = vadd.f32 %v2025_v34, %v2024_v50  ;;  %v1865_v52 = vpop.f32.mrb[30].mxu0  ;;  %1993 = vst.msk [vmem:[#allocation4 + $0x110] sm:$0xff] %vm1958_vm11, %v5066_v35  ;;  %v3631_v12 = vpop.f32.mrb[29].mxu1  ;;  %v2104_v34 = vmul.f32 %v4972_v17, %v4972_v17 }
 0x321   : > { %v2148_v55 = vsel %vm1958_vm11, %v2097_v56, 0.0  ;;  %1974 = vst.msk [vmem:[#allocation4 + $0x78] sm:$0xff] %vm1958_vm11, %v1865_v52  ;;  %v2027_v9 = vsel %vm1958_vm11, %v1865_v52, 0.0  ;;  %v2098_v16 = vmul.f32 %v1865_v52, %v1865_v52  ;;  %v3592_v19 = vpop.f32.mrb[31].mxu0  ;;  %v5070_v39 = vpop.f32.mrb[30].mxu1  ;;  %v2039_v52 = vsel %vm1958_vm11, %v4972_v17, 0.0 }
 0x322   : > { %v2149_v20 = vadd.f32 %v2148_v55, %v2147_v8  ;;  %v2028_v10 = vadd.f32 %v2027_v9, %v2026_v15  ;;  %1994 = vst.msk [vmem:[#allocation4 + $0x118] sm:$0xff] %vm1958_vm11, %v5070_v39  ;;  %v3632_v38 = vpop.f32.mrb[31].mxu1  ;;  %v2160_v15 = vsel %vm1958_vm11, %v2103_v7, 0.0  ;;  %v2105_v55 = vmul.f32 %v4982_v42, %v4982_v42 }
 0x323   : > { %v2150_v36 = vsel %vm1958_vm11, %v2098_v16, 0.0  ;;  %v2162_v19 = vsel %vm1958_vm11, %v2104_v34, 0.0  ;;  %v2043_v17 = vsel %vm1958_vm11, %v4986_v31, 0.0  ;;  %v2107_v12 = vmul.f32 %v4996_v11, %v4996_v11 }
 0x324   : > { %v2151_v26 = vadd.f32 %v2150_v36, %v2149_v20  ;;  %v2106_v20 = vmul.f32 %v4986_v31, %v4986_v31  ;;  %v2045_v42 = vsel %vm1958_vm11, %v4996_v11, 0.0  ;;  %v2047_v31 = vsel %vm1958_vm11, %v5000_v29, 0.0 }
 0x325   : > { %v2049_v11 = vsel %vm1958_vm11, %v5010_v22, 0.0  ;;  %v2113_v7 = vmul.f32 %v5038_v46, %v5038_v46  ;;  %v2115_v34 = vmul.f32 %v5052_v3, %v5052_v3 }
 0x326   : > { %v1870_v58 = vpop.f32.mrb[32].mxu0 }
 0x327   : > { %1975 = vst.msk [vmem:[#allocation4 + $0x80] sm:$0xff] %vm1958_vm11, %v1870_v58  ;;  %v2029_v25 = vsel %vm1958_vm11, %v1870_v58, 0.0  ;;  %v2099_v33 = vmul.f32 %v1870_v58, %v1870_v58  ;;  %v3595_v37 = vpop.f32.mrb[33].mxu0  ;;  %v5080_v54 = vpop.f32.mrb[32].mxu1 }
 0x328   : > { %v2030_v40 = vadd.f32 %v2029_v25, %v2028_v10  ;;  %v1873_v62 = vpop.f32.mrb[34].mxu0  ;;  %1995 = vst.msk [vmem:[#allocation4 + $0x120] sm:$0xff] %vm1958_vm11, %v5080_v54  ;;  %v3635_v59 = vpop.f32.mrb[33].mxu1  ;;  %v2108_v37 = vmul.f32 %v5000_v29, %v5000_v29  ;;  %v2051_v29 = vsel %vm1958_vm11, %v5014_v61, 0.0 }
 0x329   : > { %v2152_v43 = vsel %vm1958_vm11, %v2099_v33, 0.0  ;;  %1976 = vst.msk [vmem:[#allocation4 + $0x88] sm:$0xff] %vm1958_vm11, %v1873_v62  ;;  %v2031_v49 = vsel %vm1958_vm11, %v1873_v62, 0.0  ;;  %v2100_v44 = vmul.f32 %v1873_v62, %v1873_v62  ;;  %v3596_v41 = vpop.f32.mrb[35].mxu0  ;;  %v5084_v28 = vpop.f32.mrb[34].mxu1  ;;  %v2166_v33 = vsel %vm1958_vm11, %v2106_v20, 0.0 }
 0x32a   : > { %v2153_v48 = vadd.f32 %v2152_v43, %v2151_v26  ;;  %v2032_v63 = vadd.f32 %v2031_v49, %v2030_v40  ;;  %1996 = vst.msk [vmem:[#allocation4 + $0x128] sm:$0xff] %vm1958_vm11, %v5084_v28  ;;  %v3636_v47 = vpop.f32.mrb[35].mxu1  ;;  %v2164_v26 = vsel %vm1958_vm11, %v2105_v55, 0.0  ;;  %v2168_v62 = vsel %vm1958_vm11, %v2107_v12, 0.0 }
 0x32b   : > { %v2154_v53 = vsel %vm1958_vm11, %v2100_v44, 0.0  ;;  %v2109_v43 = vmul.f32 %v5010_v22, %v5010_v22  ;;  %v2170_v41 = vsel %vm1958_vm11, %v2108_v37, 0.0  ;;  %v2111_v59 = vmul.f32 %v5024_v27, %v5024_v27 }
 0x32c   : > { %v2155_v45 = vadd.f32 %v2154_v53, %v2153_v48  ;;  %v2110_v48 = vmul.f32 %v5014_v61, %v5014_v61  ;;  %v2053_v22 = vsel %vm1958_vm11, %v5024_v27, 0.0  ;;  %v2055_v61 = vsel %vm1958_vm11, %v5028_v32, 0.0 }
 0x32d   : > { %v2057_v27 = vsel %vm1958_vm11, %v5038_v46, 0.0  ;;  %v2061_v46 = vsel %vm1958_vm11, %v5052_v3, 0.0  ;;  %v2065_v3 = vsel %vm1958_vm11, %v5066_v35, 0.0  ;;  %v2067_v12 = vsel %vm1958_vm11, %v5070_v39, 0.0 }
 0x32e   : > { %v1878_v60 = vpop.f32.mrb[36].mxu0  ;;  %v2120_v37 = vmul.f32 %v5084_v28, %v5084_v28 }
 0x32f   : > { %1977 = vst.msk [vmem:[#allocation4 + $0x90] sm:$0xff] %vm1958_vm11, %v1878_v60  ;;  %v2033_v0 = vsel %vm1958_vm11, %v1878_v60, 0.0  ;;  %v2101_v1 = vmul.f32 %v1878_v60, %v1878_v60  ;;  %v3599_v14 = vpop.f32.mrb[37].mxu0 }
 0x330   : > { %v2034_v2 = vadd.f32 %v2033_v0, %v2032_v63  ;;  %v1881_v6 = vpop.f32.mrb[38].mxu0  ;;  %v2112_v14 = vmul.f32 %v5028_v32, %v5028_v32  ;;  %v2059_v32 = vsel %vm1958_vm11, %v5042_v4, 0.0 }
 0x331   : > { %v2156_v51 = vsel %vm1958_vm11, %v2101_v1, 0.0  ;;  %1978 = vst.msk [vmem:[#allocation4 + $0x98] sm:$0xff] %vm1958_vm11, %v1881_v6  ;;  %v2035_v57 = vsel %vm1958_vm11, %v1881_v6, 0.0  ;;  %v2102_v50 = vmul.f32 %v1881_v6, %v1881_v6  ;;  %v3600_v30 = vpop.f32.mrb[39].mxu0  ;;  %v2174_v1 = vsel %vm1958_vm11, %v2110_v48, 0.0 }
 0x332   : > { %v2157_v8 = vadd.f32 %v2156_v51, %v2155_v45  ;;  %v2036_v13 = vadd.f32 %v2035_v57, %v2034_v2  ;;  %v2172_v45 = vsel %vm1958_vm11, %v2109_v43, 0.0  ;;  %v2176_v6 = vsel %vm1958_vm11, %v2111_v59, 0.0  ;;  %v1997_v59 = vld [vmem:[#allocation9] sm:$0x1] }
 0x333   : > { %v2158_v56 = vsel %vm1958_vm11, %v2102_v50, 0.0  ;;  %v2178_v50 = vsel %vm1958_vm11, %v2112_v14, 0.0  ;;  %v2114_v30 = vmul.f32 %v5042_v4, %v5042_v4  ;;  %v2063_v4 = vsel %vm1958_vm11, %v5056_v21, 0.0 }
 0x334   : > { %v2038_v5 = vadd.f32 %v2037_v24, %v2036_v13  ;;  %v2159_v23 = vadd.f32 %v2158_v56, %v2157_v8  ;;  %v2180_v24 = vsel %vm1958_vm11, %v2113_v7, 0.0 }
 0x336   : > { %v2040_v9 = vadd.f32 %v2039_v52, %v2038_v5  ;;  %v2161_v16 = vadd.f32 %v2160_v15, %v2159_v23  ;;  %v2182_v23 = vsel %vm1958_vm11, %v2114_v30, 0.0  ;;  %v2116_v15 = vmul.f32 %v5056_v21, %v5056_v21 }
 0x338   : > { %v2042_v10 = vadd.f32 %v2041_v18, %v2040_v9  ;;  %v2163_v36 = vadd.f32 %v2162_v19, %v2161_v16  ;;  %v2184_v9 = vsel %vm1958_vm11, %v2115_v34, 0.0  ;;  %v2117_v16 = vmul.f32 %v5066_v35, %v5066_v35 }
 0x339   : > { %v2186_v20 = vsel %vm1958_vm11, %v2116_v15, 0.0 }
 0x33a   : > { %v2044_v58 = vadd.f32 %v2043_v17, %v2042_v10  ;;  %v2165_v25 = vadd.f32 %v2164_v26, %v2163_v36  ;;  %v2118_v10 = vmul.f32 %v5070_v39, %v5070_v39  ;;  %v2119_v36 = vmul.f32 %v5080_v54, %v5080_v54 }
 0x33b   : > { %v2188_v21 = vsel %vm1958_vm11, %v2117_v16, 0.0  ;;  %v2194_v39 = vsel %vm1958_vm11, %v2120_v37, 0.0 }
 0x33c   : > { %v2167_v38 = vadd.f32 %v2166_v33, %v2165_v25  ;;  %v2046_v40 = vadd.f32 %v2045_v42, %v2044_v58  ;;  %v2069_v58 = vsel %vm1958_vm11, %v5080_v54, 0.0  ;;  %v2190_v35 = vsel %vm1958_vm11, %v2118_v10, 0.0 }
 0x33d   : > { %v2192_v42 = vsel %vm1958_vm11, %v2119_v36, 0.0 }
 0x33e   : > { %v2048_v49 = vadd.f32 %v2047_v31, %v2046_v40  ;;  %v2169_v44 = vadd.f32 %v2168_v62, %v2167_v38  ;;  %v2071_v62 = vsel %vm1958_vm11, %v5084_v28, 0.0 }
 0x340   : > { %v2050_v63 = vadd.f32 %v2049_v11, %v2048_v49  ;;  %v2171_v53 = vadd.f32 %v2170_v41, %v2169_v44 }
 0x342   : > { %v2052_v60 = vadd.f32 %v2051_v29, %v2050_v63  ;;  %v2173_v0 = vadd.f32 %v2172_v45, %v2171_v53 }
 0x344   : > { %v2054_v47 = vadd.f32 %v2053_v22, %v2052_v60  ;;  %v2175_v2 = vadd.f32 %v2174_v1, %v2173_v0  ;;  %v2082_v1 = vld [vmem:[#allocation10] sm:$0x1] }
 0x346   : > { %v2056_v51 = vadd.f32 %v2055_v61, %v2054_v47  ;;  %v2177_v57 = vadd.f32 %v2176_v6, %v2175_v2 }
 0x348   : > { %v2179_v8 = vadd.f32 %v2178_v50, %v2177_v57  ;;  %v2058_v13 = vadd.f32 %v2057_v27, %v2056_v51 }
 0x34a   : > { %v2181_v56 = vadd.f32 %v2180_v24, %v2179_v8  ;;  %v2060_v5 = vadd.f32 %v2059_v32, %v2058_v13 }
 0x34c   : > { %v2183_v52 = vadd.f32 %v2182_v23, %v2181_v56  ;;  %v2062_v55 = vadd.f32 %v2061_v46, %v2060_v5 }
 0x34e   : > { %v2185_v19 = vadd.f32 %v2184_v9, %v2183_v52  ;;  %v2064_v18 = vadd.f32 %v2063_v4, %v2062_v55 }
 0x350   : > { %v2187_v26 = vadd.f32 %v2186_v20, %v2185_v19  ;;  %v2066_v17 = vadd.f32 %v2065_v3, %v2064_v18 }
 0x352   : > { %v2189_v25 = vadd.f32 %v2188_v21, %v2187_v26  ;;  %v2068_v33 = vadd.f32 %v2067_v12, %v2066_v17 }
 0x354   : > { %v2191_v38 = vadd.f32 %v2190_v35, %v2189_v25  ;;  %v2070_v40 = vadd.f32 %v2069_v58, %v2068_v33 }
 0x356   : > { %v2193_v31 = vadd.f32 %v2192_v42, %v2191_v38  ;;  %v2072_v43 = vadd.f32 %v2071_v62, %v2070_v40 }
 0x358   : > { %v2073_v49 = vrot.slane %v2072_v43, 4  ;;  %v2195_v54 = vadd.f32 %v2194_v39, %v2193_v31 }
 0x35a   : > { %v2074_v44 = vadd.f32 %v2073_v49, %v2072_v43  ;;  %v2196_v41 = vrot.slane %v2195_v54, 4 }
 0x35c   : > { %v2075_v11 = vrot.slane %v2074_v44, 2  ;;  %v2197_v48 = vadd.f32 %v2196_v41, %v2195_v54 }
 0x35e   : > { %v2076_v63 = vadd.f32 %v2075_v11, %v2074_v44  ;;  %v2198_v53 = vrot.slane %v2197_v48, 2 }
 0x360   : > { %v2077_v45 = vrot.slane %v2076_v63, 1  ;;  %v2199_v29 = vadd.f32 %v2198_v53, %v2197_v48 }
 0x362   : > { %v2078_v60 = vadd.f32 %v2077_v45, %v2076_v63  ;;  %v2200_v0 = vrot.slane %v2199_v29, 1 }
 0x364   : > { %v2079_v28 = vadd.f32 %v2078_v60, %v1997_v59  ;;  %v2201_v22 = vadd.f32 %v2200_v0, %v2199_v29 }
 0x366   : > { %2081 = vst.msk [vmem:[#allocation9] sm:$0x1] %vm2080_vm12, %v2079_v28  ;;  %v2202_v14 = vadd.f32 %v2201_v22, %v2082_v1 }
 0x368   : > { %2203 = vst.msk [vmem:[#allocation10] sm:$0x1] %vm2080_vm12, %v2202_v14 }
 0x369 PF: > { %p3380_p8 = scmp.ne.s32.totalorder %s3944_s13, 3 }
 0x36a   : > { %v3774_v47 = vld [vmem:[%s5939_s8] sm:$0xff] (!%p3380_p8)   ;;  %v3959_v2 = vmov (!%p3380_p8), 0.0   ;;  %v3775_v6 = vld [vmem:[%s5939_s8 + $0x8] sm:$0xff] (!%p3380_p8)   ;;  %vm3960_vm13 = vmmov (!%p3380_p8), 0   ;;  %v2262_v13 = vlaneseq (!%p3380_p8)  ;;  %v2225_v16 = vld [vmem:[#allocation4 + $0x10] sm:$0xff] (!%p3380_p8)  ;;  %vm2429_vm14 = vcmask (!%p3380_p8), 261120  }
 0x36b   : > { %2207 = sbr.rel (%p3380_p8) target bundleno = 1529 (0x5f9), region = 80  ;;  %3637 = vmatprep.subr.bf16.mxu0 (!%p3380_p8), %v3959_v2  ;;  %3729 = vmatprep.subr.bf16.mxu1 (!%p3380_p8), %v3959_v2  ;;  %v2215_v32 = vld [vmem:[%s5937_s6] sm:$0x1] (!%p3380_p8)  ;;  %v2224_v15 = vld [vmem:[#allocation4 + $0x8] sm:$0xff] (!%p3380_p8)  ;;  %v2226_v19 = vld [vmem:[#allocation4 + $0x18] sm:$0xff] (!%p3380_p8)  ;;  %vm2672_vm15 = vcmask (!%p3380_p8), 64512  }
 0x36c   : > { %3638 = vmatpush3.bf16.msra.mxu0 (!%p3380_p8), %v3774_v47  ;;  %3731 = vmatpush3.bf16.msra.mxu1 (!%p3380_p8), %v3774_v47  ;;  %v2263_v24 = vshrl.u32 (!%p3380_p8), %v2262_v13, 7  ;;  %v2219_v23 = vld [vmem:[%s5938_s7] sm:$0x1] (!%p3380_p8)  ;;  %v2244_v55 = vld [vmem:[#allocation4 + $0xa8] sm:$0xff] (!%p3380_p8)  ;;  %v2245_v18 = vld [vmem:[#allocation4 + $0xb0] sm:$0xff] (!%p3380_p8) }
 0x36d   : > { %v2208_v61 = vld [vmem:[#allocation9] sm:$0x1] (!%p3380_p8)  ;;  %3639 = vmatprep.subr.bf16.mxu0 (!%p3380_p8), %v3959_v2  ;;  %3730 = vmatprep.subr.bf16.mxu1 (!%p3380_p8), %v3959_v2  ;;  %v2223_v46 = vld [vmem:[#allocation4] sm:$0xff] (!%p3380_p8)  ;;  %v2246_v20 = vld [vmem:[#allocation4 + $0xb8] sm:$0xff] (!%p3380_p8) }
 0x36e   : > { %v2209_v51 = vmul.f32 (!%p3380_p8), 0.0033333334, %v2208_v61  ;;  %3641 = vmatprep.mubr.msk.bf16.mxu0 (!%p3380_p8), %vm3960_vm13, %v3959_v2  ;;  %3681 = vmatprep.mubr.msk.bf16.mxu1 (!%p3380_p8), %vm3960_vm13, %v3959_v2  ;;  %v2264_v34 = vsub.s32 (!%p3380_p8), 0, %v2263_v24  ;;  %v2243_v52 = vld [vmem:[#allocation4 + $0xa0] sm:$0xff] (!%p3380_p8)  ;;  %v2228_v49 = vld [vmem:[#allocation4 + $0x28] sm:$0xff] (!%p3380_p8)  ;;  %v2229_v47 = vld [vmem:[#allocation4 + $0x30] sm:$0xff] (!%p3380_p8) }
 0x36f   : > { %v2210_v7 = vld [vmem:[#allocation10] sm:$0x1] (!%p3380_p8)  ;;  %v2227_v39 = vld [vmem:[#allocation4 + $0x20] sm:$0xff] (!%p3380_p8)  ;;  %v2248_v63 = vld [vmem:[#allocation4 + $0xc8] sm:$0xff] (!%p3380_p8) }
 0x370   : > { %v2211_v57 = vmul.f32 (!%p3380_p8), 0.0033333334, %v2210_v7  ;;  %v2212_v50 = vmul.f32 (!%p3380_p8), %v2209_v51, %v2209_v51  ;;  %3640 = vmatpush3.bf16.msra.mxu0 (!%p3380_p8), %v3775_v6  ;;  %3732 = vmatpush3.bf16.msra.mxu1 (!%p3380_p8), %v3775_v6  ;;  %v2247_v48 = vld [vmem:[#allocation4 + $0xc0] sm:$0xff] (!%p3380_p8)  ;;  %v2230_v6 = vld [vmem:[#allocation4 + $0x38] sm:$0xff] (!%p3380_p8)  ;;  %v2249_v13 = vld [vmem:[#allocation4 + $0xd0] sm:$0xff] (!%p3380_p8) }
 0x371   : > { %v2250_v24 = vld [vmem:[#allocation4 + $0xd8] sm:$0xff] (!%p3380_p8) }
 0x372   : > { %v2213_v27 = vsub.f32 %v2211_v57, %v2212_v50 }
 0x374   : > { %v2214_v30 = vmax.f32 %v2213_v27, 0.0 }
 0x376   : > { %v2216_v8 = vadd.f32 1e-05, %v2214_v30 }
 0x378   : > { %3776 = vrsqrt.f32 %v2216_v8 }
 0x382   : > { %v3777_v56 = vpop.eup %3776 }
 0x383   : > { %v2218_v5 = vmul.f32 %v3777_v56, %v2215_v32 }
 0x385   : > { %v2220_v9 = vmul.f32 %v2218_v5, %v2209_v51  ;;  %v5205_v4 = vrot.slane %v2218_v5, %v2264_v34 }
 0x387   : > { %v2221_v3 = vsub.f32 %v2219_v23, %v2220_v9  ;;  %v2267_v10 = vmul.f32 %v5205_v4, %v2223_v46  ;;  %v2268_v36 = vmul.f32 %v5205_v4, %v2224_v15  ;;  %v2287_v26 = vmul.f32 %v5205_v4, %v2243_v52  ;;  %v2232_v9 = vld [vmem:[#allocation4 + $0x48] sm:$0xff] }
 0x388   : > { %v2288_v17 = vmul.f32 %v5205_v4, %v2244_v55  ;;  %v2269_v21 = vmul.f32 %v5205_v4, %v2225_v16  ;;  %v2270_v12 = vmul.f32 %v5205_v4, %v2226_v19  ;;  %v2289_v58 = vmul.f32 %v5205_v4, %v2245_v18  ;;  %v2231_v55 = vld [vmem:[#allocation4 + $0x40] sm:$0xff] }
 0x389   : > { %v5214_v25 = vrot.slane %v2221_v3, %v2264_v34  ;;  %v2290_v33 = vmul.f32 %v5205_v4, %v2246_v20  ;;  %v2271_v29 = vmul.f32 %v5205_v4, %v2227_v39  ;;  %v2272_v59 = vmul.f32 %v5205_v4, %v2228_v49  ;;  %v2251_v20 = vld [vmem:[#allocation4 + $0xe0] sm:$0xff] }
 0x38a   : > { %v2291_v60 = vmul.f32 %v5205_v4, %v2247_v48  ;;  %v2292_v0 = vmul.f32 %v5205_v4, %v2248_v63  ;;  %v2273_v51 = vmul.f32 %v5205_v4, %v2229_v47  ;;  %v2274_v57 = vmul.f32 %v5205_v4, %v2230_v6  ;;  %v2259_v49 = vld [vmem:[#allocation4 + $0x120] sm:$0xff]  ;;  %v2234_v63 = vld [vmem:[#allocation4 + $0x58] sm:$0xff] }
 0x38b   : > { %v2311_v35 = vadd.f32 %v5214_v25, %v2267_v10  ;;  %v2312_v42 = vadd.f32 %v5214_v25, %v2268_v36  ;;  %v2331_v37 = vadd.f32 %v5214_v25, %v2287_v26  ;;  %v2332_v38 = vadd.f32 %v5214_v25, %v2288_v17  ;;  %v2252_v17 = vld [vmem:[#allocation4 + $0xe8] sm:$0xff] }
 0x38c   : > { %v2313_v40 = vadd.f32 %v5214_v25, %v2269_v21  ;;  %v2314_v62 = vadd.f32 %v5214_v25, %v2270_v12  ;;  %v2333_v31 = vadd.f32 %v5214_v25, %v2289_v58  ;;  %v2334_v43 = vadd.f32 %v5214_v25, %v2290_v33  ;;  %v2239_v12 = vld [vmem:[#allocation4 + $0x80] sm:$0xff]  ;;  %v2233_v33 = vld [vmem:[#allocation4 + $0x50] sm:$0xff] }
 0x38d   : > { %v2349_v54 = vmax.f32 %v2311_v35, 0.0  ;;  %v2350_v44 = vmax.f32 %v2312_v42, 0.0  ;;  %v2369_v41 = vmax.f32 %v2331_v37, 0.0  ;;  %v2370_v11 = vmax.f32 %v2332_v38, 0.0  ;;  %v2240_v35 = vld [vmem:[#allocation4 + $0x88] sm:$0xff] }
 0x38e   : > { %v2351_v1 = vmax.f32 %v2313_v40, 0.0  ;;  %v2352_v28 = vmax.f32 %v2314_v62, 0.0  ;;  %v2371_v22 = vmax.f32 %v2333_v31, 0.0  ;;  %v2372_v14 = vmax.f32 %v2334_v43, 0.0  ;;  %v2241_v40 = vld [vmem:[#allocation4 + $0x90] sm:$0xff]  ;;  %v2242_v62 = vld [vmem:[#allocation4 + $0x98] sm:$0xff] }
 0x38f   : > { %v2387_v53 = vpack.c.bf16 %v2350_v44, %v2349_v54  ;;  %v2397_v45 = vpack.c.bf16 %v2370_v11, %v2369_v41  ;;  %v2315_v61 = vadd.f32 %v5214_v25, %v2271_v29  ;;  %v2316_v7 = vadd.f32 %v5214_v25, %v2272_v59  ;;  %v2260_v11 = vld [vmem:[#allocation4 + $0x128] sm:$0xff] }
 0x390   : > { %v2388_v50 = vpack.c.bf16 %v2352_v28, %v2351_v1  ;;  %v2398_v27 = vpack.c.bf16 %v2372_v14, %v2371_v22  ;;  %v2335_v30 = vadd.f32 %v5214_v25, %v2291_v60  ;;  %v2336_v8 = vadd.f32 %v5214_v25, %v2292_v0  ;;  %v2253_v28 = vld [vmem:[#allocation4 + $0xf0] sm:$0xff] }
 0x391   : > { %3642 = vmatmul.mubr.msk.bf16.vlgmr.msra.gmra.mrb[0].mxu0 %vm2429_vm14, %v2387_v53  ;;  %3682 = vmatmul.mubr.msk.bf16.vlgmr.msra.gmra.mrb[0].mxu1 %vm2429_vm14, %v2397_v45  ;;  %v2353_v32 = vmax.f32 %v2315_v61, 0.0  ;;  %v2354_v34 = vmax.f32 %v2316_v7, 0.0  ;;  %v2293_v56 = vmul.f32 %v5205_v4, %v2249_v13  ;;  %v2294_v5 = vmul.f32 %v5205_v4, %v2250_v24 }
 0x392   : > { %3645 = vmatprep.mubr.msk.bf16.mxu0 %vm3960_vm13, %v3959_v2  ;;  %3685 = vmatprep.mubr.msk.bf16.mxu1 %vm3960_vm13, %v3959_v2  ;;  %v2373_v23 = vmax.f32 %v2335_v30, 0.0  ;;  %v2374_v46 = vmax.f32 %v2336_v8, 0.0  ;;  %v2317_v15 = vadd.f32 %v5214_v25, %v2273_v51  ;;  %v2318_v52 = vadd.f32 %v5214_v25, %v2274_v57  ;;  %v2254_v51 = vld [vmem:[#allocation4 + $0xf8] sm:$0xff] }
 0x393   : > { %v2389_v16 = vpack.c.bf16 %v2354_v34, %v2353_v32  ;;  %v2337_v19 = vadd.f32 %v5214_v25, %v2293_v56  ;;  %v2338_v18 = vadd.f32 %v5214_v25, %v2294_v5  ;;  %v2275_v26 = vmul.f32 %v5205_v4, %v2231_v55 }
 0x394   : > { %v2399_v3 = vpack.c.bf16 %v2374_v46, %v2373_v23  ;;  %v2355_v10 = vmax.f32 %v2317_v15, 0.0  ;;  %v2356_v36 = vmax.f32 %v2318_v52, 0.0  ;;  %v2276_v21 = vmul.f32 %v5205_v4, %v2232_v9 }
 0x395   : > { %v2295_v58 = vmul.f32 %v5205_v4, %v2251_v20  ;;  %v2375_v42 = vmax.f32 %v2337_v19, 0.0  ;;  %v2376_v37 = vmax.f32 %v2338_v18, 0.0  ;;  %v2296_v38 = vmul.f32 %v5205_v4, %v2252_v17 }
 0x396   : > { %v2390_v31 = vpack.c.bf16 %v2356_v36, %v2355_v10  ;;  %v2319_v43 = vadd.f32 %v5214_v25, %v2275_v26  ;;  %v2283_v39 = vmul.f32 %v5205_v4, %v2239_v12  ;;  %v2320_v54 = vadd.f32 %v5214_v25, %v2276_v21  ;;  %v2236_v10 = vld [vmem:[#allocation4 + $0x68] sm:$0xff]  ;;  %v2255_v36 = vld [vmem:[#allocation4 + $0x100] sm:$0xff] }
 0x397   : > { %v2277_v44 = vmul.f32 %v5205_v4, %v2233_v33  ;;  %v2284_v41 = vmul.f32 %v5205_v4, %v2240_v35  ;;  %v2339_v48 = vadd.f32 %v5214_v25, %v2295_v58  ;;  %v2285_v45 = vmul.f32 %v5205_v4, %v2241_v40  ;;  %v2256_v26 = vld [vmem:[#allocation4 + $0x108] sm:$0xff] }
 0x398   : > { %v2327_v53 = vadd.f32 %v5214_v25, %v2283_v39  ;;  %v2286_v29 = vmul.f32 %v5205_v4, %v2242_v62  ;;  %v2400_v59 = vpack.c.bf16 %v2376_v37, %v2375_v42  ;;  %v2340_v60 = vadd.f32 %v5214_v25, %v2296_v38 }
 0x399   : > { %3646 = vmatmul.mubr.msk.bf16.gmra.mrb[4].mxu0 %vm2429_vm14, %v2388_v50  ;;  %3686 = vmatmul.mubr.msk.bf16.gmra.mrb[4].mxu1 %vm2429_vm14, %v2398_v27  ;;  %v2328_v0 = vadd.f32 %v5214_v25, %v2284_v41  ;;  %v2303_v1 = vmul.f32 %v5205_v4, %v2259_v49  ;;  %v2329_v14 = vadd.f32 %v5214_v25, %v2285_v45  ;;  %v2357_v61 = vmax.f32 %v2319_v43, 0.0  ;;  %v2237_v49 = vld [vmem:[#allocation4 + $0x70] sm:$0xff]  ;;  %v2258_v41 = vld [vmem:[#allocation4 + $0x118] sm:$0xff] }
 0x39a   : > { %3649 = vmatprep.mubr.msk.bf16.mxu0 %vm3960_vm13, %v3959_v2  ;;  %3689 = vmatprep.mubr.msk.bf16.mxu1 %vm3960_vm13, %v3959_v2  ;;  %v2365_v22 = vmax.f32 %v2327_v53, 0.0  ;;  %v2330_v47 = vadd.f32 %v5214_v25, %v2286_v29  ;;  %v2304_v6 = vmul.f32 %v5205_v4, %v2260_v11  ;;  %v2278_v7 = vmul.f32 %v5205_v4, %v2234_v63 }
 0x39b   : > { %v2366_v57 = vmax.f32 %v2328_v0, 0.0  ;;  %v2347_v50 = vadd.f32 %v5214_v25, %v2303_v1  ;;  %v2358_v27 = vmax.f32 %v2320_v54, 0.0  ;;  %v2367_v30 = vmax.f32 %v2329_v14, 0.0  ;;  %v2238_v54 = vld [vmem:[#allocation4 + $0x78] sm:$0xff] }
 0x39c   : > { %v2368_v8 = vmax.f32 %v2330_v47, 0.0  ;;  %v2348_v13 = vadd.f32 %v5214_v25, %v2304_v6  ;;  %v2377_v24 = vmax.f32 %v2339_v48, 0.0  ;;  %v2297_v32 = vmul.f32 %v5205_v4, %v2253_v28 }
 0x39d   : > { %v5282_v34 = vpack.c.bf16 %v2366_v57, %v2365_v22  ;;  %v2385_v56 = vmax.f32 %v2347_v50, 0.0  ;;  %v2378_v5 = vmax.f32 %v2340_v60, 0.0  ;;  %v2298_v23 = vmul.f32 %v5205_v4, %v2254_v51 }
 0x39e   : > { %v5287_v46 = vpack.c.bf16 %v2368_v8, %v2367_v30  ;;  %v2386_v15 = vmax.f32 %v2348_v13, 0.0  ;;  %v2321_v55 = vadd.f32 %v5214_v25, %v2277_v44  ;;  %v2322_v9 = vadd.f32 %v5214_v25, %v2278_v7  ;;  %v2257_v44 = vld [vmem:[#allocation4 + $0x110] sm:$0xff] }
 0x39f   : > { %v2401_v19 = vpack.c.bf16 %v2378_v5, %v2377_v24  ;;  %v2341_v18 = vadd.f32 %v5214_v25, %v2297_v32  ;;  %v2342_v20 = vadd.f32 %v5214_v25, %v2298_v23  ;;  %v2280_v58 = vmul.f32 %v5205_v4, %v2236_v10 }
 0x3a0   : > { %v5293_v52 = vpack.c.bf16 %v2386_v15, %v2385_v56  ;;  %v2359_v17 = vmax.f32 %v2321_v55, 0.0  ;;  %v2360_v21 = vmax.f32 %v2322_v9, 0.0  ;;  %v2299_v42 = vmul.f32 %v5205_v4, %v2255_v36 }
 0x3a1   : > { %3650 = vmatmul.mubr.msk.bf16.gmra.mrb[8].mxu0 %vm2429_vm14, %v2389_v16  ;;  %3690 = vmatmul.mubr.msk.bf16.gmra.mrb[8].mxu1 %vm2429_vm14, %v2399_v3  ;;  %v2391_v16 = vpack.c.bf16 %v2358_v27, %v2357_v61  ;;  %v2235_v3 = vld [vmem:[#allocation4 + $0x60] sm:$0xff]  ;;  %v2379_v33 = vmax.f32 %v2341_v18, 0.0  ;;  %v2380_v35 = vmax.f32 %v2342_v20, 0.0  ;;  %v2300_v37 = vmul.f32 %v5205_v4, %v2256_v26 }
 0x3a2   : > { %3653 = vmatprep.mubr.msk.bf16.mxu0 %vm3960_vm13, %v3959_v2  ;;  %3693 = vmatprep.mubr.msk.bf16.mxu1 %vm3960_vm13, %v3959_v2  ;;  %v2279_v12 = vmul.f32 %v5205_v4, %v2235_v3  ;;  %v2324_v40 = vadd.f32 %v5214_v25, %v2280_v58  ;;  %v2392_v62 = vpack.c.bf16 %v2360_v21, %v2359_v17 }
 0x3a3   : > { %v2343_v43 = vadd.f32 %v5214_v25, %v2299_v42  ;;  %v2344_v39 = vadd.f32 %v5214_v25, %v2300_v37  ;;  %v2281_v63 = vmul.f32 %v5205_v4, %v2237_v49  ;;  %v2282_v53 = vmul.f32 %v5205_v4, %v2238_v54 }
 0x3a4   : > { %v2323_v38 = vadd.f32 %v5214_v25, %v2279_v12  ;;  %v2362_v48 = vmax.f32 %v2324_v40, 0.0  ;;  %v2302_v60 = vmul.f32 %v5205_v4, %v2258_v41 }
 0x3a5   : > { %v2381_v45 = vmax.f32 %v2343_v43, 0.0  ;;  %v2382_v29 = vmax.f32 %v2344_v39, 0.0  ;;  %v2325_v0 = vadd.f32 %v5214_v25, %v2281_v63  ;;  %v2326_v1 = vadd.f32 %v5214_v25, %v2282_v53 }
 0x3a6   : > { %v2361_v11 = vmax.f32 %v2323_v38, 0.0  ;;  %v2346_v47 = vadd.f32 %v5214_v25, %v2302_v60 }
 0x3a7   : > { %v2403_v22 = vpack.c.bf16 %v2382_v29, %v2381_v45  ;;  %v2364_v6 = vmax.f32 %v2326_v1, 0.0 }
 0x3a8   : > { %v2393_v28 = vpack.c.bf16 %v2362_v48, %v2361_v11  ;;  %v2384_v7 = vmax.f32 %v2346_v47, 0.0 }
 0x3a9   : > { %3654 = vmatmul.mubr.msk.bf16.gmra.mrb[12].mxu0 %vm2429_vm14, %v2390_v31  ;;  %3694 = vmatmul.mubr.msk.bf16.gmra.mrb[12].mxu1 %vm2429_vm14, %v2400_v59  ;;  %v2402_v31 = vpack.c.bf16 %v2380_v35, %v2379_v33  ;;  %v2301_v59 = vmul.f32 %v5205_v4, %v2257_v44  ;;  %v2363_v4 = vmax.f32 %v2325_v0, 0.0 }
 0x3aa   : > { %3657 = vmatprep.mubr.msk.bf16.mxu0 %vm3960_vm13, %v3959_v2  ;;  %3697 = vmatprep.mubr.msk.bf16.mxu1 %vm3960_vm13, %v3959_v2 }
 0x3ab   : > { %v2345_v14 = vadd.f32 %v5214_v25, %v2301_v59  ;;  %v2394_v51 = vpack.c.bf16 %v2364_v6, %v2363_v4  ;;  %v5350_v25 = vld [vmem:[%s5940_s9] ss:$0 sm:$0xff] }
 0x3ad   : > { %v2383_v61 = vmax.f32 %v2345_v14, 0.0 }
 0x3af   : > { %v2404_v57 = vpack.c.bf16 %v2384_v7, %v2383_v61 }
 0x3b1   : > { %3658 = vmatmul.mubr.msk.bf16.gmra.mrb[16].mxu0 %vm2429_vm14, %v2391_v16  ;;  %3698 = vmatmul.mubr.msk.bf16.gmra.mrb[16].mxu1 %vm2429_vm14, %v2401_v19 }
 0x3b2   : > { %3661 = vmatprep.mubr.msk.bf16.mxu0 %vm3960_vm13, %v3959_v2  ;;  %3701 = vmatprep.mubr.msk.bf16.mxu1 %vm3960_vm13, %v3959_v2 }
 0x3b9   : > { %3662 = vmatmul.mubr.msk.bf16.gmra.mrb[20].mxu0 %vm2429_vm14, %v2392_v62  ;;  %3702 = vmatmul.mubr.msk.bf16.gmra.mrb[20].mxu1 %vm2429_vm14, %v2402_v31 }
 0x3ba   : > { %3665 = vmatprep.mubr.msk.bf16.mxu0 %vm3960_vm13, %v3959_v2  ;;  %3705 = vmatprep.mubr.msk.bf16.mxu1 %vm3960_vm13, %v3959_v2 }
 0x3c1   : > { %3666 = vmatmul.mubr.msk.bf16.gmra.mrb[24].mxu0 %vm2429_vm14, %v2393_v28  ;;  %3706 = vmatmul.mubr.msk.bf16.gmra.mrb[24].mxu1 %vm2429_vm14, %v2403_v22 }
 0x3c2   : > { %3669 = vmatprep.mubr.msk.bf16.mxu0 %vm3960_vm13, %v3959_v2  ;;  %3709 = vmatprep.mubr.msk.bf16.mxu1 %vm3960_vm13, %v3959_v2 }
 0x3c9   : > { %3670 = vmatmul.mubr.msk.bf16.gmra.mrb[28].mxu0 %vm2429_vm14, %v2394_v51  ;;  %3710 = vmatmul.mubr.msk.bf16.gmra.mrb[28].mxu1 %vm2429_vm14, %v2404_v57 }
 0x3ca   : > { %3673 = vmatprep.mubr.msk.bf16.mxu0 %vm3960_vm13, %v3959_v2  ;;  %3713 = vmatprep.mubr.msk.bf16.mxu1 %vm3960_vm13, %v3959_v2 }
 0x3d1   : > { %3674 = vmatmul.mubr.msk.bf16.gmra.mrb[32].mxu0 %vm2429_vm14, %v5282_v34  ;;  %3714 = vmatmul.mubr.msk.bf16.gmra.mrb[32].mxu1 %vm2429_vm14, %v5293_v52 }
 0x3d2   : > { %3677 = vmatprep.mubr.msk.bf16.mxu0 %vm3960_vm13, %v3959_v2 }
 0x3d9   : > { %3678 = vmatmul.mubr.msk.bf16.gmra.mrb[36].mxu0 %vm2429_vm14, %v5287_v46 }
 0x464   : > { %v2521_v50 = vpop.f32.mrb[0].mxu0  ;;  %v2601_v27 = vpop.f32.mrb[0].mxu1 }
 0x465   : > { %v5353_v30 = vadd.f32 %v5350_v25, %v2521_v50  ;;  %v5356_v8 = vadd.f32 %v5350_v25, %v2601_v27  ;;  %v3643_v13 = vpop.f32.mrb[1].mxu0  ;;  %v3683_v24 = vpop.f32.mrb[1].mxu1 }
 0x466   : > { %v2524_v2 = vpop.f32.mrb[2].mxu0  ;;  %v2604_v32 = vpop.f32.mrb[2].mxu1 }
 0x467   : > { %v5359_v34 = vadd.f32 %v5350_v25, %v2604_v32  ;;  %v3644_v56 = vpop.f32.mrb[3].mxu0  ;;  %v3684_v5 = vpop.f32.mrb[3].mxu1  ;;  %v2673_v23 = vsel %vm2672_vm15, %v5353_v30, -inf  ;;  %v2733_v15 = vsel %vm2672_vm15, %v5356_v8, -inf  ;;  %v5368_v52 = vadd.f32 %v5350_v25, %v2524_v2 }
 0x468   : > { %2674 = vmax.xlane.f32.xlu0 %v2673_v23 }
 0x469   : > { %v2736_v46 = vsel %vm2672_vm15, %v5359_v34, -inf  ;;  %v2676_v17 = vsel %vm2672_vm15, %v5368_v52, -inf }
 0x46a   : > { %2737 = vmax.xlane.f32.xlu1 %v2736_v46 }
 0x46c   : > { %2734 = vmax.xlane.f32.xlu0 %v2733_v15  ;;  %v2529_v55 = vpop.f32.mrb[4].mxu0  ;;  %v2609_v9 = vpop.f32.mrb[4].mxu1 }
 0x46d   : > { %v5371_v16 = vadd.f32 %v5350_v25, %v2529_v55  ;;  %v3647_v19 = vpop.f32.mrb[5].mxu0  ;;  %v5374_v18 = vadd.f32 %v5350_v25, %v2609_v9  ;;  %v3687_v20 = vpop.f32.mrb[5].mxu1 }
 0x46e   : > { %v2532_v3 = vpop.f32.mrb[6].mxu0  ;;  %v2612_v10 = vpop.f32.mrb[6].mxu1 }
 0x46f   : > { %v5377_v36 = vadd.f32 %v5350_v25, %v2532_v3  ;;  %v3648_v26 = vpop.f32.mrb[7].mxu0  ;;  %v2679_v21 = vsel %vm2672_vm15, %v5371_v16, -inf  ;;  %v3688_v12 = vpop.f32.mrb[7].mxu1  ;;  %v5384_v58 = vadd.f32 %v5350_v25, %v2612_v10  ;;  %v2739_v33 = vsel %vm2672_vm15, %v5374_v18, -inf }
 0x470   : > { %2677 = vmax.xlane.f32.xlu0 %v2676_v17  ;;  %2680 = vmax.xlane.f32.xlu1 %v2679_v21 }
 0x471   : > { %v2682_v35 = vsel %vm2672_vm15, %v5377_v36, -inf  ;;  %v2742_v31 = vsel %vm2672_vm15, %v5384_v58, -inf }
 0x474   : > { %2740 = vmax.xlane.f32.xlu0 %v2739_v33  ;;  %2683 = vmax.xlane.f32.xlu1 %v2682_v35  ;;  %v2537_v42 = vpop.f32.mrb[8].mxu0  ;;  %v2617_v37 = vpop.f32.mrb[8].mxu1 }
 0x475   : > { %v5391_v38 = vadd.f32 %v5350_v25, %v2537_v42  ;;  %v3651_v40 = vpop.f32.mrb[9].mxu0  ;;  %v5394_v62 = vadd.f32 %v5350_v25, %v2617_v37  ;;  %v3691_v43 = vpop.f32.mrb[9].mxu1 }
 0x476   : > { %v2540_v39 = vpop.f32.mrb[10].mxu0  ;;  %v2620_v49 = vpop.f32.mrb[10].mxu1 }
 0x477   : > { %v5399_v54 = vadd.f32 %v5350_v25, %v2540_v39  ;;  %v3652_v44 = vpop.f32.mrb[11].mxu0  ;;  %v2685_v41 = vsel %vm2672_vm15, %v5391_v38, -inf  ;;  %v3692_v11 = vpop.f32.mrb[11].mxu1  ;;  %v5404_v48 = vadd.f32 %v5350_v25, %v2620_v49  ;;  %v2745_v63 = vsel %vm2672_vm15, %v5394_v62, -inf }
 0x478   : > { %2743 = vmax.xlane.f32.xlu1 %v2742_v31  ;;  %2686 = vmax.xlane.f32.xlu0 %v2685_v41 }
 0x479   : > { %v2688_v53 = vsel %vm2672_vm15, %v5399_v54, -inf  ;;  %v2748_v1 = vsel %vm2672_vm15, %v5404_v48, -inf }
 0x47c   : > { %2746 = vmax.xlane.f32.xlu0 %v2745_v63  ;;  %2689 = vmax.xlane.f32.xlu1 %v2688_v53  ;;  %v2545_v45 = vpop.f32.mrb[12].mxu0  ;;  %v2625_v29 = vpop.f32.mrb[12].mxu1 }
 0x47d   : > { %v5411_v59 = vadd.f32 %v5350_v25, %v2545_v45  ;;  %v3655_v60 = vpop.f32.mrb[13].mxu0  ;;  %v5414_v0 = vadd.f32 %v5350_v25, %v2625_v29  ;;  %v3695_v28 = vpop.f32.mrb[13].mxu1 }
 0x47e   : > { %v2548_v22 = vpop.f32.mrb[14].mxu0  ;;  %v2628_v14 = vpop.f32.mrb[14].mxu1 }
 0x47f   : > { %v5419_v47 = vadd.f32 %v5350_v25, %v2548_v22  ;;  %v3656_v4 = vpop.f32.mrb[15].mxu0  ;;  %v2691_v6 = vsel %vm2672_vm15, %v5411_v59, -inf  ;;  %v3696_v61 = vpop.f32.mrb[15].mxu1  ;;  %v5424_v7 = vadd.f32 %v5350_v25, %v2628_v14  ;;  %v2751_v51 = vsel %vm2672_vm15, %v5414_v0, -inf }
 0x480   : > { %2749 = vmax.xlane.f32.xlu1 %v2748_v1  ;;  %2692 = vmax.xlane.f32.xlu0 %v2691_v6 }
 0x481   : > { %v2694_v57 = vsel %vm2672_vm15, %v5419_v47, -inf  ;;  %v2754_v32 = vsel %vm2672_vm15, %v5424_v7, -inf }
 0x484   : > { %2752 = vmax.xlane.f32.xlu0 %v2751_v51  ;;  %2695 = vmax.xlane.f32.xlu1 %v2694_v57  ;;  %v2553_v50 = vpop.f32.mrb[16].mxu0  ;;  %v2633_v27 = vpop.f32.mrb[16].mxu1 }
 0x485   : > { %v5431_v13 = vadd.f32 %v5350_v25, %v2553_v50  ;;  %v3659_v24 = vpop.f32.mrb[17].mxu0  ;;  %v5434_v2 = vadd.f32 %v5350_v25, %v2633_v27  ;;  %v3699_v56 = vpop.f32.mrb[17].mxu1 }
 0x486   : > { %v2556_v5 = vpop.f32.mrb[18].mxu0  ;;  %v2636_v23 = vpop.f32.mrb[18].mxu1 }
 0x487   : > { %v5439_v46 = vadd.f32 %v5350_v25, %v2556_v5  ;;  %v3660_v15 = vpop.f32.mrb[19].mxu0  ;;  %v2697_v55 = vsel %vm2672_vm15, %v5431_v13, -inf  ;;  %v3700_v9 = vpop.f32.mrb[19].mxu1  ;;  %v5444_v19 = vadd.f32 %v5350_v25, %v2636_v23  ;;  %v2757_v20 = vsel %vm2672_vm15, %v5434_v2, -inf }
 0x488   : > { %2755 = vmax.xlane.f32.xlu1 %v2754_v32  ;;  %2698 = vmax.xlane.f32.xlu0 %v2697_v55 }
 0x489   : > { %v2700_v3 = vsel %vm2672_vm15, %v5439_v46, -inf  ;;  %v2760_v33 = vsel %vm2672_vm15, %v5444_v19, -inf }
 0x48c   : > { %2758 = vmax.xlane.f32.xlu0 %v2757_v20  ;;  %2701 = vmax.xlane.f32.xlu1 %v2700_v3  ;;  %v2561_v10 = vpop.f32.mrb[20].mxu0  ;;  %v2641_v26 = vpop.f32.mrb[20].mxu1 }
 0x48d   : > { %v5451_v17 = vadd.f32 %v5350_v25, %v2561_v10  ;;  %v3663_v21 = vpop.f32.mrb[21].mxu0  ;;  %v5454_v12 = vadd.f32 %v5350_v25, %v2641_v26  ;;  %v3703_v35 = vpop.f32.mrb[21].mxu1 }
 0x48e   : > { %v2564_v42 = vpop.f32.mrb[22].mxu0  ;;  %v2644_v37 = vpop.f32.mrb[22].mxu1 }
 0x48f   : > { %v5459_v40 = vadd.f32 %v5350_v25, %v2564_v42  ;;  %v3664_v31 = vpop.f32.mrb[23].mxu0  ;;  %v2703_v43 = vsel %vm2672_vm15, %v5451_v17, -inf  ;;  %v3704_v39 = vpop.f32.mrb[23].mxu1  ;;  %v5464_v49 = vadd.f32 %v5350_v25, %v2644_v37  ;;  %v2763_v44 = vsel %vm2672_vm15, %v5454_v12, -inf }
 0x490   : > { %2761 = vmax.xlane.f32.xlu1 %v2760_v33  ;;  %2704 = vmax.xlane.f32.xlu0 %v2703_v43 }
 0x491   : > { %v2706_v41 = vsel %vm2672_vm15, %v5459_v40, -inf  ;;  %v2766_v60 = vsel %vm2672_vm15, %v5464_v49, -inf }
 0x494   : > { %2764 = vmax.xlane.f32.xlu0 %v2763_v44  ;;  %2707 = vmax.xlane.f32.xlu1 %v2706_v41  ;;  %v2569_v11 = vpop.f32.mrb[24].mxu0  ;;  %v2649_v63 = vpop.f32.mrb[24].mxu1 }
 0x495   : > { %v5471_v53 = vadd.f32 %v5350_v25, %v2569_v11  ;;  %v3667_v45 = vpop.f32.mrb[25].mxu0  ;;  %v5474_v29 = vadd.f32 %v5350_v25, %v2649_v63  ;;  %v3707_v1 = vpop.f32.mrb[25].mxu1 }
 0x496   : > { %v2572_v28 = vpop.f32.mrb[26].mxu0  ;;  %v2652_v22 = vpop.f32.mrb[26].mxu1 }
 0x497   : > { %v5479_v14 = vadd.f32 %v5350_v25, %v2572_v28  ;;  %v3668_v4 = vpop.f32.mrb[27].mxu0  ;;  %v2709_v6 = vsel %vm2672_vm15, %v5471_v53, -inf  ;;  %v3708_v61 = vpop.f32.mrb[27].mxu1  ;;  %v5484_v51 = vadd.f32 %v5350_v25, %v2652_v22  ;;  %v2769_v57 = vsel %vm2672_vm15, %v5474_v29, -inf }
 0x498   : > { %2767 = vmax.xlane.f32.xlu1 %v2766_v60  ;;  %2710 = vmax.xlane.f32.xlu0 %v2709_v6 }
 0x499   : > { %v2712_v50 = vsel %vm2672_vm15, %v5479_v14, -inf  ;;  %v2772_v23 = vsel %vm2672_vm15, %v5484_v51, -inf }
 0x49c   : > { %2770 = vmax.xlane.f32.xlu0 %v2769_v57  ;;  %2713 = vmax.xlane.f32.xlu1 %v2712_v50  ;;  %v2577_v27 = vpop.f32.mrb[28].mxu0  ;;  %v2657_v24 = vpop.f32.mrb[28].mxu1 }
 0x49d   : > { %v5491_v32 = vadd.f32 %v5350_v25, %v2577_v27  ;;  %v3671_v56 = vpop.f32.mrb[29].mxu0  ;;  %v5494_v5 = vadd.f32 %v5350_v25, %v2657_v24  ;;  %v3711_v15 = vpop.f32.mrb[29].mxu1 }
 0x49e   : > { %v2580_v55 = vpop.f32.mrb[30].mxu0  ;;  %v2660_v9 = vpop.f32.mrb[30].mxu1 }
 0x49f   : > { %v5499_v20 = vadd.f32 %v5350_v25, %v2580_v55  ;;  %v3672_v3 = vpop.f32.mrb[31].mxu0  ;;  %v2715_v10 = vsel %vm2672_vm15, %v5491_v32, -inf  ;;  %v3712_v26 = vpop.f32.mrb[31].mxu1  ;;  %v5504_v21 = vadd.f32 %v5350_v25, %v2660_v9  ;;  %v2775_v33 = vsel %vm2672_vm15, %v5494_v5, -inf }
 0x4a0   : > { %2773 = vmax.xlane.f32.xlu1 %v2772_v23  ;;  %2716 = vmax.xlane.f32.xlu0 %v2715_v10 }
 0x4a1   : > { %v2718_v35 = vsel %vm2672_vm15, %v5499_v20, -inf  ;;  %v2778_v39 = vsel %vm2672_vm15, %v5504_v21, -inf }
 0x4a4   : > { %2776 = vmax.xlane.f32.xlu0 %v2775_v33  ;;  %2719 = vmax.xlane.f32.xlu1 %v2718_v35  ;;  %v2585_v42 = vpop.f32.mrb[32].mxu0  ;;  %v2665_v37 = vpop.f32.mrb[32].mxu1 }
 0x4a5   : > { %v5511_v31 = vadd.f32 %v5350_v25, %v2585_v42  ;;  %v3675_v43 = vpop.f32.mrb[33].mxu0  ;;  %v3715_v44 = vpop.f32.mrb[33].mxu1  ;;  %v5526_v61 = vadd.f32 %v5350_v25, %v2665_v37 }
 0x4a6   : > { %v2588_v41 = vpop.f32.mrb[34].mxu0  ;;  %v2668_v11 = vpop.f32.mrb[34].mxu1 }
 0x4a7   : > { %v5516_v63 = vadd.f32 %v5350_v25, %v2588_v41  ;;  %v3676_v45 = vpop.f32.mrb[35].mxu0  ;;  %v2721_v60 = vsel %vm2672_vm15, %v5511_v31, -inf  ;;  %v3716_v1 = vpop.f32.mrb[35].mxu1  ;;  %v5534_v56 = vadd.f32 %v5350_v25, %v2668_v11  ;;  %v2781_v15 = vsel %vm2672_vm15, %v5526_v61, -inf }
 0x4a8   : > { %2779 = vmax.xlane.f32.xlu1 %v2778_v39  ;;  %2722 = vmax.xlane.f32.xlu0 %v2721_v60 }
 0x4a9   : > { %v2724_v28 = vsel %vm2672_vm15, %v5516_v63, -inf  ;;  %v2784_v55 = vsel %vm2672_vm15, %v5534_v56, -inf }
 0x4ac   : > { %2725 = vmax.xlane.f32.xlu1 %v2724_v28  ;;  %v2593_v22 = vpop.f32.mrb[36].mxu0 }
 0x4ad   : > { %v5523_v4 = vadd.f32 %v5350_v25, %v2593_v22  ;;  %v3679_v6 = vpop.f32.mrb[37].mxu0 }
 0x4ae   : > { %v2596_v57 = vpop.f32.mrb[38].mxu0 }
 0x4af   : > { %v5529_v50 = vadd.f32 %v5350_v25, %v2596_v57  ;;  %v3680_v27 = vpop.f32.mrb[39].mxu0  ;;  %v2727_v24 = vsel %vm2672_vm15, %v5523_v4, -inf }
 0x4b0   : > { %2728 = vmax.xlane.f32.xlu0 %v2727_v24 }
 0x4b1   : > { %v2730_v23 = vsel %vm2672_vm15, %v5529_v50, -inf }
 0x4b2   : > { %2731 = vmax.xlane.f32.xlu1 %v2730_v23 }
 0x4b4   : > { %2782 = vmax.xlane.f32.xlu0 %v2781_v15 }
 0x4b6   : > { %2785 = vmax.xlane.f32.xlu1 %v2784_v55 }
 0x4f5   : > { %v2675_v9 = vpop.xlane.xlu0 %2674 }
 0x4f6   : > { %v2787_v3 = vsub.f32 %v5353_v30, %v2675_v9 }
 0x4f7   : > { %v2738_v26 = vpop.xlane.xlu1 %2737 }
 0x4f8   : > { %v2825_v10 = vmul.f32 1.442695, %v2787_v3  ;;  %v2808_v35 = vsub.f32 %v5359_v34, %v2738_v26 }
 0x4f9   : > { %v2735_v25 = vpop.xlane.xlu0 %2734 }
 0x4fa   : > { %3778 = vpow2.f32 %v2825_v10  ;;  %v2807_v33 = vsub.f32 %v5356_v8, %v2735_v25  ;;  %v2867_v41 = vmul.f32 1.442695, %v2808_v35 }
 0x4fc   : > { %v2865_v42 = vmul.f32 1.442695, %v2807_v33 }
 0x4fd   : > { %v2678_v37 = vpop.xlane.xlu0 %2677  ;;  %v2681_v43 = vpop.xlane.xlu1 %2680 }
 0x4fe   : > { %3780 = vpow2.f32 %v2865_v42  ;;  %v2788_v39 = vsub.f32 %v5368_v52, %v2678_v37  ;;  %v2789_v44 = vsub.f32 %v5371_v16, %v2681_v43 }
 0x500   : > { %v2827_v11 = vmul.f32 1.442695, %v2788_v39  ;;  %v2829_v45 = vmul.f32 1.442695, %v2789_v44 }
 0x501   : > { %v2741_v30 = vpop.xlane.xlu0 %2740  ;;  %v2684_v60 = vpop.xlane.xlu1 %2683 }
 0x502   : > { %3782 = vpow2.f32 %v2827_v11  ;;  %v2809_v1 = vsub.f32 %v5374_v18, %v2741_v30  ;;  %v2790_v8 = vsub.f32 %v5377_v36, %v2684_v60 }
 0x503   : > { %3784 = vpow2.f32 %v2829_v45 }
 0x504   : > { %v5549_v34 = vpop.eup %3778  ;;  %3786 = vpow2.f32 %v2867_v41  ;;  %v2869_v28 = vmul.f32 1.442695, %v2809_v1  ;;  %v2831_v22 = vmul.f32 1.442695, %v2790_v8 }
 0x505   : > { %v2744_v6 = vpop.xlane.xlu1 %2743  ;;  %v2687_v52 = vpop.xlane.xlu0 %2686  ;;  %v2901_v16 = vsel %vm2672_vm15, %v5549_v34, 0.0 }
 0x506   : > { %3788 = vpow2.f32 %v2869_v28  ;;  %v2810_v57 = vsub.f32 %v5384_v58, %v2744_v6  ;;  %v2791_v27 = vsub.f32 %v5391_v38, %v2687_v52  ;;  %2902 = vadd.xlane.f32.xlu0 %v2901_v16 }
 0x507   : > { %3790 = vpow2.f32 %v2831_v22 }
 0x508   : > { %v5555_v18 = vpop.eup %3780  ;;  %v2871_v36 = vmul.f32 1.442695, %v2810_v57  ;;  %v2833_v24 = vmul.f32 1.442695, %v2791_v27 }
 0x509   : > { %v2747_v23 = vpop.xlane.xlu0 %2746  ;;  %v2690_v15 = vpop.xlane.xlu1 %2689  ;;  %v2961_v55 = vsel %vm2672_vm15, %v5555_v18, 0.0 }
 0x50a   : > { %v2811_v9 = vsub.f32 %v5394_v62, %v2747_v23  ;;  %v2792_v3 = vsub.f32 %v5399_v54, %v2690_v15  ;;  %2962 = vadd.xlane.f32.xlu0 %v2961_v55  ;;  %3792 = vpow2.f32 %v2833_v24 }
 0x50b   : > { %3794 = vpow2.f32 %v2871_v36 }
 0x50c   : > { %v5561_v58 = vpop.eup %3782  ;;  %v2873_v38 = vmul.f32 1.442695, %v2811_v9  ;;  %v2835_v10 = vmul.f32 1.442695, %v2792_v3 }
 0x50d   : > { %v5563_v26 = vpop.eup %3784  ;;  %v2750_v25 = vpop.xlane.xlu1 %2749  ;;  %v2904_v35 = vsel %vm2672_vm15, %v5561_v58, 0.0 }
 0x50e   : > { %v2693_v33 = vpop.xlane.xlu0 %2692  ;;  %v5567_v42 = vpop.eup %3786  ;;  %3796 = vpow2.f32 %v2873_v38  ;;  %v2812_v62 = vsub.f32 %v5404_v48, %v2750_v25  ;;  %v2907_v37 = vsel %vm2672_vm15, %v5563_v26, 0.0  ;;  %2905 = vadd.xlane.f32.xlu1 %v2904_v35 }
 0x50f   : > { %v2793_v54 = vsub.f32 %v5411_v59, %v2693_v33  ;;  %2908 = vadd.xlane.f32.xlu0 %v2907_v37  ;;  %3798 = vpow2.f32 %v2835_v10  ;;  %v2964_v48 = vsel %vm2672_vm15, %v5567_v42, 0.0 }
 0x510   : > { %v5573_v43 = vpop.eup %3788  ;;  %v2875_v39 = vmul.f32 1.442695, %v2812_v62 }
 0x511   : > { %v2837_v44 = vmul.f32 1.442695, %v2793_v54  ;;  %v2696_v11 = vpop.xlane.xlu1 %2695  ;;  %v2967_v45 = vsel %vm2672_vm15, %v5573_v43, 0.0  ;;  %v5579_v30 = vpop.eup %3790 }
 0x512   : > { %v2753_v41 = vpop.xlane.xlu0 %2752  ;;  %v2794_v60 = vsub.f32 %v5419_v47, %v2696_v11  ;;  %2965 = vadd.xlane.f32.xlu1 %v2964_v48  ;;  %v2910_v52 = vsel %vm2672_vm15, %v5579_v30, 0.0 }
 0x513   : > { %v2813_v59 = vsub.f32 %v5414_v0, %v2753_v41  ;;  %3800 = vpow2.f32 %v2837_v44  ;;  %2968 = vadd.xlane.f32.xlu0 %v2967_v45 }
 0x514   : > { %3802 = vpow2.f32 %v2875_v39  ;;  %v2839_v8 = vmul.f32 1.442695, %v2794_v60  ;;  %v5583_v28 = vpop.eup %3792 }
 0x515   : > { %v2877_v1 = vmul.f32 1.442695, %v2813_v59  ;;  %v2756_v22 = vpop.xlane.xlu1 %2755  ;;  %v5587_v16 = vpop.eup %3794  ;;  %v2913_v57 = vsel %vm2672_vm15, %v5583_v28, 0.0 }
 0x516   : > { %v2699_v6 = vpop.xlane.xlu0 %2698  ;;  %v2814_v0 = vsub.f32 %v5424_v7, %v2756_v22  ;;  %2911 = vadd.xlane.f32.xlu1 %v2910_v52  ;;  %v2970_v7 = vsel %vm2672_vm15, %v5587_v16, 0.0 }
 0x517   : > { %3804 = vpow2.f32 %v2877_v1  ;;  %v2795_v47 = vsub.f32 %v5431_v13, %v2699_v6  ;;  %2914 = vadd.xlane.f32.xlu0 %v2913_v57 }
 0x518   : > { %v5593_v27 = vpop.eup %3796  ;;  %3806 = vpow2.f32 %v2839_v8  ;;  %v2879_v36 = vmul.f32 1.442695, %v2814_v0 }
 0x519   : > { %v2841_v24 = vmul.f32 1.442695, %v2795_v47  ;;  %v2702_v15 = vpop.xlane.xlu1 %2701  ;;  %v2973_v55 = vsel %vm2672_vm15, %v5593_v27, 0.0  ;;  %v5599_v9 = vpop.eup %3798 }
 0x51a   : > { %v2759_v23 = vpop.xlane.xlu0 %2758  ;;  %v2796_v3 = vsub.f32 %v5439_v46, %v2702_v15  ;;  %2971 = vadd.xlane.f32.xlu1 %v2970_v7  ;;  %v2916_v62 = vsel %vm2672_vm15, %v5599_v9, 0.0 }
 0x51b   : > { %v2815_v13 = vsub.f32 %v5434_v2, %v2759_v23  ;;  %3808 = vpow2.f32 %v2841_v24  ;;  %2974 = vadd.xlane.f32.xlu0 %v2973_v55 }
 0x51c   : > { %3810 = vpow2.f32 %v2879_v36  ;;  %v2843_v10 = vmul.f32 1.442695, %v2796_v3 }
 0x51d   : > { %v2881_v38 = vmul.f32 1.442695, %v2815_v13  ;;  %v5603_v25 = vpop.eup %3800  ;;  %v2762_v33 = vpop.xlane.xlu1 %2761 }
 0x51e   : > { %v2705_v35 = vpop.xlane.xlu0 %2704  ;;  %v5607_v54 = vpop.eup %3802  ;;  %v2816_v2 = vsub.f32 %v5444_v19, %v2762_v33  ;;  %v2919_v37 = vsel %vm2672_vm15, %v5603_v25, 0.0  ;;  %2917 = vadd.xlane.f32.xlu1 %v2916_v62 }
 0x51f   : > { %3812 = vpow2.f32 %v2881_v38  ;;  %v2797_v46 = vsub.f32 %v5451_v17, %v2705_v35  ;;  %2920 = vadd.xlane.f32.xlu0 %v2919_v37  ;;  %v2976_v19 = vsel %vm2672_vm15, %v5607_v54, 0.0 }
 0x520   : > { %3814 = vpow2.f32 %v2843_v10  ;;  %v2883_v44 = vmul.f32 1.442695, %v2816_v2 }
 0x521   : > { %v5613_v39 = vpop.eup %3804  ;;  %v2845_v41 = vmul.f32 1.442695, %v2797_v46  ;;  %v2708_v45 = vpop.xlane.xlu1 %2707 }
 0x522   : > { %v2765_v11 = vpop.xlane.xlu0 %2764  ;;  %v2979_v48 = vsel %vm2672_vm15, %v5613_v39, 0.0  ;;  %v5619_v59 = vpop.eup %3806  ;;  %v2798_v60 = vsub.f32 %v5459_v40, %v2708_v45  ;;  %2977 = vadd.xlane.f32.xlu1 %v2976_v19 }
 0x523   : > { %v2817_v17 = vsub.f32 %v5454_v12, %v2765_v11  ;;  %3816 = vpow2.f32 %v2845_v41  ;;  %2980 = vadd.xlane.f32.xlu0 %v2979_v48  ;;  %v2922_v0 = vsel %vm2672_vm15, %v5619_v59, 0.0 }
 0x524   : > { %3818 = vpow2.f32 %v2883_v44  ;;  %v2847_v8 = vmul.f32 1.442695, %v2798_v60 }
 0x525   : > { %v2885_v1 = vmul.f32 1.442695, %v2817_v17  ;;  %v5623_v22 = vpop.eup %3808  ;;  %v2768_v6 = vpop.xlane.xlu1 %2767 }
 0x526   : > { %v2711_v52 = vpop.xlane.xlu0 %2710  ;;  %v5627_v47 = vpop.eup %3810  ;;  %v2818_v12 = vsub.f32 %v5464_v49, %v2768_v6  ;;  %v2925_v57 = vsel %vm2672_vm15, %v5623_v22, 0.0  ;;  %2923 = vadd.xlane.f32.xlu1 %v2922_v0 }
 0x527   : > { %3820 = vpow2.f32 %v2885_v1  ;;  %v2799_v40 = vsub.f32 %v5471_v53, %v2711_v52  ;;  %2926 = vadd.xlane.f32.xlu0 %v2925_v57  ;;  %v2982_v49 = vsel %vm2672_vm15, %v5627_v47, 0.0 }
 0x528   : > { %3822 = vpow2.f32 %v2847_v8  ;;  %v2887_v24 = vmul.f32 1.442695, %v2818_v12 }
 0x529   : > { %v5633_v36 = vpop.eup %3812  ;;  %v2849_v23 = vmul.f32 1.442695, %v2799_v40  ;;  %v2714_v55 = vpop.xlane.xlu1 %2713 }
 0x52a   : > { %v2771_v15 = vpop.xlane.xlu0 %2770  ;;  %v2985_v7 = vsel %vm2672_vm15, %v5633_v36, 0.0  ;;  %v5639_v13 = vpop.eup %3814  ;;  %v2800_v3 = vsub.f32 %v5479_v14, %v2714_v55  ;;  %2983 = vadd.xlane.f32.xlu1 %v2982_v49 }
 0x52b   : > { %v2819_v53 = vsub.f32 %v5474_v29, %v2771_v15  ;;  %3824 = vpow2.f32 %v2849_v23  ;;  %2986 = vadd.xlane.f32.xlu0 %v2985_v7  ;;  %v2928_v2 = vsel %vm2672_vm15, %v5639_v13, 0.0 }
 0x52c   : > { %3826 = vpow2.f32 %v2887_v24  ;;  %v2851_v10 = vmul.f32 1.442695, %v2800_v3 }
 0x52d   : > { %v2889_v38 = vmul.f32 1.442695, %v2819_v53  ;;  %v5643_v33 = vpop.eup %3816  ;;  %v2774_v35 = vpop.xlane.xlu1 %2773 }
 0x52e   : > { %v2717_v62 = vpop.xlane.xlu0 %2716  ;;  %v5647_v46 = vpop.eup %3818  ;;  %v2820_v29 = vsub.f32 %v5484_v51, %v2774_v35  ;;  %v2931_v37 = vsel %vm2672_vm15, %v5643_v33, 0.0  ;;  %2929 = vadd.xlane.f32.xlu1 %v2928_v2 }
 0x52f   : > { %3828 = vpow2.f32 %v2889_v38  ;;  %v2801_v14 = vsub.f32 %v5491_v32, %v2717_v62  ;;  %2932 = vadd.xlane.f32.xlu0 %v2931_v37  ;;  %v2988_v51 = vsel %vm2672_vm15, %v5647_v46, 0.0 }
 0x530   : > { %3830 = vpow2.f32 %v2851_v10  ;;  %v2891_v41 = vmul.f32 1.442695, %v2820_v29 }
 0x531   : > { %v5653_v44 = vpop.eup %3820  ;;  %v2853_v11 = vmul.f32 1.442695, %v2801_v14  ;;  %v2720_v48 = vpop.xlane.xlu1 %2719 }
 0x532   : > { %v2777_v45 = vpop.xlane.xlu0 %2776  ;;  %v2991_v19 = vsel %vm2672_vm15, %v5653_v44, 0.0  ;;  %v5659_v17 = vpop.eup %3822  ;;  %v2802_v60 = vsub.f32 %v5499_v20, %v2720_v48  ;;  %2989 = vadd.xlane.f32.xlu1 %v2988_v51 }
 0x533   : > { %v2821_v32 = vsub.f32 %v5494_v5, %v2777_v45  ;;  %3832 = vpow2.f32 %v2853_v11  ;;  %2992 = vadd.xlane.f32.xlu0 %v2991_v19  ;;  %v2934_v12 = vsel %vm2672_vm15, %v5659_v17, 0.0 }
 0x534   : > { %3834 = vpow2.f32 %v2891_v41  ;;  %v2855_v8 = vmul.f32 1.442695, %v2802_v60 }
 0x535   : > { %v2893_v1 = vmul.f32 1.442695, %v2821_v32  ;;  %v5663_v6 = vpop.eup %3824  ;;  %v2780_v52 = vpop.xlane.xlu1 %2779 }
 0x536   : > { %v2723_v0 = vpop.xlane.xlu0 %2722  ;;  %v5667_v40 = vpop.eup %3826  ;;  %v2822_v5 = vsub.f32 %v5504_v21, %v2780_v52  ;;  %v2937_v57 = vsel %vm2672_vm15, %v5663_v6, 0.0  ;;  %2935 = vadd.xlane.f32.xlu1 %v2934_v12 }
 0x537   : > { %3836 = vpow2.f32 %v2893_v1  ;;  %v2803_v20 = vsub.f32 %v5511_v31, %v2723_v0  ;;  %2938 = vadd.xlane.f32.xlu0 %v2937_v57  ;;  %v2994_v49 = vsel %vm2672_vm15, %v5667_v40, 0.0 }
 0x538   : > { %3838 = vpow2.f32 %v2855_v8  ;;  %v2895_v23 = vmul.f32 1.442695, %v2822_v5 }
 0x539   : > { %v5673_v24 = vpop.eup %3828  ;;  %v2857_v15 = vmul.f32 1.442695, %v2803_v20  ;;  %v2726_v55 = vpop.xlane.xlu1 %2725 }
 0x53a   : > { %v2997_v7 = vsel %vm2672_vm15, %v5673_v24, 0.0  ;;  %v5679_v21 = vpop.eup %3830  ;;  %v2804_v31 = vsub.f32 %v5516_v63, %v2726_v55  ;;  %2995 = vadd.xlane.f32.xlu1 %v2994_v49 }
 0x53b   : > { %3840 = vpow2.f32 %v2857_v15  ;;  %2998 = vadd.xlane.f32.xlu0 %v2997_v7  ;;  %v2940_v10 = vsel %vm2672_vm15, %v5679_v21, 0.0 }
 0x53c   : > { %3842 = vpow2.f32 %v2895_v23  ;;  %v2859_v53 = vmul.f32 1.442695, %v2804_v31 }
 0x53d   : > { %v5682_v3 = vpop.eup %3832  ;;  %v2729_v38 = vpop.xlane.xlu0 %2728 }
 0x53e   : > { %v5686_v35 = vpop.eup %3834  ;;  %v2805_v62 = vsub.f32 %v5523_v4, %v2729_v38  ;;  %v2943_v2 = vsel %vm2672_vm15, %v5682_v3, 0.0  ;;  %2941 = vadd.xlane.f32.xlu1 %v2940_v10  ;;  %3844 = vpow2.f32 %v2859_v53 }
 0x53f   : > { %2944 = vadd.xlane.f32.xlu0 %v2943_v2  ;;  %v2732_v63 = vpop.xlane.xlu1 %2731  ;;  %v3000_v45 = vsel %vm2672_vm15, %v5686_v35, 0.0 }
 0x540   : > { %v2861_v14 = vmul.f32 1.442695, %v2805_v62  ;;  %v2806_v37 = vsub.f32 %v5529_v50, %v2732_v63 }
 0x541   : > { %v5691_v29 = vpop.eup %3836  ;;  %v2783_v41 = vpop.xlane.xlu0 %2782 }
 0x542   : > { %v3003_v11 = vsel %vm2672_vm15, %v5691_v29, 0.0  ;;  %v5698_v4 = vpop.eup %3838  ;;  %3846 = vpow2.f32 %v2861_v14  ;;  %v2863_v48 = vmul.f32 1.442695, %v2806_v37  ;;  %v2823_v19 = vsub.f32 %v5526_v61, %v2783_v41  ;;  %3001 = vadd.xlane.f32.xlu1 %v3000_v45 }
 0x543   : > { %3004 = vadd.xlane.f32.xlu0 %v3003_v11  ;;  %v2786_v51 = vpop.xlane.xlu1 %2785  ;;  %v2946_v1 = vsel %vm2672_vm15, %v5698_v4, 0.0 }
 0x544   : > { %3848 = vpow2.f32 %v2863_v48  ;;  %v2897_v32 = vmul.f32 1.442695, %v2823_v19  ;;  %v2824_v50 = vsub.f32 %v5534_v56, %v2786_v51 }
 0x545   : > { %v5702_v60 = vpop.eup %3840 }
 0x546   : > { %v5706_v8 = vpop.eup %3842  ;;  %3850 = vpow2.f32 %v2897_v32  ;;  %v2899_v52 = vmul.f32 1.442695, %v2824_v50  ;;  %v2949_v0 = vsel %vm2672_vm15, %v5702_v60, 0.0  ;;  %2947 = vadd.xlane.f32.xlu1 %v2946_v1 }
 0x547   : > { %2950 = vadd.xlane.f32.xlu0 %v2949_v0  ;;  %v3006_v61 = vsel %vm2672_vm15, %v5706_v8, 0.0 }
 0x548   : > { %3852 = vpow2.f32 %v2899_v52  ;;  %v5712_v12 = vpop.eup %3844 }
 0x549   : > { %v2952_v20 = vsel %vm2672_vm15, %v5712_v12, 0.0 }
 0x54a   : > { %3007 = vadd.xlane.f32.xlu1 %v3006_v61 }
 0x54c   : > { %v5714_v56 = vpop.eup %3846 }
 0x54d   : > { %v2955_v5 = vsel %vm2672_vm15, %v5714_v56, 0.0 }
 0x54e   : > { %v5720_v57 = vpop.eup %3848  ;;  %2956 = vadd.xlane.f32.xlu0 %v2955_v5  ;;  %2953 = vadd.xlane.f32.xlu1 %v2952_v20 }
 0x54f   : > { %v2958_v55 = vsel %vm2672_vm15, %v5720_v57, 0.0 }
 0x550   : > { %v5722_v23 = vpop.eup %3850 }
 0x551   : > { %v3009_v15 = vsel %vm2672_vm15, %v5722_v23, 0.0 }
 0x552   : > { %v5728_v7 = vpop.eup %3852  ;;  %3010 = vadd.xlane.f32.xlu0 %v3009_v15  ;;  %2959 = vadd.xlane.f32.xlu1 %v2958_v55 }
 0x553   : > { %v3012_v49 = vsel %vm2672_vm15, %v5728_v7, 0.0 }
 0x556   : > { %3013 = vadd.xlane.f32.xlu1 %v3012_v49 }
 0x593   : > { %v2903_v31 = vpop.xlane.xlu0 %2902 }
 0x594   : > { %3854 = vrcp.f32 %v2903_v31 }
 0x597   : > { %v2963_v53 = vpop.xlane.xlu0 %2962 }
 0x598   : > { %3856 = vrcp.f32 %v2963_v53 }
 0x59b   : > { %v2906_v38 = vpop.xlane.xlu1 %2905 }
 0x59c   : > { %v2909_v10 = vpop.xlane.xlu0 %2908  ;;  %3858 = vrcp.f32 %v2906_v38 }
 0x59d   : > { %3860 = vrcp.f32 %v2909_v10 }
 0x59e   : > { %v3855_v62 = vpop.eup %3854 }
 0x59f   : > { %v3053_v2 = vmul.f32 %v3855_v62, %v2903_v31  ;;  %v2966_v63 = vpop.xlane.xlu1 %2965 }
 0x5a0   : > { %v2969_v14 = vpop.xlane.xlu0 %2968  ;;  %3862 = vrcp.f32 %v2966_v63 }
 0x5a1   : > { %v3091_v37 = vsub.f32 2.0, %v3053_v2  ;;  %3864 = vrcp.f32 %v2969_v14 }
 0x5a2   : > { %v3857_v41 = vpop.eup %3856 }
 0x5a3   : > { %v3129_v11 = vmul.f32 %v3855_v62, %v3091_v37  ;;  %v3073_v45 = vmul.f32 %v3857_v41, %v2963_v53  ;;  %v2912_v48 = vpop.xlane.xlu1 %2911 }
 0x5a4   : > { %v2915_v19 = vpop.xlane.xlu0 %2914  ;;  %3866 = vrcp.f32 %v2912_v48 }
 0x5a5   : > { %v3167_v51 = vmul.f32 %v5549_v34, %v3129_v11  ;;  %v3111_v32 = vsub.f32 2.0, %v3073_v45  ;;  %3868 = vrcp.f32 %v2915_v19 }
 0x5a6   : > { %v3859_v50 = vpop.eup %3858 }
 0x5a7   : > { %v3861_v1 = vpop.eup %3860  ;;  %3205 = vst.msk [vmem:[%s5941_s10] sm:$0xff] %vm2672_vm15, %v3167_v51  ;;  %v3149_v52 = vmul.f32 %v3857_v41, %v3111_v32  ;;  %v3054_v0 = vmul.f32 %v3859_v50, %v2906_v38  ;;  %v2972_v61 = vpop.xlane.xlu1 %2971 }
 0x5a8   : > { %v3055_v5 = vmul.f32 %v3861_v1, %v2909_v10  ;;  %v2975_v20 = vpop.xlane.xlu0 %2974  ;;  %3870 = vrcp.f32 %v2972_v61 }
 0x5a9   : > { %v3187_v15 = vmul.f32 %v5555_v18, %v3149_v52  ;;  %v3092_v55 = vsub.f32 2.0, %v3054_v0  ;;  %3872 = vrcp.f32 %v2975_v20 }
 0x5aa   : > { %v3863_v34 = vpop.eup %3862  ;;  %v3093_v49 = vsub.f32 2.0, %v3055_v5 }
 0x5ab   : > { %v3865_v31 = vpop.eup %3864  ;;  %3225 = vst.msk [vmem:[%s5941_s10 + $0xa0] sm:$0xff] %vm2672_vm15, %v3187_v15  ;;  %v3130_v53 = vmul.f32 %v3859_v50, %v3092_v55  ;;  %v3074_v62 = vmul.f32 %v3863_v34, %v2966_v63  ;;  %v2918_v2 = vpop.xlane.xlu1 %2917 }
 0x5ac   : > { %v3131_v38 = vmul.f32 %v3861_v1, %v3093_v49  ;;  %v3075_v37 = vmul.f32 %v3865_v31, %v2969_v14  ;;  %v2921_v10 = vpop.xlane.xlu0 %2920  ;;  %3874 = vrcp.f32 %v2918_v2 }
 0x5ad   : > { %v3168_v41 = vmul.f32 %v5561_v58, %v3130_v53  ;;  %v3112_v18 = vsub.f32 2.0, %v3074_v62  ;;  %3876 = vrcp.f32 %v2921_v10 }
 0x5ae   : > { %v3867_v11 = vpop.eup %3866  ;;  %v3169_v45 = vmul.f32 %v5563_v26, %v3131_v38  ;;  %v3113_v51 = vsub.f32 2.0, %v3075_v37 }
 0x5af   : > { %v3869_v32 = vpop.eup %3868  ;;  %3206 = vst.msk [vmem:[%s5941_s10 + $0x8] sm:$0xff] %vm2672_vm15, %v3168_v41  ;;  %v3150_v63 = vmul.f32 %v3863_v34, %v3112_v18  ;;  %v3056_v50 = vmul.f32 %v3867_v11, %v2912_v48  ;;  %v2978_v1 = vpop.xlane.xlu1 %2977 }
 0x5b0   : > { %3207 = vst.msk [vmem:[%s5941_s10 + $0x10] sm:$0xff] %vm2672_vm15, %v3169_v45  ;;  %v3151_v58 = vmul.f32 %v3865_v31, %v3113_v51  ;;  %v3057_v14 = vmul.f32 %v3869_v32, %v2915_v19  ;;  %v2981_v52 = vpop.xlane.xlu0 %2980  ;;  %3878 = vrcp.f32 %v2978_v1 }
 0x5b1   : > { %v3188_v26 = vmul.f32 %v5567_v42, %v3150_v63  ;;  %v3094_v0 = vsub.f32 2.0, %v3056_v50  ;;  %3880 = vrcp.f32 %v2981_v52 }
 0x5b2   : > { %v3871_v5 = vpop.eup %3870  ;;  %v3189_v15 = vmul.f32 %v5573_v43, %v3151_v58  ;;  %v3095_v55 = vsub.f32 2.0, %v3057_v14 }
 0x5b3   : > { %v3873_v34 = vpop.eup %3872  ;;  %3226 = vst.msk [vmem:[%s5941_s10 + $0xa8] sm:$0xff] %vm2672_vm15, %v3188_v26  ;;  %v3132_v48 = vmul.f32 %v3867_v11, %v3094_v0  ;;  %v3076_v49 = vmul.f32 %v3871_v5, %v2972_v61  ;;  %v2924_v31 = vpop.xlane.xlu1 %2923 }
 0x5b4   : > { %3227 = vst.msk [vmem:[%s5941_s10 + $0xb0] sm:$0xff] %vm2672_vm15, %v3189_v15  ;;  %v3133_v42 = vmul.f32 %v3869_v32, %v3095_v55  ;;  %v3077_v19 = vmul.f32 %v3873_v34, %v2975_v20  ;;  %v2927_v53 = vpop.xlane.xlu0 %2926  ;;  %3882 = vrcp.f32 %v2924_v31 }
 0x5b5   : > { %v3170_v43 = vmul.f32 %v5579_v30, %v3132_v48  ;;  %v3114_v62 = vsub.f32 2.0, %v3076_v49  ;;  %3884 = vrcp.f32 %v2927_v53 }
 0x5b6   : > { %v3875_v38 = vpop.eup %3874  ;;  %v3171_v37 = vmul.f32 %v5583_v28, %v3133_v42  ;;  %v3115_v41 = vsub.f32 2.0, %v3077_v19 }
 0x5b7   : > { %v3877_v18 = vpop.eup %3876  ;;  %3208 = vst.msk [vmem:[%s5941_s10 + $0x18] sm:$0xff] %vm2672_vm15, %v3170_v43  ;;  %v3152_v61 = vmul.f32 %v3871_v5, %v3114_v62  ;;  %v3058_v11 = vmul.f32 %v3875_v38, %v2918_v2  ;;  %v2984_v45 = vpop.xlane.xlu1 %2983 }
 0x5b8   : > { %3209 = vst.msk [vmem:[%s5941_s10 + $0x20] sm:$0xff] %vm2672_vm15, %v3171_v37  ;;  %v3153_v30 = vmul.f32 %v3873_v34, %v3115_v41  ;;  %v3059_v20 = vmul.f32 %v3877_v18, %v2921_v10  ;;  %v2987_v51 = vpop.xlane.xlu0 %2986  ;;  %3886 = vrcp.f32 %v2984_v45 }
 0x5b9   : > { %v3190_v28 = vmul.f32 %v5587_v16, %v3152_v61  ;;  %v3096_v32 = vsub.f32 2.0, %v3058_v11  ;;  %3888 = vrcp.f32 %v2987_v51 }
 0x5ba   : > { %v3879_v63 = vpop.eup %3878  ;;  %v3191_v50 = vmul.f32 %v5593_v27, %v3153_v30  ;;  %v3097_v58 = vsub.f32 2.0, %v3059_v20 }
 0x5bb   : > { %v3881_v14 = vpop.eup %3880  ;;  %3228 = vst.msk [vmem:[%s5941_s10 + $0xb8] sm:$0xff] %vm2672_vm15, %v3190_v28  ;;  %v3134_v2 = vmul.f32 %v3875_v38, %v3096_v32  ;;  %v3078_v26 = vmul.f32 %v3879_v63, %v2978_v1  ;;  %v2930_v0 = vpop.xlane.xlu1 %2929 }
 0x5bc   : > { %3229 = vst.msk [vmem:[%s5941_s10 + $0xc0] sm:$0xff] %vm2672_vm15, %v3191_v50  ;;  %v3135_v16 = vmul.f32 %v3877_v18, %v3097_v58  ;;  %v3079_v10 = vmul.f32 %v3881_v14, %v2981_v52  ;;  %v2933_v5 = vpop.xlane.xlu0 %2932  ;;  %3890 = vrcp.f32 %v2930_v0 }
 0x5bd   : > { %v3172_v27 = vmul.f32 %v5599_v9, %v3134_v2  ;;  %v3116_v15 = vsub.f32 2.0, %v3078_v26  ;;  %3892 = vrcp.f32 %v2933_v5 }
 0x5be   : > { %v3883_v55 = vpop.eup %3882  ;;  %v3173_v34 = vmul.f32 %v5603_v25, %v3135_v16  ;;  %v3117_v48 = vsub.f32 2.0, %v3079_v10 }
 0x5bf   : > { %v3885_v49 = vpop.eup %3884  ;;  %3210 = vst.msk [vmem:[%s5941_s10 + $0x28] sm:$0xff] %vm2672_vm15, %v3172_v27  ;;  %v3154_v1 = vmul.f32 %v3879_v63, %v3116_v15  ;;  %v3060_v42 = vmul.f32 %v3883_v55, %v2924_v31  ;;  %v2990_v19 = vpop.xlane.xlu1 %2989 }
 0x5c0   : > { %3211 = vst.msk [vmem:[%s5941_s10 + $0x30] sm:$0xff] %vm2672_vm15, %v3173_v34  ;;  %v3155_v9 = vmul.f32 %v3881_v14, %v3117_v48  ;;  %v3061_v52 = vmul.f32 %v3885_v49, %v2927_v53  ;;  %v2993_v43 = vpop.xlane.xlu0 %2992  ;;  %3894 = vrcp.f32 %v2990_v19 }
 0x5c1   : > { %v3192_v25 = vmul.f32 %v5607_v54, %v3154_v1  ;;  %v3098_v62 = vsub.f32 2.0, %v3060_v42  ;;  %3896 = vrcp.f32 %v2993_v43 }
 0x5c2   : > { %v3887_v38 = vpop.eup %3886  ;;  %v3193_v37 = vmul.f32 %v5613_v39, %v3155_v9  ;;  %v3099_v41 = vsub.f32 2.0, %v3061_v52 }
 0x5c3   : > { %v3889_v18 = vpop.eup %3888  ;;  %3230 = vst.msk [vmem:[%s5941_s10 + $0xc8] sm:$0xff] %vm2672_vm15, %v3192_v25  ;;  %v3136_v31 = vmul.f32 %v3883_v55, %v3098_v62  ;;  %v3080_v61 = vmul.f32 %v3887_v38, %v2984_v45  ;;  %v2936_v11 = vpop.xlane.xlu1 %2935 }
 0x5c4   : > { %3231 = vst.msk [vmem:[%s5941_s10 + $0xd0] sm:$0xff] %vm2672_vm15, %v3193_v37  ;;  %v3137_v54 = vmul.f32 %v3885_v49, %v3099_v41  ;;  %v3081_v53 = vmul.f32 %v3889_v18, %v2987_v51  ;;  %v2939_v30 = vpop.xlane.xlu0 %2938  ;;  %3898 = vrcp.f32 %v2936_v11 }
 0x5c5   : > { %v3174_v39 = vmul.f32 %v5619_v59, %v3136_v31  ;;  %v3118_v20 = vsub.f32 2.0, %v3080_v61  ;;  %3900 = vrcp.f32 %v2939_v30 }
 0x5c6   : > { %v3891_v28 = vpop.eup %3890  ;;  %v3175_v32 = vmul.f32 %v5623_v22, %v3137_v54  ;;  %v3119_v63 = vsub.f32 2.0, %v3081_v53 }
 0x5c7   : > { %v3893_v50 = vpop.eup %3892  ;;  %3212 = vst.msk [vmem:[%s5941_s10 + $0x38] sm:$0xff] %vm2672_vm15, %v3174_v39  ;;  %v3156_v45 = vmul.f32 %v3887_v38, %v3118_v20  ;;  %v3062_v58 = vmul.f32 %v3891_v28, %v2930_v0  ;;  %v2996_v14 = vpop.xlane.xlu1 %2995 }
 0x5c8   : > { %3213 = vst.msk [vmem:[%s5941_s10 + $0x40] sm:$0xff] %vm2672_vm15, %v3175_v32  ;;  %v3157_v59 = vmul.f32 %v3889_v18, %v3119_v63  ;;  %v3063_v51 = vmul.f32 %v3893_v50, %v2933_v5  ;;  %v2999_v2 = vpop.xlane.xlu0 %2998  ;;  %3902 = vrcp.f32 %v2996_v14 }
 0x5c9   : > { %v3194_v22 = vmul.f32 %v5627_v47, %v3156_v45  ;;  %v3100_v26 = vsub.f32 2.0, %v3062_v58  ;;  %3904 = vrcp.f32 %v2999_v2 }
 0x5ca   : > { %v3895_v16 = vpop.eup %3894  ;;  %v3195_v10 = vmul.f32 %v5633_v36, %v3157_v59  ;;  %v3101_v27 = vsub.f32 2.0, %v3063_v51 }
 0x5cb   : > { %v3897_v15 = vpop.eup %3896  ;;  %3232 = vst.msk [vmem:[%s5941_s10 + $0xd8] sm:$0xff] %vm2672_vm15, %v3194_v22  ;;  %v3138_v0 = vmul.f32 %v3891_v28, %v3100_v26  ;;  %v3082_v55 = vmul.f32 %v3895_v16, %v2990_v19  ;;  %v2942_v34 = vpop.xlane.xlu1 %2941 }
 0x5cc   : > { %3233 = vst.msk [vmem:[%s5941_s10 + $0xe0] sm:$0xff] %vm2672_vm15, %v3195_v10  ;;  %v3139_v47 = vmul.f32 %v3893_v50, %v3101_v27  ;;  %v3083_v5 = vmul.f32 %v3897_v15, %v2993_v43  ;;  %v2945_v48 = vpop.xlane.xlu0 %2944  ;;  %3906 = vrcp.f32 %v2942_v34 }
 0x5cd   : > { %v3176_v36 = vmul.f32 %v5639_v13, %v3138_v0  ;;  %v3120_v49 = vsub.f32 2.0, %v3082_v55  ;;  %3908 = vrcp.f32 %v2945_v48 }
 0x5ce   : > { %v3899_v1 = vpop.eup %3898  ;;  %v3177_v42 = vmul.f32 %v5643_v33, %v3139_v47  ;;  %v3121_v9 = vsub.f32 2.0, %v3083_v5 }
 0x5cf   : > { %v3901_v52 = vpop.eup %3900  ;;  %3214 = vst.msk [vmem:[%s5941_s10 + $0x48] sm:$0xff] %vm2672_vm15, %v3176_v36  ;;  %v3158_v19 = vmul.f32 %v3895_v16, %v3120_v49  ;;  %v3064_v25 = vmul.f32 %v3899_v1, %v2936_v11  ;;  %v3002_v62 = vpop.xlane.xlu1 %3001 }
 0x5d0   : > { %3215 = vst.msk [vmem:[%s5941_s10 + $0x50] sm:$0xff] %vm2672_vm15, %v3177_v42  ;;  %v3159_v13 = vmul.f32 %v3897_v15, %v3121_v9  ;;  %v3065_v43 = vmul.f32 %v3901_v52, %v2939_v30  ;;  %v3005_v38 = vpop.xlane.xlu0 %3004  ;;  %3910 = vrcp.f32 %v3002_v62 }
 0x5d1   : > { %v3196_v33 = vmul.f32 %v5647_v46, %v3158_v19  ;;  %v3102_v37 = vsub.f32 2.0, %v3064_v25  ;;  %3912 = vrcp.f32 %v3005_v38 }
 0x5d2   : > { %v3903_v41 = vpop.eup %3902  ;;  %v3197_v18 = vmul.f32 %v5653_v44, %v3159_v13  ;;  %v3103_v31 = vsub.f32 2.0, %v3065_v43 }
 0x5d3   : > { %v3905_v61 = vpop.eup %3904  ;;  %3234 = vst.msk [vmem:[%s5941_s10 + $0xe8] sm:$0xff] %vm2672_vm15, %v3196_v33  ;;  %v3140_v11 = vmul.f32 %v3899_v1, %v3102_v37  ;;  %v3084_v54 = vmul.f32 %v3903_v41, %v2996_v14  ;;  %v2948_v53 = vpop.xlane.xlu1 %2947 }
 0x5d4   : > { %3235 = vst.msk [vmem:[%s5941_s10 + $0xf0] sm:$0xff] %vm2672_vm15, %v3197_v18  ;;  %v3141_v46 = vmul.f32 %v3901_v52, %v3103_v31  ;;  %v3085_v30 = vmul.f32 %v3905_v61, %v2999_v2  ;;  %v2951_v39 = vpop.xlane.xlu0 %2950  ;;  %3914 = vrcp.f32 %v2948_v53 }
 0x5d5   : > { %v3178_v44 = vmul.f32 %v5659_v17, %v3140_v11  ;;  %v3122_v20 = vsub.f32 2.0, %v3084_v54  ;;  %3916 = vrcp.f32 %v2951_v39 }
 0x5d6   : > { %v3907_v28 = vpop.eup %3906  ;;  %v3179_v32 = vmul.f32 %v5663_v6, %v3141_v46  ;;  %v3123_v63 = vsub.f32 2.0, %v3085_v30 }
 0x5d7   : > { %v3909_v50 = vpop.eup %3908  ;;  %3216 = vst.msk [vmem:[%s5941_s10 + $0x58] sm:$0xff] %vm2672_vm15, %v3178_v44  ;;  %v3160_v45 = vmul.f32 %v3903_v41, %v3122_v20  ;;  %v3066_v58 = vmul.f32 %v3907_v28, %v2942_v34  ;;  %v3008_v14 = vpop.xlane.xlu1 %3007 }
 0x5d8   : > { %3217 = vst.msk [vmem:[%s5941_s10 + $0x60] sm:$0xff] %vm2672_vm15, %v3179_v32  ;;  %v3161_v17 = vmul.f32 %v3905_v61, %v3123_v63  ;;  %v3067_v59 = vmul.f32 %v3909_v50, %v2945_v48  ;;  %3918 = vrcp.f32 %v3008_v14 }
 0x5d9   : > { %v3198_v6 = vmul.f32 %v5667_v40, %v3160_v45  ;;  %v3104_v51 = vsub.f32 2.0, %v3066_v58 }
 0x5da   : > { %v3911_v2 = vpop.eup %3910  ;;  %v3199_v22 = vmul.f32 %v5673_v24, %v3161_v17  ;;  %v3105_v26 = vsub.f32 2.0, %v3067_v59 }
 0x5db   : > { %v3913_v16 = vpop.eup %3912  ;;  %3236 = vst.msk [vmem:[%s5941_s10 + $0xf8] sm:$0xff] %vm2672_vm15, %v3198_v6  ;;  %v3142_v10 = vmul.f32 %v3907_v28, %v3104_v51  ;;  %v3086_v27 = vmul.f32 %v3911_v2, %v3002_v62  ;;  %v2957_v15 = vpop.xlane.xlu0 %2956 }
 0x5dc   : > { %v2954_v0 = vpop.xlane.xlu1 %2953  ;;  %3237 = vst.msk [vmem:[%s5941_s10 + $0x100] sm:$0xff] %vm2672_vm15, %v3199_v22  ;;  %v3143_v40 = vmul.f32 %v3909_v50, %v3105_v26  ;;  %v3087_v55 = vmul.f32 %v3913_v16, %v3005_v38  ;;  %3920 = vrcp.f32 %v2957_v15 }
 0x5dd   : > { %v3180_v24 = vmul.f32 %v5679_v21, %v3142_v10  ;;  %v3124_v34 = vsub.f32 2.0, %v3086_v27  ;;  %3922 = vrcp.f32 %v2954_v0 }
 0x5de   : > { %v3915_v47 = vpop.eup %3914  ;;  %v3181_v5 = vmul.f32 %v5682_v3, %v3143_v40  ;;  %v3125_v48 = vsub.f32 2.0, %v3087_v55 }
 0x5df   : > { %v3917_v36 = vpop.eup %3916  ;;  %3218 = vst.msk [vmem:[%s5941_s10 + $0x68] sm:$0xff] %vm2672_vm15, %v3180_v24  ;;  %v3162_v49 = vmul.f32 %v3911_v2, %v3124_v34  ;;  %v3068_v1 = vmul.f32 %v3915_v47, %v2948_v53  ;;  %v3011_v42 = vpop.xlane.xlu0 %3010 }
 0x5e0   : > { %v2960_v9 = vpop.xlane.xlu1 %2959  ;;  %3219 = vst.msk [vmem:[%s5941_s10 + $0x70] sm:$0xff] %vm2672_vm15, %v3181_v5  ;;  %v3163_v21 = vmul.f32 %v3913_v16, %v3125_v48  ;;  %v3069_v52 = vmul.f32 %v3917_v36, %v2951_v39  ;;  %3924 = vrcp.f32 %v3011_v42 }
 0x5e1   : > { %v3200_v3 = vmul.f32 %v5686_v35, %v3162_v49  ;;  %v3106_v19 = vsub.f32 2.0, %v3068_v1  ;;  %3926 = vrcp.f32 %v2960_v9 }
 0x5e2   : > { %v3919_v25 = vpop.eup %3918  ;;  %v3201_v62 = vmul.f32 %v5691_v29, %v3163_v21  ;;  %v3107_v13 = vsub.f32 2.0, %v3069_v52 }
 0x5e3   : > { %3238 = vst.msk [vmem:[%s5941_s10 + $0x108] sm:$0xff] %vm2672_vm15, %v3200_v3  ;;  %v3144_v43 = vmul.f32 %v3915_v47, %v3106_v19  ;;  %v3088_v38 = vmul.f32 %v3919_v25, %v3008_v14 }
 0x5e4   : > { %v3014_v33 = vpop.xlane.xlu1 %3013  ;;  %3239 = vst.msk [vmem:[%s5941_s10 + $0x110] sm:$0xff] %vm2672_vm15, %v3201_v62  ;;  %v3145_v35 = vmul.f32 %v3917_v36, %v3107_v13 }
 0x5e5   : > { %3928 = vrcp.f32 %v3014_v33  ;;  %v3182_v37 = vmul.f32 %v5698_v4, %v3144_v43  ;;  %v3126_v41 = vsub.f32 2.0, %v3088_v38 }
 0x5e6   : > { %v3921_v29 = vpop.eup %3920  ;;  %v3183_v18 = vmul.f32 %v5702_v60, %v3145_v35 }
 0x5e7   : > { %v3923_v31 = vpop.eup %3922  ;;  %3220 = vst.msk [vmem:[%s5941_s10 + $0x78] sm:$0xff] %vm2672_vm15, %v3182_v37  ;;  %v3164_v61 = vmul.f32 %v3919_v25, %v3126_v41  ;;  %v3071_v11 = vmul.f32 %v3921_v29, %v2957_v15 }
 0x5e8   : > { %3221 = vst.msk [vmem:[%s5941_s10 + $0x80] sm:$0xff] %vm2672_vm15, %v3183_v18  ;;  %v3070_v54 = vmul.f32 %v3923_v31, %v2954_v0 }
 0x5e9   : > { %v3202_v4 = vmul.f32 %v5706_v8, %v3164_v61  ;;  %v3109_v53 = vsub.f32 2.0, %v3071_v11 }
 0x5ea   : > { %v3925_v46 = vpop.eup %3924  ;;  %v3108_v30 = vsub.f32 2.0, %v3070_v54 }
 0x5eb   : > { %v3927_v60 = vpop.eup %3926  ;;  %3240 = vst.msk [vmem:[%s5941_s10 + $0x118] sm:$0xff] %vm2672_vm15, %v3202_v4  ;;  %v3147_v39 = vmul.f32 %v3921_v29, %v3109_v53  ;;  %v3089_v44 = vmul.f32 %v3925_v46, %v3011_v42 }
 0x5ec   : > { %v3146_v20 = vmul.f32 %v3923_v31, %v3108_v30  ;;  %v3072_v28 = vmul.f32 %v3927_v60, %v2960_v9 }
 0x5ed   : > { %v3185_v32 = vmul.f32 %v5714_v56, %v3147_v39  ;;  %v3127_v63 = vsub.f32 2.0, %v3089_v44 }
 0x5ee   : > { %v3184_v45 = vmul.f32 %v5712_v12, %v3146_v20  ;;  %v3110_v8 = vsub.f32 2.0, %v3072_v28 }
 0x5ef   : > { %v3929_v50 = vpop.eup %3928  ;;  %3223 = vst.msk [vmem:[%s5941_s10 + $0x90] sm:$0xff] %vm2672_vm15, %v3185_v32  ;;  %v3165_v58 = vmul.f32 %v3925_v46, %v3127_v63 }
 0x5f0   : > { %v3090_v14 = vmul.f32 %v3929_v50, %v3014_v33  ;;  %3222 = vst.msk [vmem:[%s5941_s10 + $0x88] sm:$0xff] %vm2672_vm15, %v3184_v45  ;;  %v3148_v17 = vmul.f32 %v3927_v60, %v3110_v8 }
 0x5f1   : > { %v3203_v56 = vmul.f32 %v5722_v23, %v3165_v58 }
 0x5f2   : > { %v3128_v59 = vsub.f32 2.0, %v3090_v14  ;;  %v3186_v6 = vmul.f32 %v5720_v57, %v3148_v17 }
 0x5f3   : > { %3241 = vst.msk [vmem:[%s5941_s10 + $0x120] sm:$0xff] %vm2672_vm15, %v3203_v56 }
 0x5f4   : > { %v3166_v12 = vmul.f32 %v3929_v50, %v3128_v59  ;;  %3224 = vst.msk [vmem:[%s5941_s10 + $0x98] sm:$0xff] %vm2672_vm15, %v3186_v6 }
 0x5f6   : > { %v3204_v51 = vmul.f32 %v5728_v7, %v3166_v12 }
 0x5f8   : > { %3242 = vst.msk [vmem:[%s5941_s10 + $0x128] sm:$0xff] %vm2672_vm15, %v3204_v51 }
 0x5f9 PF: > { %s20_s15 = sadd.s32 1, %s3952_s15   ;;  %s5942_s13 = smov %s3948_s14 }
 0x5fa   : > { %p17_p9 = scmp.ge.s32.totalorder %s20_s15, 6   ;;  %s5943_s14 = smov %s5945_s16 }
 0x5fc   :  { %19 = sbr.rel (!%p17_p9) target bundleno = 2 (0x2), region = 116 }

</bundles_post_ra>
